<compile_context>
chip_gen: v7x
topology: tpu7x:2x2x1
jax: 0.10.0
libtpu: 0.0.40
codegen_flags: <defaults>
</compile_context>

<pallas_src>
import functools

import jax
import jax.numpy as jnp
import numpy as np
from jax.experimental import pallas as pl
from jax.experimental.pallas import tpu as pltpu

OBJ_LENGTH = 64
HIDDEN = 256
PAIRS = 6
PAIR_IDX = ((0, 1), (0, 2), (0, 3), (1, 2), (1, 3), (2, 3))


def _round_up(x, m):
    return ((x + m - 1) // m) * m


def _default_fuse_w1():
    """Fused K=256 layer-1 on 256-deep MXUs (v6e/v7x); split-W1 on v5e / unknown v5."""
    try:
        kind = jax.devices()[0].device_kind.lower()
    except Exception:
        return True
    return "v5" not in kind


def _rn_kernel(
    x_ref,                         # [TB, 4*OBJ_LENGTH]  input embeddings tile
    w1_ref, b1_ref,                # fused: [256, 6*256] W1_six | split: [64, 512] [top|bot]
    w2_ref, b2_ref,                # g_fc2
    w3_ref, b3_ref,                # g_fc3
    w4_ref, b4_ref,                # g_fc4
    fw_ref, fb_ref,                # f_fc1
    ow2_ref, ob2_ref,              # fcout.fc2
    ow3t_ref, ob3_ref,             # fcout.fc3 transposed: [1, 256], [1, 1]
    out_ref,                       # [1, TB]  (batch on the lane axis)
    h1_ref,                        # VMEM scratch [6*TB, 256] (compute dtype)
    *, tb: int, fused_w1: bool,
):
    f32 = jnp.float32
    cdt = w2_ref.dtype             # matmul-operand dtype (bf16 default, f32 optional)
    relu = lambda v: jnp.maximum(v, 0.0)

    x = x_ref[...].astype(cdt)     # [TB, 256]
    b1 = b1_ref[...]               # f32

    if fused_w1:
        # Single K=256 dot against the zero-scattered W1_six: column block p already equals
        # obj_i @ W1_top + obj_j @ W1_bot for pair p = (i, j).
        h1_all = jnp.dot(x, w1_ref[...], preferred_element_type=f32)      # [TB, 6*256]
        for p in range(PAIRS):
            h1 = relu(h1_all[:, p * HIDDEN:(p + 1) * HIDDEN] + b1)
            h1_ref[p * tb:(p + 1) * tb, :] = h1.astype(h1_ref.dtype)
    else:
        # Per-object layer-1 partials: T[k] = obj_k @ [W1_top | W1_bot]  -> [TB, 512]
        w1c = w1_ref[...]                                                  # [64, 512]
        t = [
            jnp.dot(x[:, k * OBJ_LENGTH:(k + 1) * OBJ_LENGTH], w1c,
                    preferred_element_type=f32)
            for k in range(4)
        ]
        # pair (i, j): concat(obj_i, obj_j) @ W1 == obj_i @ W1_top + obj_j @ W1_bot
        for p, (i, j) in enumerate(PAIR_IDX):
            h1 = relu(t[i][:, :HIDDEN] + t[j][:, HIDDEN:] + b1)
            h1_ref[p * tb:(p + 1) * tb, :] = h1.astype(h1_ref.dtype)

    # g layers 2..4 over all 6*TB pair rows at once (large-M MXU matmuls).
    h = h1_ref[...]
    h = relu(jnp.dot(h, w2_ref[...], preferred_element_type=f32) + b2_ref[...]).astype(cdt)
    h = relu(jnp.dot(h, w3_ref[...], preferred_element_type=f32) + b3_ref[...]).astype(cdt)
    h = relu(jnp.dot(h, w4_ref[...], preferred_element_type=f32) + b4_ref[...])   # f32

    # Sum over the 6 pairings: aligned [TB, 256] slices, pure VPU adds.
    acc = h[0:tb, :]
    for p in range(1, PAIRS):
        acc = acc + h[p * tb:(p + 1) * tb, :]
    acc = acc.astype(cdt)

    # f network + BCE head.
    f1 = relu(jnp.dot(acc, fw_ref[...], preferred_element_type=f32) + fb_ref[...]).astype(cdt)
    f2 = relu(jnp.dot(f1, ow2_ref[...], preferred_element_type=f32) + ob2_ref[...]).astype(cdt)
    # dropout: identity (see TODO at top of file)

    # Lane-dense logits: contract dim 1 of both operands -> [1, TB], no explicit transpose.
    logits_t = jax.lax.dot_general(
        ow3t_ref[...], f2,
        dimension_numbers=(((1,), (1,)), ((), ())),
        preferred_element_type=f32) + ob3_ref[...]
    out_ref[...] = jax.nn.sigmoid(logits_t)


def rn_forward(input_feats, params, *, matmul_dtype=jnp.bfloat16, tb=None, fuse_w1=None):
    """input_feats: [B, 4*OBJ_LENGTH] float32 (args.autoencoder=True path)."""
    B = input_feats.shape[0]
    (w1, b1, w2, b2, w3, b3, w4, b4, fw, fb, ow2, ob2, ow3, ob3) = params

    if fuse_w1 is None:
        fuse_w1 = _default_fuse_w1()

    # Batch tile: 256 by default (512 for very large B); 8-aligned single tile for tiny
    # batches.  Multiples of 128 keep output stores lane-dense; VMEM footprint is bounded
    # explicitly below (v5e scoped default is 16 MiB, v7x physical VMEM is 64 MiB).
    if tb is None:
        if B <= 256:
            tb = _round_up(B, 8)
        elif B <= 2048:
            tb = 256            # keeps grid_b >= 2 at mid-size B (v7x has 2 TCs)
        else:
            tb = 512
    grid_b = pl.cdiv(B, tb)
    b_pad = grid_b * tb

    x = input_feats
    if b_pad != B:
        x = jnp.pad(x, ((0, b_pad - B), (0, 0)))

    cdt = matmul_dtype
    if fuse_w1:
        # W1_six: six [256, 256] blocks (one per pair), each zero except rows
        # 64i:64i+64 = W1_top and 64j:64j+64 = W1_bot, concatenated along N -> [256, 1536].
        w1_top, w1_bot = w1[:OBJ_LENGTH], w1[OBJ_LENGTH:]
        blocks = []
        for (i, j) in PAIR_IDX:
            m = jnp.zeros((4 * OBJ_LENGTH, HIDDEN), w1.dtype)
            m = m.at[i * OBJ_LENGTH:(i + 1) * OBJ_LENGTH].set(w1_top)
            m = m.at[j * OBJ_LENGTH:(j + 1) * OBJ_LENGTH].set(w1_bot)
            blocks.append(m)
        w1_mat = jnp.concatenate(blocks, axis=1).astype(cdt)               # [256, 1536]
    else:
        # Split-W1 trick: [W1_top | W1_bot] so pair(i,j) layer-1 = obj_i@top + obj_j@bot + b1.
        w1_mat = jnp.concatenate([w1[:OBJ_LENGTH], w1[OBJ_LENGTH:]], axis=1).astype(cdt)  # [64, 512]

    ow3_t = ow3.T.astype(cdt)                                              # [1, 256]
    w2c, w3c, w4c, fwc, ow2c = (m.astype(cdt) for m in (w2, w3, w4, fw, ow2))

    inputs = (x, w1_mat, b1, w2c, b2, w3c, b3, w4c, b4, fwc, fb, ow2c, ob2, ow3_t, ob3)

    in_specs = [pl.BlockSpec((tb, 4 * OBJ_LENGTH), lambda i: (i, 0))]   # batch-tiled input
    # Weights/biases: full-extent blocks, constant index_map -> fetched once, stay resident.
    in_specs += [pl.BlockSpec(a.shape, lambda i: (0, 0)) for a in inputs[1:]]

    out_shape = jax.ShapeDtypeStruct((1, b_pad), jnp.float32)
    out_specs = pl.BlockSpec((1, tb), lambda i: (0, i))

    l1_flops = 2 * HIDDEN * (PAIRS * HIDDEN) if fuse_w1 else 2 * 4 * OBJ_LENGTH * 2 * HIDDEN
    flops = b_pad * (l1_flops + PAIRS * 3 * 2 * HIDDEN * HIDDEN
                     + 2 * 2 * HIDDEN * HIDDEN + 2 * HIDDEN)
    bytes_accessed = int(
        x.size * x.dtype.itemsize
        + sum(int(a.size) * a.dtype.itemsize for a in inputs[1:])
        + b_pad * 4
    )

    kernel = functools.partial(_rn_kernel, tb=tb, fused_w1=fuse_w1)
    out = pl.pallas_call(
        kernel,
        grid=(grid_b,),
        in_specs=in_specs,
        out_specs=out_specs,
        out_shape=out_shape,
        scratch_shapes=[pltpu.VMEM((PAIRS * tb, HIDDEN), cdt)],
        compiler_params=pltpu.CompilerParams(
            dimension_semantics=("parallel",),
            vmem_limit_bytes=48 * 1024 * 1024),
        cost_estimate=pl.CostEstimate(
            flops=flops, transcendentals=b_pad, bytes_accessed=bytes_accessed),
    )(*inputs)
    return out[0, :B].reshape(B, 1)


def init_params(key):
    """Deterministic init mimicking nn.Linear (uniform +/- 1/sqrt(fan_in)).

    Weights are stored transposed vs. PyTorch: [in_features, out_features],
    so the kernel computes x @ W + b.  Biases are [1, out] for TPU layout.
    """
    shapes = [
        (2 * OBJ_LENGTH, HIDDEN),  # g_fc1
        (HIDDEN, HIDDEN),          # g_fc2
        (HIDDEN, HIDDEN),          # g_fc3
        (HIDDEN, HIDDEN),          # g_fc4
        (HIDDEN, HIDDEN),          # f_fc1
        (HIDDEN, HIDDEN),          # fcout.fc2
        (HIDDEN, 1),               # fcout.fc3
    ]
    params = []
    for shape in shapes:
        key, kw, kb = jax.random.split(key, 3)
        bound = 1.0 / np.sqrt(shape[0])
        w = jax.random.uniform(kw, shape, jnp.float32, -bound, bound)
        b = jax.random.uniform(kb, (1, shape[1]), jnp.float32, -bound, bound)
        params += [w, b]
    return tuple(params)


def rn_reference(input_feats, params):
    """Pure-JAX reference of the same forward (mirrors the PyTorch graph)."""
    B = input_feats.shape[0]
    first = input_feats[:, 0:64]
    second = input_feats[:, 64:128]
    third = input_feats[:, 128:192]
    post = input_feats[:, 192:256]
    cat = lambda a, b: jnp.concatenate([a, b], axis=1)
    g_in = jnp.stack([cat(first, second), cat(first, third), cat(first, post),
                      cat(second, third), cat(second, post), cat(third, post)],
                     axis=0).transpose(1, 0, 2).reshape(B * PAIRS, 2 * OBJ_LENGTH)
    (w1, b1, w2, b2, w3, b3, w4, b4, fw, fb, ow2, ob2, ow3, ob3) = params
    relu = lambda v: jnp.maximum(v, 0.0)
    h = relu(g_in @ w1 + b1)
    h = relu(h @ w2 + b2)
    h = relu(h @ w3 + b3)
    h = relu(h @ w4 + b4)
    f_in = h.reshape(B, PAIRS, HIDDEN).sum(axis=1)
    f = relu(f_in @ fw + fb)
    f = relu(f @ ow2 + ob2)
    return jax.nn.sigmoid(f @ ow3 + ob3)


if __name__ == "__main__":
    key = jax.random.PRNGKey(0)
    k_params, k_x1, k_x2 = jax.random.split(key, 3)
    params = init_params(k_params)

    # Small-shape run (B=2): single 8-row tile, f32 operands, exact-ish check.
    B = 2
    x = jax.random.normal(k_x1, (B, 4 * OBJ_LENGTH), dtype=jnp.float32)
    ref = jax.block_until_ready(rn_reference(x, params))
    out = jax.block_until_ready(rn_forward(x, params, matmul_dtype=jnp.float32))
    assert out.shape == (B, 1), out.shape
    np.testing.assert_allclose(np.asarray(out), np.asarray(ref), rtol=1e-4, atol=1e-4)

    # Multi-tile run: exercises the batch grid (tb=256 -> 2 tiles) + zero padding.
    B2 = 300
    x2 = jax.random.normal(k_x2, (B2, 4 * OBJ_LENGTH), dtype=jnp.float32)
    ref2 = jax.block_until_ready(rn_reference(x2, params))

    # Validate BOTH layer-1 code paths (fused W1_six and split-W1) with f32 operands.
    for fuse in (True, False):
        out_f32 = jax.block_until_ready(
            rn_forward(x2, params, matmul_dtype=jnp.float32, fuse_w1=fuse))
        assert out_f32.shape == (B2, 1), out_f32.shape
        np.testing.assert_allclose(np.asarray(out_f32), np.asarray(ref2),
                                   rtol=1e-4, atol=1e-4)

    # Production default: bf16 matmul operands (f32 accumulation), chip-selected W1 path.
    out_bf16 = jax.block_until_ready(rn_forward(x2, params))
    assert out_bf16.shape == (B2, 1), out_bf16.shape
    assert bool(jnp.all(jnp.isfinite(out_bf16)))
    np.testing.assert_allclose(np.asarray(out_bf16), np.asarray(ref2), atol=3e-2)

    print("KERNEL_OK")
</pallas_src>

<mosaic_0001>
module attributes {stable_mosaic.version = 11 : i64} {
  func.func @_rn_kernel(%arg0: i32, %arg1: memref<8x256xf32, #tpu.memory_space<vmem>>, %arg2: memref<256x1536xf32, #tpu.memory_space<vmem>>, %arg3: memref<1x256xf32, #tpu.memory_space<vmem>>, %arg4: memref<256x256xf32, #tpu.memory_space<vmem>>, %arg5: memref<1x256xf32, #tpu.memory_space<vmem>>, %arg6: memref<256x256xf32, #tpu.memory_space<vmem>>, %arg7: memref<1x256xf32, #tpu.memory_space<vmem>>, %arg8: memref<256x256xf32, #tpu.memory_space<vmem>>, %arg9: memref<1x256xf32, #tpu.memory_space<vmem>>, %arg10: memref<256x256xf32, #tpu.memory_space<vmem>>, %arg11: memref<1x256xf32, #tpu.memory_space<vmem>>, %arg12: memref<256x256xf32, #tpu.memory_space<vmem>>, %arg13: memref<1x256xf32, #tpu.memory_space<vmem>>, %arg14: memref<1x256xf32, #tpu.memory_space<vmem>>, %arg15: memref<1x1xf32, #tpu.memory_space<vmem>>, %arg16: memref<1x8xf32, #tpu.memory_space<vmem>>, %arg17: memref<48x256xf32, #tpu.memory_space<vmem>>) attributes {dimension_semantics = [#tpu.dimension_semantics<parallel>], iteration_bounds = array<i64: 1>, scalar_prefetch = 0 : i64, scratch_operands = 1 : i64, tpu.core_type = #tpu.core_type<tc>, window_params = [{transform_indices = @transform_0, window_bounds = array<i64: 8, 256>}, {pipeline_mode = #tpu.pipeline_mode<synchronous>, transform_indices = @transform_1, window_bounds = array<i64: 256, 1536>}, {pipeline_mode = #tpu.pipeline_mode<synchronous>, transform_indices = @transform_2, window_bounds = array<i64: 1, 256>}, {pipeline_mode = #tpu.pipeline_mode<synchronous>, transform_indices = @transform_3, window_bounds = array<i64: 256, 256>}, {pipeline_mode = #tpu.pipeline_mode<synchronous>, transform_indices = @transform_4, window_bounds = array<i64: 1, 256>}, {pipeline_mode = #tpu.pipeline_mode<synchronous>, transform_indices = @transform_5, window_bounds = array<i64: 256, 256>}, {pipeline_mode = #tpu.pipeline_mode<synchronous>, transform_indices = @transform_6, window_bounds = array<i64: 1, 256>}, {pipeline_mode = #tpu.pipeline_mode<synchronous>, transform_indices = @transform_7, window_bounds = array<i64: 256, 256>}, {pipeline_mode = #tpu.pipeline_mode<synchronous>, transform_indices = @transform_8, window_bounds = array<i64: 1, 256>}, {pipeline_mode = #tpu.pipeline_mode<synchronous>, transform_indices = @transform_9, window_bounds = array<i64: 256, 256>}, {pipeline_mode = #tpu.pipeline_mode<synchronous>, transform_indices = @transform_10, window_bounds = array<i64: 1, 256>}, {pipeline_mode = #tpu.pipeline_mode<synchronous>, transform_indices = @transform_11, window_bounds = array<i64: 256, 256>}, {pipeline_mode = #tpu.pipeline_mode<synchronous>, transform_indices = @transform_12, window_bounds = array<i64: 1, 256>}, {pipeline_mode = #tpu.pipeline_mode<synchronous>, transform_indices = @transform_13, window_bounds = array<i64: 1, 256>}, {pipeline_mode = #tpu.pipeline_mode<synchronous>, transform_indices = @transform_14, window_bounds = array<i64: 1, 1>}, {transform_indices = @transform_15, window_bounds = array<i64: 1, 8>}]} {
    %c0 = arith.constant 0 : index
    %c0_0 = arith.constant 0 : index
    %0 = vector.load %arg1[%c0, %c0_0] : memref<8x256xf32, #tpu.memory_space<vmem>>, vector<8x256xf32>
    %c0_1 = arith.constant 0 : index
    %c0_2 = arith.constant 0 : index
    %1 = vector.load %arg3[%c0_1, %c0_2] : memref<1x256xf32, #tpu.memory_space<vmem>>, vector<1x256xf32>
    %c0_3 = arith.constant 0 : index
    %c0_4 = arith.constant 0 : index
    %2 = vector.load %arg2[%c0_3, %c0_4] : memref<256x1536xf32, #tpu.memory_space<vmem>>, vector<256x1536xf32>
    %cst = arith.constant dense<0.000000e+00> : vector<8x1536xf32>
    %3 = tpu.matmul %0, %2, %cst {dimension_numbers = #tpu.dot_dimension_numbers<[1], [0], [0], [1], [0, 0, 1, 1], [], []>} : vector<8x256xf32>, vector<256x1536xf32>, vector<8x1536xf32> -> vector<8x1536xf32>
    %4 = vector.extract_strided_slice %3 {offsets = [0, 0], sizes = [8, 256], strides = [1, 1]} : vector<8x1536xf32> to vector<8x256xf32>
    %5 = vector.broadcast %1 : vector<1x256xf32> to vector<8x256xf32>
    %6 = arith.addf %4, %5 : vector<8x256xf32>
    %cst_5 = arith.constant 0.000000e+00 : f32
    %7 = vector.broadcast %cst_5 : f32 to vector<8x256xf32>
    %8 = arith.maximumf %6, %7 : vector<8x256xf32>
    %c0_6 = arith.constant 0 : index
    %c0_7 = arith.constant 0 : index
    %9 = vector.load %arg17[%c0_6, %c0_7] : memref<48x256xf32, #tpu.memory_space<vmem>>, vector<8x256xf32>
    tpu.vector_store %arg17[%c0_6, %c0_7], %8 {strides = array<i32>} : memref<48x256xf32, #tpu.memory_space<vmem>>, vector<8x256xf32>,
    %10 = vector.extract_strided_slice %3 {offsets = [0, 256], sizes = [8, 256], strides = [1, 1]} : vector<8x1536xf32> to vector<8x256xf32>
    %11 = vector.broadcast %1 : vector<1x256xf32> to vector<8x256xf32>
    %12 = arith.addf %10, %11 : vector<8x256xf32>
    %cst_8 = arith.constant 0.000000e+00 : f32
    %13 = vector.broadcast %cst_8 : f32 to vector<8x256xf32>
    %14 = arith.maximumf %12, %13 : vector<8x256xf32>
    %c8 = arith.constant 8 : index
    %c0_9 = arith.constant 0 : index
    %15 = vector.load %arg17[%c8, %c0_9] : memref<48x256xf32, #tpu.memory_space<vmem>>, vector<8x256xf32>
    tpu.vector_store %arg17[%c8, %c0_9], %14 {strides = array<i32>} : memref<48x256xf32, #tpu.memory_space<vmem>>, vector<8x256xf32>,
    %16 = vector.extract_strided_slice %3 {offsets = [0, 512], sizes = [8, 256], strides = [1, 1]} : vector<8x1536xf32> to vector<8x256xf32>
    %17 = vector.broadcast %1 : vector<1x256xf32> to vector<8x256xf32>
    %18 = arith.addf %16, %17 : vector<8x256xf32>
    %cst_10 = arith.constant 0.000000e+00 : f32
    %19 = vector.broadcast %cst_10 : f32 to vector<8x256xf32>
    %20 = arith.maximumf %18, %19 : vector<8x256xf32>
    %c16 = arith.constant 16 : index
    %c0_11 = arith.constant 0 : index
    %21 = vector.load %arg17[%c16, %c0_11] : memref<48x256xf32, #tpu.memory_space<vmem>>, vector<8x256xf32>
    tpu.vector_store %arg17[%c16, %c0_11], %20 {strides = array<i32>} : memref<48x256xf32, #tpu.memory_space<vmem>>, vector<8x256xf32>,
    %22 = vector.extract_strided_slice %3 {offsets = [0, 768], sizes = [8, 256], strides = [1, 1]} : vector<8x1536xf32> to vector<8x256xf32>
    %23 = vector.broadcast %1 : vector<1x256xf32> to vector<8x256xf32>
    %24 = arith.addf %22, %23 : vector<8x256xf32>
    %cst_12 = arith.constant 0.000000e+00 : f32
    %25 = vector.broadcast %cst_12 : f32 to vector<8x256xf32>
    %26 = arith.maximumf %24, %25 : vector<8x256xf32>
    %c24 = arith.constant 24 : index
    %c0_13 = arith.constant 0 : index
    %27 = vector.load %arg17[%c24, %c0_13] : memref<48x256xf32, #tpu.memory_space<vmem>>, vector<8x256xf32>
    tpu.vector_store %arg17[%c24, %c0_13], %26 {strides = array<i32>} : memref<48x256xf32, #tpu.memory_space<vmem>>, vector<8x256xf32>,
    %28 = vector.extract_strided_slice %3 {offsets = [0, 1024], sizes = [8, 256], strides = [1, 1]} : vector<8x1536xf32> to vector<8x256xf32>
    %29 = vector.broadcast %1 : vector<1x256xf32> to vector<8x256xf32>
    %30 = arith.addf %28, %29 : vector<8x256xf32>
    %cst_14 = arith.constant 0.000000e+00 : f32
    %31 = vector.broadcast %cst_14 : f32 to vector<8x256xf32>
    %32 = arith.maximumf %30, %31 : vector<8x256xf32>
    %c32 = arith.constant 32 : index
    %c0_15 = arith.constant 0 : index
    %33 = vector.load %arg17[%c32, %c0_15] : memref<48x256xf32, #tpu.memory_space<vmem>>, vector<8x256xf32>
    tpu.vector_store %arg17[%c32, %c0_15], %32 {strides = array<i32>} : memref<48x256xf32, #tpu.memory_space<vmem>>, vector<8x256xf32>,
    %34 = vector.extract_strided_slice %3 {offsets = [0, 1280], sizes = [8, 256], strides = [1, 1]} : vector<8x1536xf32> to vector<8x256xf32>
    %35 = vector.broadcast %1 : vector<1x256xf32> to vector<8x256xf32>
    %36 = arith.addf %34, %35 : vector<8x256xf32>
    %cst_16 = arith.constant 0.000000e+00 : f32
    %37 = vector.broadcast %cst_16 : f32 to vector<8x256xf32>
    %38 = arith.maximumf %36, %37 : vector<8x256xf32>
    %c40 = arith.constant 40 : index
    %c0_17 = arith.constant 0 : index
    %39 = vector.load %arg17[%c40, %c0_17] : memref<48x256xf32, #tpu.memory_space<vmem>>, vector<8x256xf32>
    tpu.vector_store %arg17[%c40, %c0_17], %38 {strides = array<i32>} : memref<48x256xf32, #tpu.memory_space<vmem>>, vector<8x256xf32>,
    %c0_18 = arith.constant 0 : index
    %c0_19 = arith.constant 0 : index
    %40 = vector.load %arg17[%c0_18, %c0_19] : memref<48x256xf32, #tpu.memory_space<vmem>>, vector<48x256xf32>
    %c0_20 = arith.constant 0 : index
    %c0_21 = arith.constant 0 : index
    %41 = vector.load %arg4[%c0_20, %c0_21] : memref<256x256xf32, #tpu.memory_space<vmem>>, vector<256x256xf32>
    %cst_22 = arith.constant dense<0.000000e+00> : vector<48x256xf32>
    %42 = tpu.matmul %40, %41, %cst_22 {dimension_numbers = #tpu.dot_dimension_numbers<[1], [0], [0], [1], [0, 0, 1, 1], [], []>} : vector<48x256xf32>, vector<256x256xf32>, vector<48x256xf32> -> vector<48x256xf32>
    %c0_23 = arith.constant 0 : index
    %c0_24 = arith.constant 0 : index
    %43 = vector.load %arg5[%c0_23, %c0_24] : memref<1x256xf32, #tpu.memory_space<vmem>>, vector<1x256xf32>
    %44 = vector.broadcast %43 : vector<1x256xf32> to vector<48x256xf32>
    %45 = arith.addf %42, %44 : vector<48x256xf32>
    %cst_25 = arith.constant 0.000000e+00 : f32
    %46 = vector.broadcast %cst_25 : f32 to vector<48x256xf32>
    %47 = arith.maximumf %45, %46 : vector<48x256xf32>
    %c0_26 = arith.constant 0 : index
    %c0_27 = arith.constant 0 : index
    %48 = vector.load %arg6[%c0_26, %c0_27] : memref<256x256xf32, #tpu.memory_space<vmem>>, vector<256x256xf32>
    %cst_28 = arith.constant dense<0.000000e+00> : vector<48x256xf32>
    %49 = tpu.matmul %47, %48, %cst_28 {dimension_numbers = #tpu.dot_dimension_numbers<[1], [0], [0], [1], [0, 0, 1, 1], [], []>} : vector<48x256xf32>, vector<256x256xf32>, vector<48x256xf32> -> vector<48x256xf32>
    %c0_29 = arith.constant 0 : index
    %c0_30 = arith.constant 0 : index
    %50 = vector.load %arg7[%c0_29, %c0_30] : memref<1x256xf32, #tpu.memory_space<vmem>>, vector<1x256xf32>
    %51 = vector.broadcast %50 : vector<1x256xf32> to vector<48x256xf32>
    %52 = arith.addf %49, %51 : vector<48x256xf32>
    %cst_31 = arith.constant 0.000000e+00 : f32
    %53 = vector.broadcast %cst_31 : f32 to vector<48x256xf32>
    %54 = arith.maximumf %52, %53 : vector<48x256xf32>
    %c0_32 = arith.constant 0 : index
    %c0_33 = arith.constant 0 : index
    %55 = vector.load %arg8[%c0_32, %c0_33] : memref<256x256xf32, #tpu.memory_space<vmem>>, vector<256x256xf32>
    %cst_34 = arith.constant dense<0.000000e+00> : vector<48x256xf32>
    %56 = tpu.matmul %54, %55, %cst_34 {dimension_numbers = #tpu.dot_dimension_numbers<[1], [0], [0], [1], [0, 0, 1, 1], [], []>} : vector<48x256xf32>, vector<256x256xf32>, vector<48x256xf32> -> vector<48x256xf32>
    %c0_35 = arith.constant 0 : index
    %c0_36 = arith.constant 0 : index
    %57 = vector.load %arg9[%c0_35, %c0_36] : memref<1x256xf32, #tpu.memory_space<vmem>>, vector<1x256xf32>
    %58 = vector.broadcast %57 : vector<1x256xf32> to vector<48x256xf32>
    %59 = arith.addf %56, %58 : vector<48x256xf32>
    %cst_37 = arith.constant 0.000000e+00 : f32
    %60 = vector.broadcast %cst_37 : f32 to vector<48x256xf32>
    %61 = arith.maximumf %59, %60 : vector<48x256xf32>
    %62 = vector.extract_strided_slice %61 {offsets = [0, 0], sizes = [8, 256], strides = [1, 1]} : vector<48x256xf32> to vector<8x256xf32>
    %63 = vector.extract_strided_slice %61 {offsets = [8, 0], sizes = [8, 256], strides = [1, 1]} : vector<48x256xf32> to vector<8x256xf32>
    %64 = arith.addf %62, %63 : vector<8x256xf32>
    %65 = vector.extract_strided_slice %61 {offsets = [16, 0], sizes = [8, 256], strides = [1, 1]} : vector<48x256xf32> to vector<8x256xf32>
    %66 = arith.addf %64, %65 : vector<8x256xf32>
    %67 = vector.extract_strided_slice %61 {offsets = [24, 0], sizes = [8, 256], strides = [1, 1]} : vector<48x256xf32> to vector<8x256xf32>
    %68 = arith.addf %66, %67 : vector<8x256xf32>
    %69 = vector.extract_strided_slice %61 {offsets = [32, 0], sizes = [8, 256], strides = [1, 1]} : vector<48x256xf32> to vector<8x256xf32>
    %70 = arith.addf %68, %69 : vector<8x256xf32>
    %71 = vector.extract_strided_slice %61 {offsets = [40, 0], sizes = [8, 256], strides = [1, 1]} : vector<48x256xf32> to vector<8x256xf32>
    %72 = arith.addf %70, %71 : vector<8x256xf32>
    %c0_38 = arith.constant 0 : index
    %c0_39 = arith.constant 0 : index
    %73 = vector.load %arg10[%c0_38, %c0_39] : memref<256x256xf32, #tpu.memory_space<vmem>>, vector<256x256xf32>
    %cst_40 = arith.constant dense<0.000000e+00> : vector<8x256xf32>
    %74 = tpu.matmul %72, %73, %cst_40 {dimension_numbers = #tpu.dot_dimension_numbers<[1], [0], [0], [1], [0, 0, 1, 1], [], []>} : vector<8x256xf32>, vector<256x256xf32>, vector<8x256xf32> -> vector<8x256xf32>
    %c0_41 = arith.constant 0 : index
    %c0_42 = arith.constant 0 : index
    %75 = vector.load %arg11[%c0_41, %c0_42] : memref<1x256xf32, #tpu.memory_space<vmem>>, vector<1x256xf32>
    %76 = vector.broadcast %75 : vector<1x256xf32> to vector<8x256xf32>
    %77 = arith.addf %74, %76 : vector<8x256xf32>
    %cst_43 = arith.constant 0.000000e+00 : f32
    %78 = vector.broadcast %cst_43 : f32 to vector<8x256xf32>
    %79 = arith.maximumf %77, %78 : vector<8x256xf32>
    %c0_44 = arith.constant 0 : index
    %c0_45 = arith.constant 0 : index
    %80 = vector.load %arg12[%c0_44, %c0_45] : memref<256x256xf32, #tpu.memory_space<vmem>>, vector<256x256xf32>
    %cst_46 = arith.constant dense<0.000000e+00> : vector<8x256xf32>
    %81 = tpu.matmul %79, %80, %cst_46 {dimension_numbers = #tpu.dot_dimension_numbers<[1], [0], [0], [1], [0, 0, 1, 1], [], []>} : vector<8x256xf32>, vector<256x256xf32>, vector<8x256xf32> -> vector<8x256xf32>
    %c0_47 = arith.constant 0 : index
    %c0_48 = arith.constant 0 : index
    %82 = vector.load %arg13[%c0_47, %c0_48] : memref<1x256xf32, #tpu.memory_space<vmem>>, vector<1x256xf32>
    %83 = vector.broadcast %82 : vector<1x256xf32> to vector<8x256xf32>
    %84 = arith.addf %81, %83 : vector<8x256xf32>
    %cst_49 = arith.constant 0.000000e+00 : f32
    %85 = vector.broadcast %cst_49 : f32 to vector<8x256xf32>
    %86 = arith.maximumf %84, %85 : vector<8x256xf32>
    %c0_50 = arith.constant 0 : index
    %c0_51 = arith.constant 0 : index
    %87 = vector.load %arg14[%c0_50, %c0_51] : memref<1x256xf32, #tpu.memory_space<vmem>>, vector<1x256xf32>
    %cst_52 = arith.constant dense<0.000000e+00> : vector<1x8xf32>
    %88 = tpu.matmul %87, %86, %cst_52 {dimension_numbers = #tpu.dot_dimension_numbers<[1], [1], [0], [0], [0, 0, 1, 0], [], []>} : vector<1x256xf32>, vector<8x256xf32>, vector<1x8xf32> -> vector<1x8xf32>
    %c0_53 = arith.constant 0 : index
    %c0_54 = arith.constant 0 : index
    %89 = vector.load %arg15[%c0_53, %c0_54] : memref<1x1xf32, #tpu.memory_space<vmem>>, vector<1x1xf32>
    %90 = vector.broadcast %89 : vector<1x1xf32> to vector<1x8xf32>
    %91 = arith.addf %88, %90 : vector<1x8xf32>
    %92 = arith.negf %91 : vector<1x8xf32>
    %93 = math.exp %92 : vector<1x8xf32>
    %cst_55 = arith.constant 1.000000e+00 : f32
    %94 = vector.broadcast %cst_55 : f32 to vector<1x8xf32>
    %95 = arith.addf %94, %93 : vector<1x8xf32>
    %96 = arith.divf %94, %95 : vector<1x8xf32>
    %c0_56 = arith.constant 0 : index
    %c0_57 = arith.constant 0 : index
    %97 = vector.load %arg16[%c0_56, %c0_57] : memref<1x8xf32, #tpu.memory_space<vmem>>, vector<1x8xf32>
    tpu.vector_store %arg16[%c0_56, %c0_57], %96 {strides = array<i32>} : memref<1x8xf32, #tpu.memory_space<vmem>>, vector<1x8xf32>,
    return
  }
  func.func @transform_0(%arg0: i32) -> (i32, i32) {
    %c0_i32 = arith.constant 0 : i32
    %c0_i32_0 = arith.constant 0 : i32
    return %arg0, %c0_i32 : i32, i32
  }
  func.func @transform_1(%arg0: i32) -> (i32, i32) {
    %c0_i32 = arith.constant 0 : i32
    %c0_i32_0 = arith.constant 0 : i32
    %c0_i32_1 = arith.constant 0 : i32
    return %c0_i32, %c0_i32_0 : i32, i32
  }
  func.func @transform_2(%arg0: i32) -> (i32, i32) {
    %c0_i32 = arith.constant 0 : i32
    %c0_i32_0 = arith.constant 0 : i32
    %c0_i32_1 = arith.constant 0 : i32
    return %c0_i32, %c0_i32_0 : i32, i32
  }
  func.func @transform_3(%arg0: i32) -> (i32, i32) {
    %c0_i32 = arith.constant 0 : i32
    %c0_i32_0 = arith.constant 0 : i32
    %c0_i32_1 = arith.constant 0 : i32
    return %c0_i32, %c0_i32_0 : i32, i32
  }
  func.func @transform_4(%arg0: i32) -> (i32, i32) {
    %c0_i32 = arith.constant 0 : i32
    %c0_i32_0 = arith.constant 0 : i32
    %c0_i32_1 = arith.constant 0 : i32
    return %c0_i32, %c0_i32_0 : i32, i32
  }
  func.func @transform_5(%arg0: i32) -> (i32, i32) {
    %c0_i32 = arith.constant 0 : i32
    %c0_i32_0 = arith.constant 0 : i32
    %c0_i32_1 = arith.constant 0 : i32
    return %c0_i32, %c0_i32_0 : i32, i32
  }
  func.func @transform_6(%arg0: i32) -> (i32, i32) {
    %c0_i32 = arith.constant 0 : i32
    %c0_i32_0 = arith.constant 0 : i32
    %c0_i32_1 = arith.constant 0 : i32
    return %c0_i32, %c0_i32_0 : i32, i32
  }
  func.func @transform_7(%arg0: i32) -> (i32, i32) {
    %c0_i32 = arith.constant 0 : i32
    %c0_i32_0 = arith.constant 0 : i32
    %c0_i32_1 = arith.constant 0 : i32
    return %c0_i32, %c0_i32_0 : i32, i32
  }
  func.func @transform_8(%arg0: i32) -> (i32, i32) {
    %c0_i32 = arith.constant 0 : i32
    %c0_i32_0 = arith.constant 0 : i32
    %c0_i32_1 = arith.constant 0 : i32
    return %c0_i32, %c0_i32_0 : i32, i32
  }
  func.func @transform_9(%arg0: i32) -> (i32, i32) {
    %c0_i32 = arith.constant 0 : i32
    %c0_i32_0 = arith.constant 0 : i32
    %c0_i32_1 = arith.constant 0 : i32
    return %c0_i32, %c0_i32_0 : i32, i32
  }
  func.func @transform_10(%arg0: i32) -> (i32, i32) {
    %c0_i32 = arith.constant 0 : i32
    %c0_i32_0 = arith.constant 0 : i32
    %c0_i32_1 = arith.constant 0 : i32
    return %c0_i32, %c0_i32_0 : i32, i32
  }
  func.func @transform_11(%arg0: i32) -> (i32, i32) {
    %c0_i32 = arith.constant 0 : i32
    %c0_i32_0 = arith.constant 0 : i32
    %c0_i32_1 = arith.constant 0 : i32
    return %c0_i32, %c0_i32_0 : i32, i32
  }
  func.func @transform_12(%arg0: i32) -> (i32, i32) {
    %c0_i32 = arith.constant 0 : i32
    %c0_i32_0 = arith.constant 0 : i32
    %c0_i32_1 = arith.constant 0 : i32
    return %c0_i32, %c0_i32_0 : i32, i32
  }
  func.func @transform_13(%arg0: i32) -> (i32, i32) {
    %c0_i32 = arith.constant 0 : i32
    %c0_i32_0 = arith.constant 0 : i32
    %c0_i32_1 = arith.constant 0 : i32
    return %c0_i32, %c0_i32_0 : i32, i32
  }
  func.func @transform_14(%arg0: i32) -> (i32, i32) {
    %c0_i32 = arith.constant 0 : i32
    %c0_i32_0 = arith.constant 0 : i32
    %c0_i32_1 = arith.constant 0 : i32
    return %c0_i32, %c0_i32_0 : i32, i32
  }
  func.func @transform_15(%arg0: i32) -> (i32, i32) {
    %c0_i32 = arith.constant 0 : i32
    %c0_i32_0 = arith.constant 0 : i32
    return %c0_i32, %arg0 : i32, i32
  }
}

</mosaic_0001>

<bundles_post_ra>
// kernel: tpu_custom_call.1
= control target key start
LH: loop header
LB: loop body
LE: loop exit
PB: predicated region body
PF: predicated region fallthrough
CT: control target
= control target key end

     0   :  { %s3574_s0 = inlined_call_operand.hbm [shape: f32[8,256], index: 0, kind: input, shape index: {}]   ;;  %s3575_s1 = inlined_call_operand.hbm [shape: f32[256,1536], index: 1, kind: input, shape index: {}]   ;;  %s3576_s2 = inlined_call_operand.hbm [shape: f32[1,256], index: 2, kind: input, shape index: {}]   ;;  %s3577_s3 = inlined_call_operand.hbm [shape: f32[256,256], index: 3, kind: input, shape index: {}]   ;;  %s3578_s4 = inlined_call_operand.hbm [shape: f32[1,256], index: 4, kind: input, shape index: {}]   ;;  %s3579_s5 = inlined_call_operand.hbm [shape: f32[256,256], index: 5, kind: input, shape index: {}]   ;;  %s3580_s6 = inlined_call_operand.hbm [shape: f32[1,256], index: 6, kind: input, shape index: {}]   ;;  %s3581_s7 = inlined_call_operand.hbm [shape: f32[256,256], index: 7, kind: input, shape index: {}]   ;;  %s3582_s8 = inlined_call_operand.hbm [shape: f32[1,256], index: 8, kind: input, shape index: {}]   ;;  %s3583_s9 = inlined_call_operand.hbm [shape: f32[256,256], index: 9, kind: input, shape index: {}]   ;;  %s3584_s10 = inlined_call_operand.hbm [shape: f32[1,256], index: 10, kind: input, shape index: {}]   ;;  %s3585_s11 = inlined_call_operand.hbm [shape: f32[256,256], index: 11, kind: input, shape index: {}]   ;;  %s3586_s12 = inlined_call_operand.hbm [shape: f32[1,256], index: 12, kind: input, shape index: {}]   ;;  %s3587_s13 = inlined_call_operand.hbm [shape: f32[1,256], index: 13, kind: input, shape index: {}]   ;;  %s3588_s14 = inlined_call_operand.<no memory space> [shape: f32[1,1], index: 14, kind: input, shape index: {}]   ;;  %s3589_s15 = inlined_call_operand.hbm [shape: f32[1,8], index: 15, kind: output, shape index: {}]  }
   0x1   :  { %v20_v0 = vstv %s3588_s14 }
   0x2   :  { %21 = vst [vmem:[#allocation3] sm:$0x1] %v20_v0 }
   0x3   :  { %22 = vsyncpa [#allocation5], 0 }
   0x4   :  { %23 = vsyncpa [#allocation8], 0 }
   0x5   :  { %24 = vsyncpa [#allocation11], 0 }
   0x6   :  { %25 = vsyncpa [#allocation14], 0 }
   0x7   :  { %26 = vsyncpa [#allocation17], 0 }
   0x8   :  { %27 = vsyncpa [#allocation20], 0 }
   0x9   :  { %28 = vsyncpa [#allocation23], 0 }
   0xa   :  { %29 = vsyncpa [#allocation26], 0 }
   0xb   :  { %30 = vsyncpa [#allocation6], 0  ;;  %s3175_s20 = smov [#allocation7]   ;;  %s2827_s24 = scalar_lea.hbm %s3575_s1, 49152 }
   0xc   :  { %s46_s21 = sshll.u32 %s3175_s20, 4  ;;  %p2828_p0 = scmp.ne.s32.totalorder %s3575_s1, %s2827_s24  ;;  %s47_s21 = int_to_ptr.vmem [resolvable:$true] %s46_s21 }
   0xd   :  { %p2831_p1 = scmp.lt.u32.totalorder %s2827_s24, %s3575_s1 }
   0xf   :  { %p2833_p2 = pnand %p2831_p1, %p2828_p0 }
  0x11   :  { %2836 = shalt.err (!%p2833_p2)
}
  0x12   :  { %s2837_s28 = scalar_lea.vmem %s47_s21, 49152  ;;  %p2842_p4 = scmp.lt.s32.totalorder %s47_s21, %s47_s21 }
  0x13   :  { %p2838_p3 = scmp.ne.s32.totalorder %s47_s21, %s2837_s28  ;;  %p2843_p5 = scmp.lt.s32.totalorder %s2837_s28, %s2837_s28 }
  0x15   :  { %p2844_p6 = por %p2843_p5, %p2842_p4 }
  0x17   :  { %p2845_p7 = pnand %p2844_p6, %p2838_p3 }
  0x19   :  { %2848 = shalt.err (!%p2845_p7)
}
  0x1a   :  { %s3176_s29 = smov 1536   ;;  %s3177_s30 = smov 96  }
  0x1b   :  { %52 = dma.hbm_to_vmem [thread:$0]  %s3575_s1, 49152, %s47_s21, [#allocation8], %s3176_s29, %s3176_s29, %s3177_s30  }
  0x1c   :  { %s3178_s18 = smov [#allocation10]   ;;  %s2849_s23 = scalar_lea.hbm %s3577_s3, 8192 }
  0x1d   :  { %s68_s19 = sshll.u32 %s3178_s18, 4  ;;  %p2850_p8 = scmp.ne.s32.totalorder %s3577_s3, %s2849_s23  ;;  %s69_s19 = int_to_ptr.vmem [resolvable:$true] %s68_s19 }
  0x1e   :  { %p2853_p9 = scmp.lt.u32.totalorder %s2849_s23, %s3577_s3 }
  0x20   :  { %p2855_p10 = pnand %p2853_p9, %p2850_p8 }
  0x22   :  { %2858 = shalt.err (!%p2855_p10)
}
  0x23   :  { %s2859_s27 = scalar_lea.vmem %s69_s19, 8192  ;;  %p2864_p12 = scmp.lt.s32.totalorder %s69_s19, %s69_s19 }
  0x24   :  { %p2860_p11 = scmp.ne.s32.totalorder %s69_s19, %s2859_s27  ;;  %p2865_p13 = scmp.lt.s32.totalorder %s2859_s27, %s2859_s27 }
  0x26   :  { %p2866_p0 = por %p2865_p13, %p2864_p12 }
  0x28   :  { %p2867_p1 = pnand %p2866_p0, %p2860_p11 }
  0x2a   :  { %2870 = shalt.err (!%p2867_p1)
}
  0x2b   :  { %s3179_s1 = smov 256   ;;  %s3180_s21 = smov 16  }
  0x2c   :  { %74 = dma.hbm_to_vmem [thread:$0]  %s3577_s3, 8192, %s69_s19, [#allocation11], %s3179_s1, %s3179_s1, %s3180_s21  }
  0x2d   :  { %s3181_s30 = smov [#allocation13]   ;;  %s3182_s17 = smov [#allocation16]  }
  0x2e   :  { %s90_s16 = sshll.u32 %s3181_s30, 4  ;;  %s112_s18 = sshll.u32 %s3182_s17, 4  ;;  %s91_s16 = int_to_ptr.vmem [resolvable:$true] %s90_s16  ;;  %s3305_s18 = int_to_ptr.vmem [resolvable:$true] %s112_s18 }
  0x2f   :  { %s2871_s23 = scalar_lea.hbm %s3579_s5, 8192 }
  0x30   :  { %p2872_p2 = scmp.ne.s32.totalorder %s3579_s5, %s2871_s23  ;;  %p2875_p3 = scmp.lt.u32.totalorder %s2871_s23, %s3579_s5 }
  0x32   :  { %p2877_p4 = pnand %p2875_p3, %p2872_p2 }
  0x34   :  { %2880 = shalt.err (!%p2877_p4)
}
  0x35   :  { %s2881_s3 = scalar_lea.vmem %s91_s16, 8192  ;;  %p2886_p6 = scmp.lt.s32.totalorder %s91_s16, %s91_s16 }
  0x36   :  { %p2882_p5 = scmp.ne.s32.totalorder %s91_s16, %s2881_s3  ;;  %p2887_p7 = scmp.lt.s32.totalorder %s2881_s3, %s2881_s3 }
  0x38   :  { %p2888_p8 = por %p2887_p7, %p2886_p6 }
  0x3a   :  { %p2889_p9 = pnand %p2888_p8, %p2882_p5 }
  0x3c   :  { %2892 = shalt.err (!%p2889_p9)
}
  0x3d   :  { %96 = dma.hbm_to_vmem [thread:$0]  %s3579_s5, 8192, %s91_s16, [#allocation14], %s3179_s1, %s3179_s1, %s3180_s21  }
  0x3e   :  { %s2893_s30 = scalar_lea.hbm %s3581_s7, 8192 }
  0x3f   :  { %p2894_p10 = scmp.ne.s32.totalorder %s3581_s7, %s2893_s30  ;;  %p2897_p11 = scmp.lt.u32.totalorder %s2893_s30, %s3581_s7 }
  0x41   :  { %p2899_p12 = pnand %p2897_p11, %p2894_p10 }
  0x43   :  { %2902 = shalt.err (!%p2899_p12)
}
  0x44   :  { %s2903_s24 = scalar_lea.vmem %s3305_s18, 8192  ;;  %p2908_p0 = scmp.lt.s32.totalorder %s3305_s18, %s3305_s18 }
  0x45   :  { %p2904_p13 = scmp.ne.s32.totalorder %s3305_s18, %s2903_s24  ;;  %p2909_p1 = scmp.lt.s32.totalorder %s2903_s24, %s2903_s24 }
  0x47   :  { %p2910_p2 = por %p2909_p1, %p2908_p0 }
  0x49   :  { %p2911_p3 = pnand %p2910_p2, %p2904_p13 }
  0x4b   :  { %2914 = shalt.err (!%p2911_p3)
}
  0x4c   :  { %118 = dma.hbm_to_vmem [thread:$0]  %s3581_s7, 8192, %s3305_s18, [#allocation17], %s3179_s1, %s3179_s1, %s3180_s21  }
  0x4d   :  { %s3183_s25 = smov [#allocation19]   ;;  %s3184_s14 = smov [#allocation22]  }
  0x4e   :  { %s134_s26 = sshll.u32 %s3183_s25, 4  ;;  %s156_s3 = sshll.u32 %s3184_s14, 4  ;;  %s135_s26 = int_to_ptr.vmem [resolvable:$true] %s134_s26  ;;  %s3342_s3 = int_to_ptr.vmem [resolvable:$true] %s156_s3 }
  0x4f   :  { %s2915_s28 = scalar_lea.hbm %s3583_s9, 8192 }
  0x50   :  { %p2916_p4 = scmp.ne.s32.totalorder %s3583_s9, %s2915_s28  ;;  %p2919_p5 = scmp.lt.u32.totalorder %s2915_s28, %s3583_s9 }
  0x52   :  { %p2921_p6 = pnand %p2919_p5, %p2916_p4 }
  0x54   :  { %2924 = shalt.err (!%p2921_p6)
}
  0x55   :  { %s2925_s7 = scalar_lea.vmem %s135_s26, 8192  ;;  %p2930_p8 = scmp.lt.s32.totalorder %s135_s26, %s135_s26 }
  0x56   :  { %p2926_p7 = scmp.ne.s32.totalorder %s135_s26, %s2925_s7  ;;  %p2931_p9 = scmp.lt.s32.totalorder %s2925_s7, %s2925_s7 }
  0x58   :  { %p2932_p10 = por %p2931_p9, %p2930_p8 }
  0x5a   :  { %p2933_p11 = pnand %p2932_p10, %p2926_p7 }
  0x5c   :  { %2936 = shalt.err (!%p2933_p11)
}
  0x5d   :  { %140 = dma.hbm_to_vmem [thread:$0]  %s3583_s9, 8192, %s135_s26, [#allocation20], %s3179_s1, %s3179_s1, %s3180_s21  }
  0x5e   :  { %s2937_s5 = scalar_lea.hbm %s3585_s11, 8192 }
  0x5f   :  { %p2938_p12 = scmp.ne.s32.totalorder %s3585_s11, %s2937_s5  ;;  %p2941_p13 = scmp.lt.u32.totalorder %s2937_s5, %s3585_s11 }
  0x61   :  { %p2943_p0 = pnand %p2941_p13, %p2938_p12 }
  0x63   :  { %2946 = shalt.err (!%p2943_p0)
}
  0x64   :  { %s2947_s27 = scalar_lea.vmem %s3342_s3, 8192  ;;  %p2952_p2 = scmp.lt.s32.totalorder %s3342_s3, %s3342_s3 }
  0x65   :  { %p2948_p1 = scmp.ne.s32.totalorder %s3342_s3, %s2947_s27  ;;  %p2953_p3 = scmp.lt.s32.totalorder %s2947_s27, %s2947_s27 }
  0x67   :  { %p2954_p4 = por %p2953_p3, %p2952_p2 }
  0x69   :  { %p2955_p5 = pnand %p2954_p4, %p2948_p1 }
  0x6b   :  { %2958 = shalt.err (!%p2955_p5)
}
  0x6c   :  { %162 = dma.hbm_to_vmem [thread:$0]  %s3585_s11, 8192, %s3342_s3, [#allocation23], %s3179_s1, %s3179_s1, %s3180_s21  }
  0x6d   :  { %s3185_s28 = smov [#allocation4]   ;;  %s3186_s30 = smov [#allocation9]  }
  0x6e   :  { %s37_s29 = sshll.u32 %s3185_s28, 4  ;;  %s59_s17 = sshll.u32 %s3186_s30, 4  ;;  %s38_s29 = int_to_ptr.vmem [resolvable:$true] %s37_s29  ;;  %s60_s17 = int_to_ptr.vmem [resolvable:$true] %s59_s17 }
  0x6f   :  { %s2959_s18 = scalar_lea.hbm %s3574_s0, 256 }
  0x70   :  { %p2960_p6 = scmp.ne.s32.totalorder %s3574_s0, %s2959_s18  ;;  %p2963_p7 = scmp.lt.u32.totalorder %s2959_s18, %s3574_s0 }
  0x72   :  { %p2965_p8 = pnand %p2963_p7, %p2960_p6 }
  0x74   :  { %2968 = shalt.err (!%p2965_p8)
}
  0x75   :  { %s2969_s11 = scalar_lea.vmem %s38_s29, 256  ;;  %p2974_p10 = scmp.lt.s32.totalorder %s38_s29, %s38_s29 }
  0x76   :  { %p2970_p9 = scmp.ne.s32.totalorder %s38_s29, %s2969_s11  ;;  %p2975_p11 = scmp.lt.s32.totalorder %s2969_s11, %s2969_s11 }
  0x78   :  { %p2976_p12 = por %p2975_p11, %p2974_p10 }
  0x7a   :  { %p2977_p13 = pnand %p2976_p12, %p2970_p9 }
  0x7c   :  { %2980 = shalt.err (!%p2977_p13)
}
  0x7d   :  { %40 = dma.hbm_to_vmem [thread:$0]  %s3574_s0, 256, %s38_s29, [#allocation5]  }
  0x7e   :  { %s2981_s25 = scalar_lea.hbm %s3576_s2, 32 }
  0x7f   :  { %p2982_p0 = scmp.ne.s32.totalorder %s3576_s2, %s2981_s25  ;;  %p2985_p1 = scmp.lt.u32.totalorder %s2981_s25, %s3576_s2 }
  0x81   :  { %p2987_p2 = pnand %p2985_p1, %p2982_p0 }
  0x83   :  { %2990 = shalt.err (!%p2987_p2)
}
  0x84   :  { %s2991_s26 = scalar_lea.vmem %s60_s17, 32  ;;  %p2996_p4 = scmp.lt.s32.totalorder %s60_s17, %s60_s17 }
  0x85   :  { %p2992_p3 = scmp.ne.s32.totalorder %s60_s17, %s2991_s26  ;;  %p2997_p5 = scmp.lt.s32.totalorder %s2991_s26, %s2991_s26 }
  0x87   :  { %p2998_p6 = por %p2997_p5, %p2996_p4 }
  0x89   :  { %p2999_p7 = pnand %p2998_p6, %p2992_p3 }
  0x8b   :  { %3002 = shalt.err (!%p2999_p7)
}
  0x8c   :  { %62 = dma.hbm_to_vmem [thread:$0]  %s3576_s2, 32, %s60_s17, [#allocation8]  }
  0x8d   :  { %s3187_s29 = smov [#allocation12]   ;;  %s3188_s20 = smov [#allocation15]  }
  0x8e   :  { %s81_s30 = sshll.u32 %s3187_s29, 4  ;;  %s103_s7 = sshll.u32 %s3188_s20, 4  ;;  %s82_s30 = int_to_ptr.vmem [resolvable:$true] %s81_s30  ;;  %s104_s7 = int_to_ptr.vmem [resolvable:$true] %s103_s7 }
  0x8f   :  { %s3003_s23 = scalar_lea.hbm %s3578_s4, 32 }
  0x90   :  { %p3004_p8 = scmp.ne.s32.totalorder %s3578_s4, %s3003_s23  ;;  %p3007_p9 = scmp.lt.u32.totalorder %s3003_s23, %s3578_s4 }
  0x92   :  { %p3009_p10 = pnand %p3007_p9, %p3004_p8 }
  0x94   :  { %3012 = shalt.err (!%p3009_p10)
}
  0x95   :  { %s3013_s2 = scalar_lea.vmem %s82_s30, 32  ;;  %p3018_p12 = scmp.lt.s32.totalorder %s82_s30, %s82_s30 }
  0x96   :  { %p3014_p11 = scmp.ne.s32.totalorder %s82_s30, %s3013_s2  ;;  %p3019_p13 = scmp.lt.s32.totalorder %s3013_s2, %s3013_s2 }
  0x98   :  { %p3020_p0 = por %p3019_p13, %p3018_p12 }
  0x9a   :  { %p3021_p1 = pnand %p3020_p0, %p3014_p11 }
  0x9c   :  { %3024 = shalt.err (!%p3021_p1)
}
  0x9d   :  { %84 = dma.hbm_to_vmem [thread:$0]  %s3578_s4, 32, %s82_s30, [#allocation11]  }
  0x9e   :  { %s3025_s25 = scalar_lea.hbm %s3580_s6, 32 }
  0x9f   :  { %p3026_p2 = scmp.ne.s32.totalorder %s3580_s6, %s3025_s25  ;;  %p3029_p3 = scmp.lt.u32.totalorder %s3025_s25, %s3580_s6 }
  0xa1   :  { %p3031_p4 = pnand %p3029_p3, %p3026_p2 }
  0xa3   :  { %3034 = shalt.err (!%p3031_p4)
}
  0xa4   :  { %s3035_s26 = scalar_lea.vmem %s104_s7, 32  ;;  %p3040_p6 = scmp.lt.s32.totalorder %s104_s7, %s104_s7 }
  0xa5   :  { %p3036_p5 = scmp.ne.s32.totalorder %s104_s7, %s3035_s26  ;;  %p3041_p7 = scmp.lt.s32.totalorder %s3035_s26, %s3035_s26 }
  0xa7   :  { %p3042_p8 = por %p3041_p7, %p3040_p6 }
  0xa9   :  { %p3043_p9 = pnand %p3042_p8, %p3036_p5 }
  0xab   :  { %3046 = shalt.err (!%p3043_p9)
}
  0xac   :  { %106 = dma.hbm_to_vmem [thread:$0]  %s3580_s6, 32, %s104_s7, [#allocation14]  }
  0xad   :  { %s3189_s28 = smov [#allocation18]   ;;  %s3190_s30 = smov [#allocation21]  }
  0xae   :  { %s125_s29 = sshll.u32 %s3189_s28, 4  ;;  %s147_s20 = sshll.u32 %s3190_s30, 4  ;;  %s126_s29 = int_to_ptr.vmem [resolvable:$true] %s125_s29  ;;  %s148_s20 = int_to_ptr.vmem [resolvable:$true] %s147_s20 }
  0xaf   :  { %s3047_s23 = scalar_lea.hbm %s3582_s8, 32 }
  0xb0   :  { %p3048_p10 = scmp.ne.s32.totalorder %s3582_s8, %s3047_s23  ;;  %p3051_p11 = scmp.lt.u32.totalorder %s3047_s23, %s3582_s8 }
  0xb2   :  { %p3053_p12 = pnand %p3051_p11, %p3048_p10 }
  0xb4   :  { %3056 = shalt.err (!%p3053_p12)
}
  0xb5   :  { %s3057_s6 = scalar_lea.vmem %s126_s29, 32  ;;  %p3062_p0 = scmp.lt.s32.totalorder %s126_s29, %s126_s29 }
  0xb6   :  { %p3058_p13 = scmp.ne.s32.totalorder %s126_s29, %s3057_s6  ;;  %p3063_p1 = scmp.lt.s32.totalorder %s3057_s6, %s3057_s6 }
  0xb8   :  { %p3064_p2 = por %p3063_p1, %p3062_p0 }
  0xba   :  { %p3065_p3 = pnand %p3064_p2, %p3058_p13 }
  0xbc   :  { %3068 = shalt.err (!%p3065_p3)
}
  0xbd   :  { %128 = dma.hbm_to_vmem [thread:$0]  %s3582_s8, 32, %s126_s29, [#allocation17]  }
  0xbe   :  { %s3069_s3 = scalar_lea.hbm %s3584_s10, 32 }
  0xbf   :  { %p3070_p4 = scmp.ne.s32.totalorder %s3584_s10, %s3069_s3  ;;  %p3073_p5 = scmp.lt.u32.totalorder %s3069_s3, %s3584_s10 }
  0xc1   :  { %p3075_p6 = pnand %p3073_p5, %p3070_p4 }
  0xc3   :  { %3078 = shalt.err (!%p3075_p6)
}
  0xc4   :  { %s3079_s27 = scalar_lea.vmem %s148_s20, 32  ;;  %p3084_p8 = scmp.lt.s32.totalorder %s148_s20, %s148_s20 }
  0xc5   :  { %p3080_p7 = scmp.ne.s32.totalorder %s148_s20, %s3079_s27  ;;  %p3085_p9 = scmp.lt.s32.totalorder %s3079_s27, %s3079_s27 }
  0xc7   :  { %p3086_p10 = por %p3085_p9, %p3084_p8 }
  0xc9   :  { %p3087_p11 = pnand %p3086_p10, %p3080_p7 }
  0xcb   :  { %3090 = shalt.err (!%p3087_p11)
}
  0xcc   :  { %150 = dma.hbm_to_vmem [thread:$0]  %s3584_s10, 32, %s148_s20, [#allocation20]  }
  0xcd   :  { %s3191_s26 = smov [#allocation24]   ;;  %s3192_s0 = smov [#allocation25]  }
  0xce   :  { %s169_s4 = sshll.u32 %s3191_s26, 4  ;;  %s179_s28 = sshll.u32 %s3192_s0, 4  ;;  %s170_s4 = int_to_ptr.vmem [resolvable:$true] %s169_s4  ;;  %s180_s28 = int_to_ptr.vmem [resolvable:$true] %s179_s28 }
  0xcf   :  { %s3091_s18 = scalar_lea.hbm %s3586_s12, 32 }
  0xd0   :  { %p3092_p12 = scmp.ne.s32.totalorder %s3586_s12, %s3091_s18  ;;  %p3095_p13 = scmp.lt.u32.totalorder %s3091_s18, %s3586_s12 }
  0xd2   :  { %p3097_p0 = pnand %p3095_p13, %p3092_p12 }
  0xd4   :  { %3100 = shalt.err (!%p3097_p0)
}
  0xd5   :  { %s3101_s10 = scalar_lea.vmem %s170_s4, 32  ;;  %p3106_p2 = scmp.lt.s32.totalorder %s170_s4, %s170_s4 }
  0xd6   :  { %p3102_p1 = scmp.ne.s32.totalorder %s170_s4, %s3101_s10  ;;  %p3107_p3 = scmp.lt.s32.totalorder %s3101_s10, %s3101_s10 }
  0xd8   :  { %p3108_p4 = por %p3107_p3, %p3106_p2 }
  0xda   :  { %p3109_p5 = pnand %p3108_p4, %p3102_p1 }
  0xdc   :  { %3112 = shalt.err (!%p3109_p5)
}
  0xdd   :  { %172 = dma.hbm_to_vmem [thread:$0]  %s3586_s12, 32, %s170_s4, [#allocation23]  }
  0xde   :  { %s3113_s7 = scalar_lea.hbm %s3587_s13, 32 }
  0xdf   :  { %p3114_p6 = scmp.ne.s32.totalorder %s3587_s13, %s3113_s7  ;;  %p3117_p7 = scmp.lt.u32.totalorder %s3113_s7, %s3587_s13 }
  0xe1   :  { %p3119_p8 = pnand %p3117_p7, %p3114_p6 }
  0xe3   :  { %3122 = shalt.err (!%p3119_p8)
}
  0xe4   :  { %s3123_s16 = scalar_lea.vmem %s180_s28, 32  ;;  %p3128_p10 = scmp.lt.s32.totalorder %s180_s28, %s180_s28 }
  0xe5   :  { %p3124_p9 = scmp.ne.s32.totalorder %s180_s28, %s3123_s16  ;;  %p3129_p11 = scmp.lt.s32.totalorder %s3123_s16, %s3123_s16 }
  0xe7   :  { %p3130_p12 = por %p3129_p11, %p3128_p10 }
  0xe9   :  { %p3131_p13 = pnand %p3130_p12, %p3124_p9 }
  0xeb   :  { %3134 = shalt.err (!%p3131_p13)
}
  0xec   :  { %182 = dma.hbm_to_vmem [thread:$0]  %s3587_s13, 32, %s180_s28, [#allocation26]  }
  0xed   :  { %3157 = dma.done.wait [#allocation5], 256  }
  0xee   :  { %3158 = vsyncadd [#allocation5], 4294967040 }
  0xef   :  { %3159 = dma.done.wait [#allocation8], 49184  }
  0xf0   :  { %3160 = vsyncadd [#allocation8], 4294918112 }
  0xf1   :  { %3161 = dma.done.wait [#allocation11], 8224  }
  0xf2   :  { %3162 = vsyncadd [#allocation11], 4294959072 }
  0xf3   :  { %3163 = dma.done.wait [#allocation14], 8224  }
  0xf4   :  { %3164 = vsyncadd [#allocation14], 4294959072 }
  0xf5   :  { %3165 = dma.done.wait [#allocation17], 8224  }
  0xf6   :  { %3166 = vsyncadd [#allocation17], 4294959072 }
  0xf7   :  { %3167 = dma.done.wait [#allocation20], 8224  }
  0xf8   :  { %3168 = vsyncadd [#allocation20], 4294959072 }
  0xf9   :  { %3169 = dma.done.wait [#allocation23], 8224  }
  0xfa   :  { %3170 = vsyncadd [#allocation23], 4294959072 }
  0xfb   :  { %3171 = dma.done.wait [#allocation26], 32  }
  0xfc   :  { %3172 = vsyncadd [#allocation26], 4294967264  ;;  %v231_v1 = vld [vmem:[#allocation7 + $0x8] sm:$0xff]  ;;  %v230_v3 = vld [vmem:[#allocation7] sm:$0xff]  ;;  %s3194_s13 = smov [#allocation27]   ;;  %vm2072_vm0 = vcmask 57344  }
  0xfd   :  { %v243_v2 = vld [vmem:[#allocation7 + $0x68] sm:$0xff]  ;;  %v242_v5 = vld [vmem:[#allocation7 + $0x60] sm:$0xff]  ;;  %v233_v6 = vld [vmem:[#allocation7 + $0x18] sm:$0xff]  ;;  %s2080_s14 = sshll.u32 %s3194_s13, 4  ;;  %s2081_s14 = int_to_ptr.vmem [resolvable:$true] %s2080_s14 }
  0xfe   :  { %v2097_v4 = vpack.c.bf16 %v243_v2, %v231_v1  ;;  %v245_v7 = vld [vmem:[#allocation7 + $0x78] sm:$0xff]  ;;  %v2099_v8 = vpack.c.bf16 %v242_v5, %v230_v3  ;;  %v255_v10 = vld [vmem:[#allocation7 + $0xc8] sm:$0xff]  ;;  %v232_v12 = vld [vmem:[#allocation7 + $0x10] sm:$0xff]  ;;  %s3135_s19 = scalar_lea.vmem %s2081_s14, 16  ;;  %s3139_s27 = scalar_lea.vmem %s2081_s14, 32 }
  0xff   :  { %v2161_v9 = vpack.c.bf16 %v245_v7, %v233_v6  ;;  %v267_v11 = vld [vmem:[#allocation7 + $0x128] sm:$0xff]  ;;  %v244_v14 = vld [vmem:[#allocation7 + $0x70] sm:$0xff]  ;;  %v254_v15 = vld [vmem:[#allocation7 + $0xc0] sm:$0xff]  ;;  %p3136_p0 = scmp.ne.s32.totalorder %s2081_s14, %s3135_s19  ;;  %p3140_p1 = scmp.lt.s32.totalorder %s2081_s14, %s2081_s14 }
 0x100   :  { %2098 = vmatprep.subr.bf16.mxu0 %v2097_v4  ;;  %v2101_v13 = vpack.c.bf16 %v267_v11, %v255_v10  ;;  %v266_v16 = vld [vmem:[#allocation7 + $0x120] sm:$0xff]  ;;  %v2163_v17 = vpack.c.bf16 %v244_v14, %v232_v12  ;;  %v257_v19 = vld [vmem:[#allocation7 + $0xd8] sm:$0xff]  ;;  %v279_v21 = vld [vmem:[#allocation7 + $0x188] sm:$0xff]  ;;  %p3141_p2 = scmp.lt.s32.totalorder %s3139_s27, %s3135_s19 }
 0x101   :  { %2100 = vmatpush1.bf16.msra.mxu0 %v2099_v8  ;;  %2162 = vmatprep.subr.bf16.mxu1 %v2161_v9  ;;  %v2103_v18 = vpack.c.bf16 %v266_v16, %v254_v15  ;;  %v269_v20 = vld [vmem:[#allocation7 + $0x138] sm:$0xff]  ;;  %v291_v23 = vld [vmem:[#allocation7 + $0x1e8] sm:$0xff]  ;;  %v256_v24 = vld [vmem:[#allocation7 + $0xd0] sm:$0xff] }
 0x102   :  { %2102 = vmatprep.subr.bf16.mxu0 %v2101_v13  ;;  %v2165_v22 = vpack.c.bf16 %v269_v20, %v257_v19  ;;  %v268_v25 = vld [vmem:[#allocation7 + $0x130] sm:$0xff]  ;;  %2164 = vmatpush1.bf16.msra.mxu1 %v2163_v17  ;;  %v2105_v26 = vpack.c.bf16 %v291_v23, %v279_v21  ;;  %v278_v28 = vld [vmem:[#allocation7 + $0x180] sm:$0xff]  ;;  %v281_v30 = vld [vmem:[#allocation7 + $0x198] sm:$0xff]  ;;  %p3142_p3 = por %p3141_p2, %p3140_p1 }
 0x103   :  { %v2167_v27 = vpack.c.bf16 %v268_v25, %v256_v24  ;;  %v290_v29 = vld [vmem:[#allocation7 + $0x1e0] sm:$0xff]  ;;  %v293_v31 = vld [vmem:[#allocation7 + $0x1f8] sm:$0xff]  ;;  %v303_v32 = vld [vmem:[#allocation7 + $0x248] sm:$0xff] }
 0x104   :  { %2166 = vmatprep.subr.bf16.mxu1 %v2165_v22  ;;  %v315_v33 = vld [vmem:[#allocation7 + $0x2a8] sm:$0xff]  ;;  %v2107_v34 = vpack.c.bf16 %v290_v29, %v278_v28  ;;  %v2169_v35 = vpack.c.bf16 %v293_v31, %v281_v30  ;;  %v280_v36 = vld [vmem:[#allocation7 + $0x190] sm:$0xff]  ;;  %v302_v38 = vld [vmem:[#allocation7 + $0x240] sm:$0xff]  ;;  %p3143_p4 = pnand %p3142_p3, %p3136_p0 }
 0x105   :  { %2104 = vmatpush1.bf16.msra.mxu0 %v2103_v18  ;;  %v292_v37 = vld [vmem:[#allocation7 + $0x1f0] sm:$0xff]  ;;  %v2109_v39 = vpack.c.bf16 %v315_v33, %v303_v32  ;;  %v314_v40 = vld [vmem:[#allocation7 + $0x2a0] sm:$0xff]  ;;  %v305_v41 = vld [vmem:[#allocation7 + $0x258] sm:$0xff] }
 0x106   :  { %2106 = vmatprep.subr.bf16.mxu0 %v2105_v26  ;;  %v317_v42 = vld [vmem:[#allocation7 + $0x2b8] sm:$0xff]  ;;  %2168 = vmatpush1.bf16.msra.mxu1 %v2167_v27  ;;  %v2171_v43 = vpack.c.bf16 %v292_v37, %v280_v36  ;;  %v327_v44 = vld [vmem:[#allocation7 + $0x308] sm:$0xff]  ;;  %v304_v47 = vld [vmem:[#allocation7 + $0x250] sm:$0xff]  ;;  %v2111_v49 = vpack.c.bf16 %v314_v40, %v302_v38 }
 0x107   :  { %v339_v45 = vld [vmem:[#allocation7 + $0x368] sm:$0xff]  ;;  %2170 = vmatprep.subr.bf16.mxu1 %v2169_v35  ;;  %v2173_v46 = vpack.c.bf16 %v317_v42, %v305_v41  ;;  %v316_v48 = vld [vmem:[#allocation7 + $0x2b0] sm:$0xff]  ;;  %v329_v50 = vld [vmem:[#allocation7 + $0x318] sm:$0xff] }
 0x108   :  { %v341_v51 = vld [vmem:[#allocation7 + $0x378] sm:$0xff]  ;;  %v2113_v52 = vpack.c.bf16 %v339_v45, %v327_v44  ;;  %v326_v53 = vld [vmem:[#allocation7 + $0x300] sm:$0xff]  ;;  %v2175_v55 = vpack.c.bf16 %v316_v48, %v304_v47  ;;  %v351_v56 = vld [vmem:[#allocation7 + $0x3c8] sm:$0xff] }
 0x109   :  { %2108 = vmatpush1.bf16.msra.mxu0 %v2107_v34  ;;  %v338_v54 = vld [vmem:[#allocation7 + $0x360] sm:$0xff]  ;;  %v363_v57 = vld [vmem:[#allocation7 + $0x428] sm:$0xff]  ;;  %v2177_v58 = vpack.c.bf16 %v341_v51, %v329_v50  ;;  %v328_v59 = vld [vmem:[#allocation7 + $0x310] sm:$0xff] }
 0x10a   :  { %2110 = vmatprep.subr.bf16.mxu0 %v2109_v39  ;;  %2172 = vmatpush1.bf16.msra.mxu1 %v2171_v43  ;;  %v340_v60 = vld [vmem:[#allocation7 + $0x370] sm:$0xff]  ;;  %v2115_v61 = vpack.c.bf16 %v338_v54, %v326_v53  ;;  %v353_v62 = vld [vmem:[#allocation7 + $0x3d8] sm:$0xff]  ;;  %v2117_v0 = vpack.c.bf16 %v363_v57, %v351_v56  ;;  %v350_v1 = vld [vmem:[#allocation7 + $0x3c0] sm:$0xff] }
 0x10b   :  { %2174 = vmatprep.subr.bf16.mxu1 %v2173_v46  ;;  %v365_v63 = vld [vmem:[#allocation7 + $0x438] sm:$0xff]  ;;  %v362_v2 = vld [vmem:[#allocation7 + $0x420] sm:$0xff]  ;;  %v2179_v3 = vpack.c.bf16 %v340_v60, %v328_v59  ;;  %v375_v4 = vld [vmem:[#allocation7 + $0x488] sm:$0xff] }
 0x10c   :  { %v387_v5 = vld [vmem:[#allocation7 + $0x4e8] sm:$0xff]  ;;  %v2181_v6 = vpack.c.bf16 %v365_v63, %v353_v62  ;;  %v352_v7 = vld [vmem:[#allocation7 + $0x3d0] sm:$0xff]  ;;  %v2119_v9 = vpack.c.bf16 %v362_v2, %v350_v1  ;;  %v377_v10 = vld [vmem:[#allocation7 + $0x498] sm:$0xff] }
 0x10d   :  { %2112 = vmatpush1.bf16.msra.mxu0 %v2111_v49  ;;  %v364_v8 = vld [vmem:[#allocation7 + $0x430] sm:$0xff]  ;;  %v389_v11 = vld [vmem:[#allocation7 + $0x4f8] sm:$0xff]  ;;  %v2121_v12 = vpack.c.bf16 %v387_v5, %v375_v4  ;;  %v374_v13 = vld [vmem:[#allocation7 + $0x480] sm:$0xff] }
 0x10e   :  { %2114 = vmatprep.subr.bf16.mxu0 %v2113_v52  ;;  %2176 = vmatpush1.bf16.msra.mxu1 %v2175_v55  ;;  %v386_v14 = vld [vmem:[#allocation7 + $0x4e0] sm:$0xff]  ;;  %v2183_v15 = vpack.c.bf16 %v364_v8, %v352_v7  ;;  %v399_v16 = vld [vmem:[#allocation7 + $0x548] sm:$0xff]  ;;  %v2185_v18 = vpack.c.bf16 %v389_v11, %v377_v10  ;;  %v376_v19 = vld [vmem:[#allocation7 + $0x490] sm:$0xff] }
 0x10f   :  { %2178 = vmatprep.subr.bf16.mxu1 %v2177_v58  ;;  %v411_v17 = vld [vmem:[#allocation7 + $0x5a8] sm:$0xff]  ;;  %v388_v20 = vld [vmem:[#allocation7 + $0x4f0] sm:$0xff]  ;;  %v2123_v21 = vpack.c.bf16 %v386_v14, %v374_v13  ;;  %v401_v22 = vld [vmem:[#allocation7 + $0x558] sm:$0xff] }
 0x110   :  { %v413_v23 = vld [vmem:[#allocation7 + $0x5b8] sm:$0xff]  ;;  %v2125_v24 = vpack.c.bf16 %v411_v17, %v399_v16  ;;  %v398_v25 = vld [vmem:[#allocation7 + $0x540] sm:$0xff]  ;;  %v2187_v27 = vpack.c.bf16 %v388_v20, %v376_v19  ;;  %v423_v28 = vld [vmem:[#allocation7 + $0x608] sm:$0xff] }
 0x111   :  { %2116 = vmatpush1.bf16.msra.mxu0 %v2115_v61  ;;  %v410_v26 = vld [vmem:[#allocation7 + $0x5a0] sm:$0xff]  ;;  %v435_v29 = vld [vmem:[#allocation7 + $0x668] sm:$0xff]  ;;  %v2189_v30 = vpack.c.bf16 %v413_v23, %v401_v22  ;;  %v400_v31 = vld [vmem:[#allocation7 + $0x550] sm:$0xff] }
 0x112   :  { %2118 = vmatprep.subr.bf16.mxu0 %v2117_v0  ;;  %2180 = vmatpush1.bf16.msra.mxu1 %v2179_v3  ;;  %v412_v32 = vld [vmem:[#allocation7 + $0x5b0] sm:$0xff]  ;;  %v2127_v33 = vpack.c.bf16 %v410_v26, %v398_v25  ;;  %v425_v34 = vld [vmem:[#allocation7 + $0x618] sm:$0xff]  ;;  %v2129_v36 = vpack.c.bf16 %v435_v29, %v423_v28  ;;  %v422_v37 = vld [vmem:[#allocation7 + $0x600] sm:$0xff] }
 0x113   :  { %2182 = vmatprep.subr.bf16.mxu1 %v2181_v6  ;;  %v437_v35 = vld [vmem:[#allocation7 + $0x678] sm:$0xff]  ;;  %v434_v38 = vld [vmem:[#allocation7 + $0x660] sm:$0xff]  ;;  %v2191_v39 = vpack.c.bf16 %v412_v32, %v400_v31  ;;  %v447_v40 = vld [vmem:[#allocation7 + $0x6c8] sm:$0xff] }
 0x114   :  { %v459_v41 = vld [vmem:[#allocation7 + $0x728] sm:$0xff]  ;;  %v2193_v42 = vpack.c.bf16 %v437_v35, %v425_v34  ;;  %v424_v43 = vld [vmem:[#allocation7 + $0x610] sm:$0xff]  ;;  %v2131_v45 = vpack.c.bf16 %v434_v38, %v422_v37  ;;  %v449_v46 = vld [vmem:[#allocation7 + $0x6d8] sm:$0xff] }
 0x115   :  { %2120 = vmatpush1.bf16.msra.mxu0 %v2119_v9  ;;  %v436_v44 = vld [vmem:[#allocation7 + $0x670] sm:$0xff]  ;;  %v461_v47 = vld [vmem:[#allocation7 + $0x738] sm:$0xff]  ;;  %v2133_v48 = vpack.c.bf16 %v459_v41, %v447_v40  ;;  %v446_v49 = vld [vmem:[#allocation7 + $0x6c0] sm:$0xff] }
 0x116   :  { %2122 = vmatprep.subr.bf16.mxu0 %v2121_v12  ;;  %2184 = vmatpush1.bf16.msra.mxu1 %v2183_v15  ;;  %v458_v50 = vld [vmem:[#allocation7 + $0x720] sm:$0xff]  ;;  %v2195_v51 = vpack.c.bf16 %v436_v44, %v424_v43  ;;  %v471_v52 = vld [vmem:[#allocation7 + $0x788] sm:$0xff]  ;;  %v2197_v54 = vpack.c.bf16 %v461_v47, %v449_v46  ;;  %v448_v55 = vld [vmem:[#allocation7 + $0x6d0] sm:$0xff] }
 0x117   :  { %2186 = vmatprep.subr.bf16.mxu1 %v2185_v18  ;;  %v483_v53 = vld [vmem:[#allocation7 + $0x7e8] sm:$0xff]  ;;  %v460_v56 = vld [vmem:[#allocation7 + $0x730] sm:$0xff]  ;;  %v2135_v57 = vpack.c.bf16 %v458_v50, %v446_v49  ;;  %v473_v58 = vld [vmem:[#allocation7 + $0x798] sm:$0xff] }
 0x118   :  { %v485_v59 = vld [vmem:[#allocation7 + $0x7f8] sm:$0xff]  ;;  %v2137_v60 = vpack.c.bf16 %v483_v53, %v471_v52  ;;  %v470_v61 = vld [vmem:[#allocation7 + $0x780] sm:$0xff]  ;;  %v2199_v63 = vpack.c.bf16 %v460_v56, %v448_v55  ;;  %v495_v0 = vld [vmem:[#allocation7 + $0x848] sm:$0xff] }
 0x119   :  { %2124 = vmatpush1.bf16.msra.mxu0 %v2123_v21  ;;  %v482_v62 = vld [vmem:[#allocation7 + $0x7e0] sm:$0xff]  ;;  %v507_v1 = vld [vmem:[#allocation7 + $0x8a8] sm:$0xff]  ;;  %v2201_v2 = vpack.c.bf16 %v485_v59, %v473_v58  ;;  %v472_v3 = vld [vmem:[#allocation7 + $0x790] sm:$0xff] }
 0x11a   :  { %2126 = vmatprep.subr.bf16.mxu0 %v2125_v24  ;;  %2188 = vmatpush1.bf16.msra.mxu1 %v2187_v27  ;;  %v484_v4 = vld [vmem:[#allocation7 + $0x7f0] sm:$0xff]  ;;  %v2139_v5 = vpack.c.bf16 %v482_v62, %v470_v61  ;;  %v497_v6 = vld [vmem:[#allocation7 + $0x858] sm:$0xff]  ;;  %v2141_v8 = vpack.c.bf16 %v507_v1, %v495_v0  ;;  %v494_v9 = vld [vmem:[#allocation7 + $0x840] sm:$0xff] }
 0x11b   :  { %2190 = vmatprep.subr.bf16.mxu1 %v2189_v30  ;;  %v509_v7 = vld [vmem:[#allocation7 + $0x8b8] sm:$0xff]  ;;  %v506_v10 = vld [vmem:[#allocation7 + $0x8a0] sm:$0xff]  ;;  %v2203_v12 = vpack.c.bf16 %v484_v4, %v472_v3  ;;  %v519_v13 = vld [vmem:[#allocation7 + $0x908] sm:$0xff] }
 0x11c   :  { %v3475_v11 = vld [vmem:[#allocation4 + $0x8] sm:$0xff]  ;;  %v531_v14 = vld [vmem:[#allocation7 + $0x968] sm:$0xff]  ;;  %v2205_v15 = vpack.c.bf16 %v509_v7, %v497_v6  ;;  %v496_v16 = vld [vmem:[#allocation7 + $0x850] sm:$0xff]  ;;  %v2143_v18 = vpack.c.bf16 %v506_v10, %v494_v9 }
 0x11d   :  { %2128 = vmatpush1.bf16.msra.mxu0 %v2127_v33  ;;  %678 = vmatprep.mubr.f32.mxu0 %v3475_v11  ;;  %v508_v17 = vld [vmem:[#allocation7 + $0x8b0] sm:$0xff]  ;;  %v521_v19 = vld [vmem:[#allocation7 + $0x918] sm:$0xff]  ;;  %v2145_v21 = vpack.c.bf16 %v531_v14, %v519_v13  ;;  %v518_v22 = vld [vmem:[#allocation7 + $0x900] sm:$0xff] }
 0x11e   :  { %2130 = vmatprep.subr.bf16.mxu0 %v2129_v36  ;;  %2192 = vmatpush1.bf16.msra.mxu1 %v2191_v39  ;;  %v533_v20 = vld [vmem:[#allocation7 + $0x978] sm:$0xff]  ;;  %v530_v23 = vld [vmem:[#allocation7 + $0x960] sm:$0xff]  ;;  %v2207_v24 = vpack.c.bf16 %v508_v17, %v496_v16  ;;  %v543_v25 = vld [vmem:[#allocation7 + $0x9c8] sm:$0xff] }
 0x11f   :  { %2194 = vmatprep.subr.bf16.mxu1 %v2193_v42  ;;  %749 = vmatprep.mubr.f32.mxu1 %v3475_v11  ;;  %v555_v26 = vld [vmem:[#allocation7 + $0xa28] sm:$0xff]  ;;  %v2209_v27 = vpack.c.bf16 %v533_v20, %v521_v19  ;;  %v520_v28 = vld [vmem:[#allocation7 + $0x910] sm:$0xff]  ;;  %v2147_v30 = vpack.c.bf16 %v530_v23, %v518_v22  ;;  %v545_v31 = vld [vmem:[#allocation7 + $0x9d8] sm:$0xff] }
 0x120   :  { %v532_v29 = vld [vmem:[#allocation7 + $0x970] sm:$0xff]  ;;  %v557_v32 = vld [vmem:[#allocation7 + $0xa38] sm:$0xff]  ;;  %v2149_v33 = vpack.c.bf16 %v555_v26, %v543_v25  ;;  %v542_v34 = vld [vmem:[#allocation7 + $0x9c0] sm:$0xff] }
 0x121   :  { %2132 = vmatpush1.bf16.msra.mxu0 %v2131_v45  ;;  %v554_v35 = vld [vmem:[#allocation7 + $0xa20] sm:$0xff]  ;;  %v2211_v36 = vpack.c.bf16 %v532_v29, %v520_v28  ;;  %v567_v37 = vld [vmem:[#allocation7 + $0xa88] sm:$0xff]  ;;  %v2213_v39 = vpack.c.bf16 %v557_v32, %v545_v31  ;;  %v544_v40 = vld [vmem:[#allocation7 + $0x9d0] sm:$0xff] }
 0x122   :  { %2134 = vmatprep.subr.bf16.mxu0 %v2133_v48  ;;  %2196 = vmatpush1.bf16.msra.mxu1 %v2195_v51  ;;  %v579_v38 = vld [vmem:[#allocation7 + $0xae8] sm:$0xff]  ;;  %v556_v41 = vld [vmem:[#allocation7 + $0xa30] sm:$0xff]  ;;  %v2151_v42 = vpack.c.bf16 %v554_v35, %v542_v34  ;;  %v569_v43 = vld [vmem:[#allocation7 + $0xa98] sm:$0xff] }
 0x123   :  { %2198 = vmatprep.subr.bf16.mxu1 %v2197_v54  ;;  %v581_v44 = vld [vmem:[#allocation7 + $0xaf8] sm:$0xff]  ;;  %v2153_v45 = vpack.c.bf16 %v579_v38, %v567_v37  ;;  %v566_v46 = vld [vmem:[#allocation7 + $0xa80] sm:$0xff]  ;;  %v2215_v48 = vpack.c.bf16 %v556_v41, %v544_v40  ;;  %v591_v49 = vld [vmem:[#allocation7 + $0xb48] sm:$0xff] }
 0x124   :  { %v578_v47 = vld [vmem:[#allocation7 + $0xae0] sm:$0xff]  ;;  %v603_v50 = vld [vmem:[#allocation7 + $0xba8] sm:$0xff]  ;;  %v2217_v51 = vpack.c.bf16 %v581_v44, %v569_v43  ;;  %v568_v52 = vld [vmem:[#allocation7 + $0xa90] sm:$0xff] }
 0x125   :  { %2136 = vmatpush1.bf16.msra.mxu0 %v2135_v57  ;;  %v580_v53 = vld [vmem:[#allocation7 + $0xaf0] sm:$0xff]  ;;  %v2155_v54 = vpack.c.bf16 %v578_v47, %v566_v46  ;;  %v593_v55 = vld [vmem:[#allocation7 + $0xb58] sm:$0xff]  ;;  %v2157_v57 = vpack.c.bf16 %v603_v50, %v591_v49  ;;  %v590_v58 = vld [vmem:[#allocation7 + $0xb40] sm:$0xff] }
 0x126   :  { %2138 = vmatprep.subr.bf16.mxu0 %v2137_v60  ;;  %2200 = vmatpush1.bf16.msra.mxu1 %v2199_v63  ;;  %v605_v56 = vld [vmem:[#allocation7 + $0xbb8] sm:$0xff]  ;;  %v602_v59 = vld [vmem:[#allocation7 + $0xba0] sm:$0xff]  ;;  %v2219_v60 = vpack.c.bf16 %v580_v53, %v568_v52  ;;  %v235_v61 = vld [vmem:[#allocation7 + $0x28] sm:$0xff] }
 0x127   :  { %2202 = vmatprep.subr.bf16.mxu1 %v2201_v2  ;;  %v247_v62 = vld [vmem:[#allocation7 + $0x88] sm:$0xff]  ;;  %v2221_v63 = vpack.c.bf16 %v605_v56, %v593_v55  ;;  %v592_v0 = vld [vmem:[#allocation7 + $0xb50] sm:$0xff]  ;;  %v2159_v2 = vpack.c.bf16 %v602_v59, %v590_v58  ;;  %v237_v3 = vld [vmem:[#allocation7 + $0x38] sm:$0xff] }
 0x128   :  { %v604_v1 = vld [vmem:[#allocation7 + $0xbb0] sm:$0xff]  ;;  %v249_v4 = vld [vmem:[#allocation7 + $0x98] sm:$0xff]  ;;  %v234_v6 = vld [vmem:[#allocation7 + $0x20] sm:$0xff] }
 0x129   :  { %2140 = vmatpush1.bf16.msra.mxu0 %v2139_v5  ;;  %v2225_v5 = vpack.c.bf16 %v247_v62, %v235_v61  ;;  %v246_v7 = vld [vmem:[#allocation7 + $0x80] sm:$0xff]  ;;  %v259_v9 = vld [vmem:[#allocation7 + $0xe8] sm:$0xff]  ;;  %v236_v13 = vld [vmem:[#allocation7 + $0x30] sm:$0xff] }
 0x12a   :  { %2142 = vmatprep.subr.bf16.mxu0 %v2141_v8  ;;  %2204 = vmatpush1.bf16.msra.mxu1 %v2203_v12  ;;  %v2223_v8 = vpack.c.bf16 %v604_v1, %v592_v0  ;;  %v271_v10 = vld [vmem:[#allocation7 + $0x148] sm:$0xff]  ;;  %v2289_v12 = vpack.c.bf16 %v249_v4, %v237_v3  ;;  %v248_v14 = vld [vmem:[#allocation7 + $0x90] sm:$0xff]  ;;  %v2227_v16 = vpack.c.bf16 %v246_v7, %v234_v6  ;;  %v261_v17 = vld [vmem:[#allocation7 + $0xf8] sm:$0xff] }
 0x12b   :  { %2206 = vmatprep.subr.bf16.mxu1 %v2205_v15  ;;  %v3479_v15 = vld [vmem:[#allocation4] sm:$0xff]  ;;  %v2229_v19 = vpack.c.bf16 %v271_v10, %v259_v9  ;;  %v258_v20 = vld [vmem:[#allocation7 + $0xe0] sm:$0xff]  ;;  %v2291_v22 = vpack.c.bf16 %v248_v14, %v236_v13  ;;  %v283_v23 = vld [vmem:[#allocation7 + $0x1a8] sm:$0xff] }
 0x12c   :  { %v260_v26 = vld [vmem:[#allocation7 + $0xf0] sm:$0xff]  ;;  %v285_v29 = vld [vmem:[#allocation7 + $0x1b8] sm:$0xff]  ;;  %v282_v32 = vld [vmem:[#allocation7 + $0x1a0] sm:$0xff] }
 0x12d   :  { %2144 = vmatpush1.bf16.msra.mxu0 %v2143_v18  ;;  %v273_v18 = vld [vmem:[#allocation7 + $0x158] sm:$0xff]  ;;  %v307_v35 = vld [vmem:[#allocation7 + $0x268] sm:$0xff]  ;;  %v284_v38 = vld [vmem:[#allocation7 + $0x1b0] sm:$0xff] }
 0x12e   :  { %2146 = vmatprep.subr.bf16.mxu0 %v2145_v21  ;;  %2208 = vmatpush1.bf16.msra.mxu1 %v2207_v24  ;;  %v270_v21 = vld [vmem:[#allocation7 + $0x140] sm:$0xff]  ;;  %v295_v24 = vld [vmem:[#allocation7 + $0x208] sm:$0xff]  ;;  %v2293_v25 = vpack.c.bf16 %v273_v18, %v261_v17  ;;  %v309_v41 = vld [vmem:[#allocation7 + $0x278] sm:$0xff] }
 0x12f   :  { %2210 = vmatprep.subr.bf16.mxu1 %v2209_v27  ;;  %v272_v27 = vld [vmem:[#allocation7 + $0x150] sm:$0xff]  ;;  %v2231_v28 = vpack.c.bf16 %v270_v21, %v258_v20  ;;  %v2233_v31 = vpack.c.bf16 %v295_v24, %v283_v23  ;;  %v306_v44 = vld [vmem:[#allocation7 + $0x260] sm:$0xff]  ;;  %v331_v47 = vld [vmem:[#allocation7 + $0x328] sm:$0xff] }
 0x130   :  { %v2295_v34 = vpack.c.bf16 %v272_v27, %v260_v26  ;;  %v308_v50 = vld [vmem:[#allocation7 + $0x270] sm:$0xff]  ;;  %v333_v53 = vld [vmem:[#allocation7 + $0x338] sm:$0xff]  ;;  %v330_v56 = vld [vmem:[#allocation7 + $0x320] sm:$0xff] }
 0x131   :  { %2148 = vmatpush1.bf16.msra.mxu0 %v2147_v30  ;;  %v297_v30 = vld [vmem:[#allocation7 + $0x218] sm:$0xff]  ;;  %v355_v59 = vld [vmem:[#allocation7 + $0x3e8] sm:$0xff]  ;;  %v332_v62 = vld [vmem:[#allocation7 + $0x330] sm:$0xff] }
 0x132   :  { %2150 = vmatprep.subr.bf16.mxu0 %v2149_v33  ;;  %2212 = vmatpush1.bf16.msra.mxu1 %v2211_v36  ;;  %v294_v33 = vld [vmem:[#allocation7 + $0x200] sm:$0xff]  ;;  %v319_v36 = vld [vmem:[#allocation7 + $0x2c8] sm:$0xff]  ;;  %v2297_v37 = vpack.c.bf16 %v297_v30, %v285_v29  ;;  %v357_v1 = vld [vmem:[#allocation7 + $0x3f8] sm:$0xff] }
 0x133   :  { %2214 = vmatprep.subr.bf16.mxu1 %v2213_v39  ;;  %v296_v39 = vld [vmem:[#allocation7 + $0x210] sm:$0xff]  ;;  %v2235_v40 = vpack.c.bf16 %v294_v33, %v282_v32  ;;  %v2237_v43 = vpack.c.bf16 %v319_v36, %v307_v35  ;;  %v354_v4 = vld [vmem:[#allocation7 + $0x3e0] sm:$0xff]  ;;  %v379_v7 = vld [vmem:[#allocation7 + $0x4a8] sm:$0xff] }
 0x134   :  { %v2299_v46 = vpack.c.bf16 %v296_v39, %v284_v38  ;;  %v356_v10 = vld [vmem:[#allocation7 + $0x3f0] sm:$0xff]  ;;  %v381_v14 = vld [vmem:[#allocation7 + $0x4b8] sm:$0xff]  ;;  %v378_v18 = vld [vmem:[#allocation7 + $0x4a0] sm:$0xff] }
 0x135   :  { %2152 = vmatpush1.bf16.msra.mxu0 %v2151_v42  ;;  %v321_v42 = vld [vmem:[#allocation7 + $0x2d8] sm:$0xff]  ;;  %v403_v21 = vld [vmem:[#allocation7 + $0x568] sm:$0xff]  ;;  %v380_v24 = vld [vmem:[#allocation7 + $0x4b0] sm:$0xff] }
 0x136   :  { %2154 = vmatprep.subr.bf16.mxu0 %v2153_v45  ;;  %2216 = vmatpush1.bf16.msra.mxu1 %v2215_v48  ;;  %v318_v45 = vld [vmem:[#allocation7 + $0x2c0] sm:$0xff]  ;;  %v343_v48 = vld [vmem:[#allocation7 + $0x388] sm:$0xff]  ;;  %v2301_v49 = vpack.c.bf16 %v321_v42, %v309_v41  ;;  %v405_v27 = vld [vmem:[#allocation7 + $0x578] sm:$0xff] }
 0x137   :  { %2218 = vmatprep.subr.bf16.mxu1 %v2217_v51  ;;  %v320_v51 = vld [vmem:[#allocation7 + $0x2d0] sm:$0xff]  ;;  %v2239_v52 = vpack.c.bf16 %v318_v45, %v306_v44  ;;  %v2241_v55 = vpack.c.bf16 %v343_v48, %v331_v47  ;;  %v402_v30 = vld [vmem:[#allocation7 + $0x560] sm:$0xff]  ;;  %v427_v33 = vld [vmem:[#allocation7 + $0x628] sm:$0xff] }
 0x138   :  { %v2303_v58 = vpack.c.bf16 %v320_v51, %v308_v50  ;;  %v404_v36 = vld [vmem:[#allocation7 + $0x570] sm:$0xff]  ;;  %v429_v39 = vld [vmem:[#allocation7 + $0x638] sm:$0xff]  ;;  %v426_v42 = vld [vmem:[#allocation7 + $0x620] sm:$0xff] }
 0x139   :  { %2156 = vmatpush1.bf16.msra.mxu0 %v2155_v54  ;;  %v345_v54 = vld [vmem:[#allocation7 + $0x398] sm:$0xff]  ;;  %v451_v45 = vld [vmem:[#allocation7 + $0x6e8] sm:$0xff]  ;;  %v428_v48 = vld [vmem:[#allocation7 + $0x630] sm:$0xff] }
 0x13a   :  { %2158 = vmatprep.subr.bf16.mxu0 %v2157_v57  ;;  %2220 = vmatpush1.bf16.msra.mxu1 %v2219_v60  ;;  %v342_v57 = vld [vmem:[#allocation7 + $0x380] sm:$0xff]  ;;  %v367_v60 = vld [vmem:[#allocation7 + $0x448] sm:$0xff]  ;;  %v2305_v61 = vpack.c.bf16 %v345_v54, %v333_v53  ;;  %v453_v51 = vld [vmem:[#allocation7 + $0x6f8] sm:$0xff] }
 0x13b   :  { %2222 = vmatprep.subr.bf16.mxu1 %v2221_v63  ;;  %v344_v63 = vld [vmem:[#allocation7 + $0x390] sm:$0xff]  ;;  %v2243_v0 = vpack.c.bf16 %v342_v57, %v330_v56  ;;  %v2245_v3 = vpack.c.bf16 %v367_v60, %v355_v59  ;;  %v450_v54 = vld [vmem:[#allocation7 + $0x6e0] sm:$0xff]  ;;  %v475_v57 = vld [vmem:[#allocation7 + $0x7a8] sm:$0xff] }
 0x13c   :  { %v2307_v6 = vpack.c.bf16 %v344_v63, %v332_v62  ;;  %v452_v60 = vld [vmem:[#allocation7 + $0x6f0] sm:$0xff]  ;;  %v477_v63 = vld [vmem:[#allocation7 + $0x7b8] sm:$0xff] }
 0x13d   :  { %2160 = vmatpush1.bf16.msra.mxu0 %v2159_v2  ;;  %v369_v2 = vld [vmem:[#allocation7 + $0x458] sm:$0xff] }
 0x13e   :  { %2226 = vmatprep.subr.bf16.mxu0 %v2225_v5  ;;  %2224 = vmatpush1.bf16.msra.mxu1 %v2223_v8  ;;  %v366_v5 = vld [vmem:[#allocation7 + $0x440] sm:$0xff]  ;;  %v391_v8 = vld [vmem:[#allocation7 + $0x508] sm:$0xff]  ;;  %v2309_v9 = vpack.c.bf16 %v369_v2, %v357_v1 }
 0x13f   :  { %2290 = vmatprep.subr.bf16.mxu1 %v2289_v12  ;;  %v368_v12 = vld [vmem:[#allocation7 + $0x450] sm:$0xff]  ;;  %v2247_v13 = vpack.c.bf16 %v366_v5, %v354_v4  ;;  %v2249_v17 = vpack.c.bf16 %v391_v8, %v379_v7  ;;  %v474_v2 = vld [vmem:[#allocation7 + $0x7a0] sm:$0xff]  ;;  %v499_v5 = vld [vmem:[#allocation7 + $0x868] sm:$0xff] }
 0x140   :  { %679 = vmatmul.mubr.f32.vlgmr.msra.gmra.mrb[0].mxu0 %v3479_v15  ;;  %v2311_v20 = vpack.c.bf16 %v368_v12, %v356_v10  ;;  %v476_v8 = vld [vmem:[#allocation7 + $0x7b0] sm:$0xff]  ;;  %v501_v12 = vld [vmem:[#allocation7 + $0x878] sm:$0xff] }
 0x141   :  { %2228 = vmatpush1.bf16.msra.mxu0 %v2227_v16  ;;  %820 = vmatprep.mubr.f32.mxu0 %v3475_v11  ;;  %v393_v16 = vld [vmem:[#allocation7 + $0x518] sm:$0xff] }
 0x142   :  { %750 = vmatmul.mubr.f32.vlgmr.msra.gmra.mrb[0].mxu1 %v3479_v15  ;;  %2230 = vmatprep.subr.bf16.mxu0 %v2229_v19  ;;  %v390_v19 = vld [vmem:[#allocation7 + $0x500] sm:$0xff]  ;;  %v2313_v23 = vpack.c.bf16 %v393_v16, %v381_v14 }
 0x143   :  { %2292 = vmatpush1.bf16.msra.mxu1 %v2291_v22  ;;  %891 = vmatprep.mubr.f32.mxu1 %v3475_v11  ;;  %v415_v22 = vld [vmem:[#allocation7 + $0x5c8] sm:$0xff]  ;;  %v2251_v26 = vpack.c.bf16 %v390_v19, %v378_v18  ;;  %v498_v16 = vld [vmem:[#allocation7 + $0x860] sm:$0xff] }
 0x144   :  { %2294 = vmatprep.subr.bf16.mxu1 %v2293_v25  ;;  %v392_v25 = vld [vmem:[#allocation7 + $0x510] sm:$0xff]  ;;  %v2253_v29 = vpack.c.bf16 %v415_v22, %v403_v21  ;;  %v523_v19 = vld [vmem:[#allocation7 + $0x928] sm:$0xff] }
 0x145   :  { %2232 = vmatpush1.bf16.msra.mxu0 %v2231_v28  ;;  %v417_v28 = vld [vmem:[#allocation7 + $0x5d8] sm:$0xff]  ;;  %v2315_v32 = vpack.c.bf16 %v392_v25, %v380_v24  ;;  %v500_v22 = vld [vmem:[#allocation7 + $0x870] sm:$0xff] }
 0x146   :  { %2234 = vmatprep.subr.bf16.mxu0 %v2233_v31  ;;  %v414_v31 = vld [vmem:[#allocation7 + $0x5c0] sm:$0xff]  ;;  %v2317_v35 = vpack.c.bf16 %v417_v28, %v405_v27  ;;  %v525_v25 = vld [vmem:[#allocation7 + $0x938] sm:$0xff] }
 0x147   :  { %2296 = vmatpush1.bf16.msra.mxu1 %v2295_v34  ;;  %v439_v34 = vld [vmem:[#allocation7 + $0x688] sm:$0xff]  ;;  %v2255_v38 = vpack.c.bf16 %v414_v31, %v402_v30  ;;  %v522_v28 = vld [vmem:[#allocation7 + $0x920] sm:$0xff] }
 0x148   :  { %2298 = vmatprep.subr.bf16.mxu1 %v2297_v37  ;;  %v416_v37 = vld [vmem:[#allocation7 + $0x5d0] sm:$0xff]  ;;  %v2257_v41 = vpack.c.bf16 %v439_v34, %v427_v33  ;;  %v547_v31 = vld [vmem:[#allocation7 + $0x9e8] sm:$0xff] }
 0x149   :  { %2236 = vmatpush1.bf16.msra.mxu0 %v2235_v40  ;;  %v441_v40 = vld [vmem:[#allocation7 + $0x698] sm:$0xff]  ;;  %v2319_v44 = vpack.c.bf16 %v416_v37, %v404_v36  ;;  %v524_v34 = vld [vmem:[#allocation7 + $0x930] sm:$0xff] }
 0x14a   :  { %2238 = vmatprep.subr.bf16.mxu0 %v2237_v43  ;;  %v438_v43 = vld [vmem:[#allocation7 + $0x680] sm:$0xff]  ;;  %v2321_v47 = vpack.c.bf16 %v441_v40, %v429_v39  ;;  %v549_v37 = vld [vmem:[#allocation7 + $0x9f8] sm:$0xff] }
 0x14b   :  { %2300 = vmatpush1.bf16.msra.mxu1 %v2299_v46  ;;  %v463_v46 = vld [vmem:[#allocation7 + $0x748] sm:$0xff]  ;;  %v2259_v50 = vpack.c.bf16 %v438_v43, %v426_v42  ;;  %v546_v40 = vld [vmem:[#allocation7 + $0x9e0] sm:$0xff] }
 0x14c   :  { %2302 = vmatprep.subr.bf16.mxu1 %v2301_v49  ;;  %v440_v49 = vld [vmem:[#allocation7 + $0x690] sm:$0xff]  ;;  %v2261_v53 = vpack.c.bf16 %v463_v46, %v451_v45  ;;  %v571_v43 = vld [vmem:[#allocation7 + $0xaa8] sm:$0xff] }
 0x14d   :  { %2240 = vmatpush1.bf16.msra.mxu0 %v2239_v52  ;;  %v465_v52 = vld [vmem:[#allocation7 + $0x758] sm:$0xff]  ;;  %v2323_v56 = vpack.c.bf16 %v440_v49, %v428_v48  ;;  %v548_v46 = vld [vmem:[#allocation7 + $0x9f0] sm:$0xff] }
 0x14e   :  { %2242 = vmatprep.subr.bf16.mxu0 %v2241_v55  ;;  %v462_v55 = vld [vmem:[#allocation7 + $0x740] sm:$0xff]  ;;  %v2325_v59 = vpack.c.bf16 %v465_v52, %v453_v51  ;;  %v573_v49 = vld [vmem:[#allocation7 + $0xab8] sm:$0xff] }
 0x14f   :  { %2304 = vmatpush1.bf16.msra.mxu1 %v2303_v58  ;;  %v487_v58 = vld [vmem:[#allocation7 + $0x808] sm:$0xff]  ;;  %v2263_v62 = vpack.c.bf16 %v462_v55, %v450_v54  ;;  %v570_v52 = vld [vmem:[#allocation7 + $0xaa0] sm:$0xff] }
 0x150   :  { %2306 = vmatprep.subr.bf16.mxu1 %v2305_v61  ;;  %v464_v61 = vld [vmem:[#allocation7 + $0x750] sm:$0xff]  ;;  %v2265_v1 = vpack.c.bf16 %v487_v58, %v475_v57  ;;  %v595_v55 = vld [vmem:[#allocation7 + $0xb68] sm:$0xff] }
 0x151   :  { %2244 = vmatpush1.bf16.msra.mxu0 %v2243_v0  ;;  %v489_v0 = vld [vmem:[#allocation7 + $0x818] sm:$0xff]  ;;  %v2327_v4 = vpack.c.bf16 %v464_v61, %v452_v60  ;;  %v572_v58 = vld [vmem:[#allocation7 + $0xab0] sm:$0xff] }
 0x152   :  { %2246 = vmatprep.subr.bf16.mxu0 %v2245_v3  ;;  %v486_v3 = vld [vmem:[#allocation7 + $0x800] sm:$0xff]  ;;  %v2329_v7 = vpack.c.bf16 %v489_v0, %v477_v63  ;;  %v597_v61 = vld [vmem:[#allocation7 + $0xb78] sm:$0xff] }
 0x153   :  { %2308 = vmatpush1.bf16.msra.mxu1 %v2307_v6  ;;  %v511_v6 = vld [vmem:[#allocation7 + $0x8c8] sm:$0xff]  ;;  %v2267_v10 = vpack.c.bf16 %v486_v3, %v474_v2  ;;  %v594_v0 = vld [vmem:[#allocation7 + $0xb60] sm:$0xff] }
 0x154   :  { %2310 = vmatprep.subr.bf16.mxu1 %v2309_v9  ;;  %v488_v9 = vld [vmem:[#allocation7 + $0x810] sm:$0xff]  ;;  %v2269_v14 = vpack.c.bf16 %v511_v6, %v499_v5  ;;  %v239_v3 = vld [vmem:[#allocation7 + $0x48] sm:$0xff] }
 0x155   :  { %2248 = vmatpush1.bf16.msra.mxu0 %v2247_v13  ;;  %v513_v13 = vld [vmem:[#allocation7 + $0x8d8] sm:$0xff]  ;;  %v2331_v18 = vpack.c.bf16 %v488_v9, %v476_v8  ;;  %v596_v6 = vld [vmem:[#allocation7 + $0xb70] sm:$0xff] }
 0x156   :  { %2250 = vmatprep.subr.bf16.mxu0 %v2249_v17  ;;  %v510_v17 = vld [vmem:[#allocation7 + $0x8c0] sm:$0xff]  ;;  %v2333_v21 = vpack.c.bf16 %v513_v13, %v501_v12  ;;  %v241_v9 = vld [vmem:[#allocation7 + $0x58] sm:$0xff] }
 0x157   :  { %2312 = vmatpush1.bf16.msra.mxu1 %v2311_v20  ;;  %v535_v20 = vld [vmem:[#allocation7 + $0x988] sm:$0xff]  ;;  %v2271_v24 = vpack.c.bf16 %v510_v17, %v498_v16  ;;  %v238_v13 = vld [vmem:[#allocation7 + $0x40] sm:$0xff] }
 0x158   :  { %2314 = vmatprep.subr.bf16.mxu1 %v2313_v23  ;;  %v512_v23 = vld [vmem:[#allocation7 + $0x8d0] sm:$0xff]  ;;  %v2273_v27 = vpack.c.bf16 %v535_v20, %v523_v19  ;;  %v263_v17 = vld [vmem:[#allocation7 + $0x108] sm:$0xff] }
 0x159   :  { %2252 = vmatpush1.bf16.msra.mxu0 %v2251_v26  ;;  %v537_v26 = vld [vmem:[#allocation7 + $0x998] sm:$0xff]  ;;  %v2335_v30 = vpack.c.bf16 %v512_v23, %v500_v22  ;;  %v240_v20 = vld [vmem:[#allocation7 + $0x50] sm:$0xff] }
 0x15a   :  { %2254 = vmatprep.subr.bf16.mxu0 %v2253_v29  ;;  %v534_v29 = vld [vmem:[#allocation7 + $0x980] sm:$0xff]  ;;  %v2337_v33 = vpack.c.bf16 %v537_v26, %v525_v25  ;;  %v265_v23 = vld [vmem:[#allocation7 + $0x118] sm:$0xff] }
 0x15b   :  { %2316 = vmatpush1.bf16.msra.mxu1 %v2315_v32  ;;  %v559_v32 = vld [vmem:[#allocation7 + $0xa48] sm:$0xff]  ;;  %v2275_v36 = vpack.c.bf16 %v534_v29, %v522_v28  ;;  %v262_v26 = vld [vmem:[#allocation7 + $0x100] sm:$0xff] }
 0x15c   :  { %2318 = vmatprep.subr.bf16.mxu1 %v2317_v35  ;;  %v536_v35 = vld [vmem:[#allocation7 + $0x990] sm:$0xff]  ;;  %v2277_v39 = vpack.c.bf16 %v559_v32, %v547_v31  ;;  %v287_v29 = vld [vmem:[#allocation7 + $0x1c8] sm:$0xff] }
 0x15d   :  { %2256 = vmatpush1.bf16.msra.mxu0 %v2255_v38  ;;  %v561_v38 = vld [vmem:[#allocation7 + $0xa58] sm:$0xff]  ;;  %v2339_v42 = vpack.c.bf16 %v536_v35, %v524_v34  ;;  %v264_v32 = vld [vmem:[#allocation7 + $0x110] sm:$0xff] }
 0x15e   :  { %2258 = vmatprep.subr.bf16.mxu0 %v2257_v41  ;;  %v558_v41 = vld [vmem:[#allocation7 + $0xa40] sm:$0xff]  ;;  %v2341_v45 = vpack.c.bf16 %v561_v38, %v549_v37  ;;  %v289_v35 = vld [vmem:[#allocation7 + $0x1d8] sm:$0xff] }
 0x15f   :  { %2320 = vmatpush1.bf16.msra.mxu1 %v2319_v44  ;;  %v583_v44 = vld [vmem:[#allocation7 + $0xb08] sm:$0xff]  ;;  %v2279_v48 = vpack.c.bf16 %v558_v41, %v546_v40  ;;  %v286_v38 = vld [vmem:[#allocation7 + $0x1c0] sm:$0xff] }
 0x160   :  { %2322 = vmatprep.subr.bf16.mxu1 %v2321_v47  ;;  %v560_v47 = vld [vmem:[#allocation7 + $0xa50] sm:$0xff]  ;;  %v2281_v51 = vpack.c.bf16 %v583_v44, %v571_v43  ;;  %v311_v41 = vld [vmem:[#allocation7 + $0x288] sm:$0xff] }
 0x161   :  { %2260 = vmatpush1.bf16.msra.mxu0 %v2259_v50  ;;  %v585_v50 = vld [vmem:[#allocation7 + $0xb18] sm:$0xff]  ;;  %v2343_v54 = vpack.c.bf16 %v560_v47, %v548_v46  ;;  %v288_v44 = vld [vmem:[#allocation7 + $0x1d0] sm:$0xff] }
 0x162   :  { %2262 = vmatprep.subr.bf16.mxu0 %v2261_v53  ;;  %v582_v53 = vld [vmem:[#allocation7 + $0xb00] sm:$0xff]  ;;  %v2345_v57 = vpack.c.bf16 %v585_v50, %v573_v49  ;;  %v313_v47 = vld [vmem:[#allocation7 + $0x298] sm:$0xff] }
 0x163   :  { %2324 = vmatpush1.bf16.msra.mxu1 %v2323_v56  ;;  %v607_v56 = vld [vmem:[#allocation7 + $0xbc8] sm:$0xff]  ;;  %v2283_v60 = vpack.c.bf16 %v582_v53, %v570_v52  ;;  %v310_v49 = vld [vmem:[#allocation7 + $0x280] sm:$0xff] }
 0x164   :  { %2326 = vmatprep.subr.bf16.mxu1 %v2325_v59  ;;  %v584_v59 = vld [vmem:[#allocation7 + $0xb10] sm:$0xff]  ;;  %v2285_v63 = vpack.c.bf16 %v607_v56, %v595_v55  ;;  %v322_v50 = vld [vmem:[#allocation7 + $0x2e0] sm:$0xff]  ;;  %v335_v52 = vld [vmem:[#allocation7 + $0x348] sm:$0xff] }
 0x165   :  { %2264 = vmatpush1.bf16.msra.mxu0 %v2263_v62  ;;  %v609_v62 = vld [vmem:[#allocation7 + $0xbd8] sm:$0xff]  ;;  %v2347_v2 = vpack.c.bf16 %v584_v59, %v572_v58  ;;  %v347_v53 = vld [vmem:[#allocation7 + $0x3a8] sm:$0xff]  ;;  %v312_v55 = vld [vmem:[#allocation7 + $0x290] sm:$0xff]  ;;  %v2367_v56 = vpack.c.bf16 %v322_v50, %v310_v49 }
 0x166   :  { %2266 = vmatprep.subr.bf16.mxu0 %v2265_v1  ;;  %v606_v1 = vld [vmem:[#allocation7 + $0xbc0] sm:$0xff]  ;;  %v2349_v5 = vpack.c.bf16 %v609_v62, %v597_v61  ;;  %v349_v58 = vld [vmem:[#allocation7 + $0x3b8] sm:$0xff]  ;;  %v2369_v59 = vpack.c.bf16 %v347_v53, %v335_v52  ;;  %v467_v49 = vld [vmem:[#allocation7 + $0x768] sm:$0xff] }
 0x167   :  { %2328 = vmatpush1.bf16.msra.mxu1 %v2327_v4  ;;  %v251_v4 = vld [vmem:[#allocation7 + $0xa8] sm:$0xff]  ;;  %v2287_v8 = vpack.c.bf16 %v606_v1, %v594_v0  ;;  %v346_v61 = vld [vmem:[#allocation7 + $0x3a0] sm:$0xff]  ;;  %v444_v52 = vld [vmem:[#allocation7 + $0x6b0] sm:$0xff] }
 0x168   :  { %2330 = vmatprep.subr.bf16.mxu1 %v2329_v7  ;;  %v608_v7 = vld [vmem:[#allocation7 + $0xbd0] sm:$0xff]  ;;  %v2353_v12 = vpack.c.bf16 %v251_v4, %v239_v3  ;;  %v371_v0 = vld [vmem:[#allocation7 + $0x468] sm:$0xff] }
 0x169   :  { %2268 = vmatpush1.bf16.msra.mxu0 %v2267_v10  ;;  %v253_v10 = vld [vmem:[#allocation7 + $0xb8] sm:$0xff]  ;;  %v2351_v16 = vpack.c.bf16 %v608_v7, %v596_v6  ;;  %v348_v3 = vld [vmem:[#allocation7 + $0x3b0] sm:$0xff] }
 0x16a   :  { %2270 = vmatprep.subr.bf16.mxu0 %v2269_v14  ;;  %v250_v14 = vld [vmem:[#allocation7 + $0xa0] sm:$0xff]  ;;  %v2417_v19 = vpack.c.bf16 %v253_v10, %v241_v9  ;;  %v373_v6 = vld [vmem:[#allocation7 + $0x478] sm:$0xff] }
 0x16b   :  { %2332 = vmatpush1.bf16.msra.mxu1 %v2331_v18  ;;  %v275_v18 = vld [vmem:[#allocation7 + $0x168] sm:$0xff]  ;;  %v2355_v22 = vpack.c.bf16 %v250_v14, %v238_v13  ;;  %v370_v9 = vld [vmem:[#allocation7 + $0x460] sm:$0xff] }
 0x16c   :  { %2334 = vmatprep.subr.bf16.mxu1 %v2333_v21  ;;  %v252_v21 = vld [vmem:[#allocation7 + $0xb0] sm:$0xff]  ;;  %v2357_v25 = vpack.c.bf16 %v275_v18, %v263_v17  ;;  %v395_v13 = vld [vmem:[#allocation7 + $0x528] sm:$0xff] }
 0x16d   :  { %2272 = vmatpush1.bf16.msra.mxu0 %v2271_v24  ;;  %v277_v24 = vld [vmem:[#allocation7 + $0x178] sm:$0xff]  ;;  %v2419_v28 = vpack.c.bf16 %v252_v21, %v240_v20  ;;  %v372_v17 = vld [vmem:[#allocation7 + $0x470] sm:$0xff] }
 0x16e   :  { %2274 = vmatprep.subr.bf16.mxu0 %v2273_v27  ;;  %v274_v27 = vld [vmem:[#allocation7 + $0x160] sm:$0xff]  ;;  %v2421_v31 = vpack.c.bf16 %v277_v24, %v265_v23  ;;  %v397_v20 = vld [vmem:[#allocation7 + $0x538] sm:$0xff] }
 0x16f   :  { %2336 = vmatpush1.bf16.msra.mxu1 %v2335_v30  ;;  %v299_v30 = vld [vmem:[#allocation7 + $0x228] sm:$0xff]  ;;  %v2359_v34 = vpack.c.bf16 %v274_v27, %v262_v26  ;;  %v394_v23 = vld [vmem:[#allocation7 + $0x520] sm:$0xff] }
 0x170   :  { %2338 = vmatprep.subr.bf16.mxu1 %v2337_v33  ;;  %v276_v33 = vld [vmem:[#allocation7 + $0x170] sm:$0xff]  ;;  %v2361_v37 = vpack.c.bf16 %v299_v30, %v287_v29  ;;  %v419_v26 = vld [vmem:[#allocation7 + $0x5e8] sm:$0xff] }
 0x171   :  { %2276 = vmatpush1.bf16.msra.mxu0 %v2275_v36  ;;  %v301_v36 = vld [vmem:[#allocation7 + $0x238] sm:$0xff]  ;;  %v2423_v40 = vpack.c.bf16 %v276_v33, %v264_v32  ;;  %v396_v29 = vld [vmem:[#allocation7 + $0x530] sm:$0xff] }
 0x172   :  { %2278 = vmatprep.subr.bf16.mxu0 %v2277_v39  ;;  %v298_v39 = vld [vmem:[#allocation7 + $0x220] sm:$0xff]  ;;  %v2425_v43 = vpack.c.bf16 %v301_v36, %v289_v35  ;;  %v421_v32 = vld [vmem:[#allocation7 + $0x5f8] sm:$0xff] }
 0x173   :  { %2340 = vmatpush1.bf16.msra.mxu1 %v2339_v42  ;;  %v323_v42 = vld [vmem:[#allocation7 + $0x2e8] sm:$0xff]  ;;  %v2363_v46 = vpack.c.bf16 %v298_v39, %v286_v38  ;;  %v418_v35 = vld [vmem:[#allocation7 + $0x5e0] sm:$0xff] }
 0x174   :  { %2342 = vmatprep.subr.bf16.mxu1 %v2341_v45  ;;  %v300_v45 = vld [vmem:[#allocation7 + $0x230] sm:$0xff]  ;;  %v443_v38 = vld [vmem:[#allocation7 + $0x6a8] sm:$0xff] }
 0x175   :  { %2280 = vmatpush1.bf16.msra.mxu0 %v2279_v48  ;;  %v325_v48 = vld [vmem:[#allocation7 + $0x2f8] sm:$0xff] }
 0x176   :  { %2282 = vmatprep.subr.bf16.mxu0 %v2281_v51  ;;  %v2427_v51 = vpack.c.bf16 %v300_v45, %v288_v44  ;;  %v445_v44 = vld [vmem:[#allocation7 + $0x6b8] sm:$0xff] }
 0x177   :  { %2344 = vmatpush1.bf16.msra.mxu1 %v2343_v54  ;;  %v2429_v54 = vpack.c.bf16 %v325_v48, %v313_v47  ;;  %v442_v47 = vld [vmem:[#allocation7 + $0x6a0] sm:$0xff] }
 0x178   :  { %2346 = vmatprep.subr.bf16.mxu1 %v2345_v57  ;;  %v337_v57 = vld [vmem:[#allocation7 + $0x358] sm:$0xff] }
 0x179   :  { %2284 = vmatpush1.bf16.msra.mxu0 %v2283_v60  ;;  %v334_v60 = vld [vmem:[#allocation7 + $0x340] sm:$0xff]  ;;  %v2433_v1 = vpack.c.bf16 %v349_v58, %v337_v57 }
 0x17a   :  { %2286 = vmatprep.subr.bf16.mxu0 %v2285_v63  ;;  %v359_v63 = vld [vmem:[#allocation7 + $0x408] sm:$0xff]  ;;  %v2371_v4 = vpack.c.bf16 %v346_v61, %v334_v60  ;;  %v466_v57 = vld [vmem:[#allocation7 + $0x760] sm:$0xff] }
 0x17b   :  { %2348 = vmatpush1.bf16.msra.mxu1 %v2347_v2  ;;  %v336_v2 = vld [vmem:[#allocation7 + $0x350] sm:$0xff]  ;;  %v2373_v7 = vpack.c.bf16 %v371_v0, %v359_v63  ;;  %v491_v60 = vld [vmem:[#allocation7 + $0x828] sm:$0xff] }
 0x17c   :  { %2350 = vmatprep.subr.bf16.mxu1 %v2349_v5  ;;  %v361_v5 = vld [vmem:[#allocation7 + $0x418] sm:$0xff]  ;;  %v2435_v10 = vpack.c.bf16 %v348_v3, %v336_v2  ;;  %v468_v63 = vld [vmem:[#allocation7 + $0x770] sm:$0xff] }
 0x17d   :  { %2288 = vmatpush1.bf16.msra.mxu0 %v2287_v8  ;;  %v358_v8 = vld [vmem:[#allocation7 + $0x400] sm:$0xff]  ;;  %v2437_v14 = vpack.c.bf16 %v373_v6, %v361_v5  ;;  %v493_v2 = vld [vmem:[#allocation7 + $0x838] sm:$0xff] }
 0x17e   :  { %2354 = vmatprep.subr.bf16.mxu0 %v2353_v12  ;;  %v383_v12 = vld [vmem:[#allocation7 + $0x4c8] sm:$0xff]  ;;  %v2375_v18 = vpack.c.bf16 %v370_v9, %v358_v8  ;;  %v490_v5 = vld [vmem:[#allocation7 + $0x820] sm:$0xff] }
 0x17f   :  { %2352 = vmatpush1.bf16.msra.mxu1 %v2351_v16  ;;  %v360_v16 = vld [vmem:[#allocation7 + $0x410] sm:$0xff]  ;;  %v2377_v21 = vpack.c.bf16 %v395_v13, %v383_v12  ;;  %v515_v8 = vld [vmem:[#allocation7 + $0x8e8] sm:$0xff] }
 0x180   :  { %821 = vmatmul.mubr.f32.vlgmr.msra.gmra.mrb[2].mxu0 %v3479_v15  ;;  %2418 = vmatprep.subr.bf16.mxu1 %v2417_v19  ;;  %v385_v19 = vld [vmem:[#allocation7 + $0x4d8] sm:$0xff]  ;;  %v2439_v24 = vpack.c.bf16 %v372_v17, %v360_v16  ;;  %v492_v12 = vld [vmem:[#allocation7 + $0x830] sm:$0xff] }
 0x181   :  { %2356 = vmatpush1.bf16.msra.mxu0 %v2355_v22  ;;  %962 = vmatprep.mubr.f32.mxu0 %v3475_v11  ;;  %v382_v22 = vld [vmem:[#allocation7 + $0x4c0] sm:$0xff]  ;;  %v2441_v27 = vpack.c.bf16 %v397_v20, %v385_v19  ;;  %v517_v16 = vld [vmem:[#allocation7 + $0x8f8] sm:$0xff] }
 0x182   :  { %892 = vmatmul.mubr.f32.vlgmr.msra.gmra.mrb[2].mxu1 %v3479_v15  ;;  %2358 = vmatprep.subr.bf16.mxu0 %v2357_v25  ;;  %v2365_v15 = vpack.c.bf16 %v323_v42, %v311_v41  ;;  %v407_v25 = vld [vmem:[#allocation7 + $0x588] sm:$0xff]  ;;  %v2379_v30 = vpack.c.bf16 %v394_v23, %v382_v22  ;;  %v420_v41 = vld [vmem:[#allocation7 + $0x5f0] sm:$0xff]  ;;  %v514_v19 = vld [vmem:[#allocation7 + $0x8e0] sm:$0xff] }
 0x183   :  { %2420 = vmatpush1.bf16.msra.mxu1 %v2419_v28  ;;  %1033 = vmatprep.mubr.f32.mxu1 %v3475_v11  ;;  %v324_v11 = vld [vmem:[#allocation7 + $0x2f0] sm:$0xff]  ;;  %v2381_v33 = vpack.c.bf16 %v419_v26, %v407_v25  ;;  %v539_v22 = vld [vmem:[#allocation7 + $0x9a8] sm:$0xff] }
 0x184   :  { %2422 = vmatprep.subr.bf16.mxu1 %v2421_v31  ;;  %v2431_v62 = vpack.c.bf16 %v324_v11, %v312_v55  ;;  %v384_v28 = vld [vmem:[#allocation7 + $0x4d0] sm:$0xff]  ;;  %v409_v31 = vld [vmem:[#allocation7 + $0x598] sm:$0xff] }
 0x185   :  { %2360 = vmatpush1.bf16.msra.mxu0 %v2359_v34  ;;  %v406_v34 = vld [vmem:[#allocation7 + $0x580] sm:$0xff]  ;;  %v2443_v36 = vpack.c.bf16 %v396_v29, %v384_v28  ;;  %v2445_v39 = vpack.c.bf16 %v421_v32, %v409_v31  ;;  %v469_v55 = vld [vmem:[#allocation7 + $0x778] sm:$0xff]  ;;  %v516_v25 = vld [vmem:[#allocation7 + $0x8f0] sm:$0xff] }
 0x186   :  { %2362 = vmatprep.subr.bf16.mxu0 %v2361_v37  ;;  %v431_v37 = vld [vmem:[#allocation7 + $0x648] sm:$0xff]  ;;  %v2383_v42 = vpack.c.bf16 %v418_v35, %v406_v34  ;;  %v541_v28 = vld [vmem:[#allocation7 + $0x9b8] sm:$0xff]  ;;  %v538_v31 = vld [vmem:[#allocation7 + $0x9a0] sm:$0xff] }
 0x187   :  { %2424 = vmatpush1.bf16.msra.mxu1 %v2423_v40  ;;  %v408_v40 = vld [vmem:[#allocation7 + $0x590] sm:$0xff]  ;;  %v2385_v45 = vpack.c.bf16 %v443_v38, %v431_v37  ;;  %v563_v34 = vld [vmem:[#allocation7 + $0xa68] sm:$0xff] }
 0x188   :  { %2426 = vmatprep.subr.bf16.mxu1 %v2425_v43  ;;  %v433_v43 = vld [vmem:[#allocation7 + $0x658] sm:$0xff]  ;;  %v2447_v48 = vpack.c.bf16 %v420_v41, %v408_v40  ;;  %v540_v37 = vld [vmem:[#allocation7 + $0x9b0] sm:$0xff] }
 0x189   :  { %2364 = vmatpush1.bf16.msra.mxu0 %v2363_v46  ;;  %v430_v46 = vld [vmem:[#allocation7 + $0x640] sm:$0xff]  ;;  %v2449_v50 = vpack.c.bf16 %v445_v44, %v433_v43  ;;  %v565_v40 = vld [vmem:[#allocation7 + $0xa78] sm:$0xff] }
 0x18a   :  { %2366 = vmatprep.subr.bf16.mxu0 %v2365_v15  ;;  %v455_v15 = vld [vmem:[#allocation7 + $0x708] sm:$0xff]  ;;  %v2387_v53 = vpack.c.bf16 %v442_v47, %v430_v46  ;;  %v562_v43 = vld [vmem:[#allocation7 + $0xa60] sm:$0xff] }
 0x18b   :  { %2428 = vmatpush1.bf16.msra.mxu1 %v2427_v51  ;;  %v432_v51 = vld [vmem:[#allocation7 + $0x650] sm:$0xff]  ;;  %v2389_v11 = vpack.c.bf16 %v467_v49, %v455_v15  ;;  %v587_v46 = vld [vmem:[#allocation7 + $0xb28] sm:$0xff] }
 0x18c   :  { %2430 = vmatprep.subr.bf16.mxu1 %v2429_v54  ;;  %v457_v54 = vld [vmem:[#allocation7 + $0x718] sm:$0xff]  ;;  %v2451_v58 = vpack.c.bf16 %v444_v52, %v432_v51  ;;  %v564_v15 = vld [vmem:[#allocation7 + $0xa70] sm:$0xff] }
 0x18d   :  { %2368 = vmatpush1.bf16.msra.mxu0 %v2367_v56  ;;  %v454_v56 = vld [vmem:[#allocation7 + $0x700] sm:$0xff]  ;;  %v2453_v61 = vpack.c.bf16 %v469_v55, %v457_v54  ;;  %v589_v51 = vld [vmem:[#allocation7 + $0xb38] sm:$0xff] }
 0x18e   :  { %2370 = vmatprep.subr.bf16.mxu0 %v2369_v59  ;;  %v479_v59 = vld [vmem:[#allocation7 + $0x7c8] sm:$0xff]  ;;  %v2391_v0 = vpack.c.bf16 %v466_v57, %v454_v56  ;;  %v586_v54 = vld [vmem:[#allocation7 + $0xb20] sm:$0xff] }
 0x18f   :  { %2432 = vmatpush1.bf16.msra.mxu1 %v2431_v62  ;;  %v456_v62 = vld [vmem:[#allocation7 + $0x710] sm:$0xff]  ;;  %v2393_v3 = vpack.c.bf16 %v491_v60, %v479_v59  ;;  %v611_v56 = vld [vmem:[#allocation7 + $0xbe8] sm:$0xff] }
 0x190   :  { %2434 = vmatprep.subr.bf16.mxu1 %v2433_v1  ;;  %v481_v1 = vld [vmem:[#allocation7 + $0x7d8] sm:$0xff]  ;;  %v2455_v6 = vpack.c.bf16 %v468_v63, %v456_v62  ;;  %v588_v59 = vld [vmem:[#allocation7 + $0xb30] sm:$0xff] }
 0x191   :  { %2372 = vmatpush1.bf16.msra.mxu0 %v2371_v4  ;;  %v478_v4 = vld [vmem:[#allocation7 + $0x7c0] sm:$0xff]  ;;  %v2457_v9 = vpack.c.bf16 %v493_v2, %v481_v1  ;;  %v613_v62 = vld [vmem:[#allocation7 + $0xbf8] sm:$0xff] }
 0x192   :  { %2374 = vmatprep.subr.bf16.mxu0 %v2373_v7  ;;  %v503_v7 = vld [vmem:[#allocation7 + $0x888] sm:$0xff]  ;;  %v2395_v13 = vpack.c.bf16 %v490_v5, %v478_v4  ;;  %v610_v1 = vld [vmem:[#allocation7 + $0xbe0] sm:$0xff] }
 0x193   :  { %2436 = vmatpush1.bf16.msra.mxu1 %v2435_v10  ;;  %v480_v10 = vld [vmem:[#allocation7 + $0x7d0] sm:$0xff]  ;;  %v2397_v17 = vpack.c.bf16 %v515_v8, %v503_v7  ;;  %v1102_v4 = vld [vmem:[#allocation10 + $0x18] sm:$0xff] }
 0x194   :  { %2438 = vmatprep.subr.bf16.mxu1 %v2437_v14  ;;  %v505_v14 = vld [vmem:[#allocation7 + $0x898] sm:$0xff]  ;;  %v2459_v20 = vpack.c.bf16 %v492_v12, %v480_v10  ;;  %v612_v7 = vld [vmem:[#allocation7 + $0xbf0] sm:$0xff]  ;;  %v1099_v10 = vld [vmem:[#allocation10] sm:$0xff] }
 0x195   :  { %2376 = vmatpush1.bf16.msra.mxu0 %v2375_v18  ;;  %v502_v18 = vld [vmem:[#allocation7 + $0x880] sm:$0xff]  ;;  %v2461_v23 = vpack.c.bf16 %v517_v16, %v505_v14  ;;  %v1101_v12 = vld [vmem:[#allocation10 + $0x10] sm:$0xff]  ;;  %v1104_v14 = vld [vmem:[#allocation10 + $0x28] sm:$0xff] }
 0x196   :  { %2378 = vmatprep.subr.bf16.mxu0 %v2377_v21  ;;  %v527_v21 = vld [vmem:[#allocation7 + $0x948] sm:$0xff]  ;;  %v2399_v26 = vpack.c.bf16 %v514_v19, %v502_v18  ;;  %v1106_v16 = vld [vmem:[#allocation10 + $0x38] sm:$0xff] }
 0x197   :  { %2440 = vmatpush1.bf16.msra.mxu1 %v2439_v24  ;;  %v504_v24 = vld [vmem:[#allocation7 + $0x890] sm:$0xff]  ;;  %v2401_v29 = vpack.c.bf16 %v539_v22, %v527_v21  ;;  %v2485_v18 = vpack.c.bf16 %v1106_v16, %v1104_v14  ;;  %v1103_v19 = vld [vmem:[#allocation10 + $0x20] sm:$0xff]  ;;  %v1110_v22 = vld [vmem:[#allocation10 + $0x58] sm:$0xff] }
 0x198   :  { %2442 = vmatprep.subr.bf16.mxu1 %v2441_v27  ;;  %v529_v27 = vld [vmem:[#allocation7 + $0x958] sm:$0xff]  ;;  %v2463_v32 = vpack.c.bf16 %v516_v25, %v504_v24  ;;  %v1108_v21 = vld [vmem:[#allocation10 + $0x48] sm:$0xff]  ;;  %v1143_v16 = vld [vmem:[#allocation10 + $0x160] sm:$0xff] }
 0x199   :  { %2380 = vmatpush1.bf16.msra.mxu0 %v2379_v30  ;;  %v526_v30 = vld [vmem:[#allocation7 + $0x940] sm:$0xff]  ;;  %v2465_v35 = vpack.c.bf16 %v541_v28, %v529_v27  ;;  %v2489_v25 = vpack.c.bf16 %v1110_v22, %v1108_v21  ;;  %v1109_v27 = vld [vmem:[#allocation10 + $0x50] sm:$0xff]  ;;  %v1112_v28 = vld [vmem:[#allocation10 + $0x68] sm:$0xff] }
 0x19a   :  { %2382 = vmatprep.subr.bf16.mxu0 %v2381_v33  ;;  %v551_v33 = vld [vmem:[#allocation7 + $0xa08] sm:$0xff]  ;;  %v2403_v38 = vpack.c.bf16 %v538_v31, %v526_v30 }
 0x19b   :  { %2444 = vmatpush1.bf16.msra.mxu1 %v2443_v36  ;;  %v528_v36 = vld [vmem:[#allocation7 + $0x950] sm:$0xff]  ;;  %v2405_v41 = vpack.c.bf16 %v563_v34, %v551_v33  ;;  %v1147_v22 = vld [vmem:[#allocation10 + $0x180] sm:$0xff] }
 0x19c   :  { %2446 = vmatprep.subr.bf16.mxu1 %v2445_v39  ;;  %v553_v39 = vld [vmem:[#allocation7 + $0xa18] sm:$0xff]  ;;  %v2467_v44 = vpack.c.bf16 %v540_v37, %v528_v36  ;;  %v1116_v34 = vld [vmem:[#allocation10 + $0x88] sm:$0xff] }
 0x19d   :  { %2384 = vmatpush1.bf16.msra.mxu0 %v2383_v42  ;;  %v550_v42 = vld [vmem:[#allocation7 + $0xa00] sm:$0xff]  ;;  %v2469_v47 = vpack.c.bf16 %v565_v40, %v553_v39  ;;  %v1113_v33 = vld [vmem:[#allocation10 + $0x70] sm:$0xff]  ;;  %v1120_v40 = vld [vmem:[#allocation10 + $0xa8] sm:$0xff] }
 0x19e   :  { %2386 = vmatprep.subr.bf16.mxu0 %v2385_v45  ;;  %v575_v45 = vld [vmem:[#allocation7 + $0xac8] sm:$0xff]  ;;  %v2407_v49 = vpack.c.bf16 %v562_v43, %v550_v42  ;;  %v1117_v39 = vld [vmem:[#allocation10 + $0x90] sm:$0xff] }
 0x19f   :  { %2448 = vmatpush1.bf16.msra.mxu1 %v2447_v48  ;;  %v552_v48 = vld [vmem:[#allocation7 + $0xa10] sm:$0xff]  ;;  %v2409_v52 = vpack.c.bf16 %v587_v46, %v575_v45 }
 0x1a0   :  { %2450 = vmatprep.subr.bf16.mxu1 %v2449_v50  ;;  %v577_v50 = vld [vmem:[#allocation7 + $0xad8] sm:$0xff]  ;;  %v2471_v55 = vpack.c.bf16 %v564_v15, %v552_v48  ;;  %v1124_v46 = vld [vmem:[#allocation10 + $0xc8] sm:$0xff] }
 0x1a1   :  { %2388 = vmatpush1.bf16.msra.mxu0 %v2387_v53  ;;  %v574_v53 = vld [vmem:[#allocation7 + $0xac0] sm:$0xff]  ;;  %v2473_v57 = vpack.c.bf16 %v589_v51, %v577_v50  ;;  %v1121_v45 = vld [vmem:[#allocation10 + $0xb0] sm:$0xff]  ;;  %v1128_v51 = vld [vmem:[#allocation10 + $0xe8] sm:$0xff] }
 0x1a2   :  { %2390 = vmatprep.subr.bf16.mxu0 %v2389_v11  ;;  %v599_v11 = vld [vmem:[#allocation7 + $0xb88] sm:$0xff]  ;;  %v2411_v60 = vpack.c.bf16 %v586_v54, %v574_v53  ;;  %v1125_v50 = vld [vmem:[#allocation10 + $0xd0] sm:$0xff] }
 0x1a3   :  { %2452 = vmatpush1.bf16.msra.mxu1 %v2451_v58  ;;  %v576_v58 = vld [vmem:[#allocation7 + $0xad0] sm:$0xff]  ;;  %v2413_v63 = vpack.c.bf16 %v611_v56, %v599_v11 }
 0x1a4   :  { %2454 = vmatprep.subr.bf16.mxu1 %v2453_v61  ;;  %v601_v61 = vld [vmem:[#allocation7 + $0xb98] sm:$0xff]  ;;  %v2475_v2 = vpack.c.bf16 %v588_v59, %v576_v58  ;;  %v1132_v56 = vld [vmem:[#allocation10 + $0x108] sm:$0xff] }
 0x1a5   :  { %2392 = vmatpush1.bf16.msra.mxu0 %v2391_v0  ;;  %v598_v0 = vld [vmem:[#allocation7 + $0xb80] sm:$0xff]  ;;  %v2477_v5 = vpack.c.bf16 %v613_v62, %v601_v61  ;;  %v1129_v11 = vld [vmem:[#allocation10 + $0xf0] sm:$0xff]  ;;  %v1136_v62 = vld [vmem:[#allocation10 + $0x128] sm:$0xff] }
 0x1a6   :  { %2394 = vmatprep.subr.bf16.mxu0 %v2393_v3  ;;  %v1100_v3 = vld [vmem:[#allocation10 + $0x8] sm:$0xff]  ;;  %v2415_v8 = vpack.c.bf16 %v610_v1, %v598_v0  ;;  %v1133_v61 = vld [vmem:[#allocation10 + $0x110] sm:$0xff] }
 0x1a7   :  { %2456 = vmatpush1.bf16.msra.mxu1 %v2455_v6  ;;  %v600_v6 = vld [vmem:[#allocation7 + $0xb90] sm:$0xff] }
 0x1a8   :  { %2458 = vmatprep.subr.bf16.mxu1 %v2457_v9  ;;  %v2481_v9 = vpack.c.bf16 %v1102_v4, %v1100_v3  ;;  %v1137_v3 = vld [vmem:[#allocation10 + $0x130] sm:$0xff]  ;;  %v1140_v4 = vld [vmem:[#allocation10 + $0x148] sm:$0xff] }
 0x1a9   :  { %2396 = vmatpush1.bf16.msra.mxu0 %v2395_v13  ;;  %v2479_v13 = vpack.c.bf16 %v612_v7, %v600_v6 }
 0x1aa   :  { %2398 = vmatprep.subr.bf16.mxu0 %v2397_v17  ;;  %v2483_v17 = vpack.c.bf16 %v1101_v12, %v1099_v10  ;;  %v1144_v10 = vld [vmem:[#allocation10 + $0x168] sm:$0xff]  ;;  %v1146_v12 = vld [vmem:[#allocation10 + $0x178] sm:$0xff] }
 0x1ab   :  { %2460 = vmatpush1.bf16.msra.mxu1 %v2459_v20  ;;  %v1105_v20 = vld [vmem:[#allocation10 + $0x30] sm:$0xff]  ;;  %v2525_v14 = vpack.c.bf16 %v1146_v12, %v1144_v10  ;;  %v1296_v12 = vld [vmem:[#allocation13 + $0x40] sm:$0xff] }
 0x1ac   :  { %2462 = vmatprep.subr.bf16.mxu1 %v2461_v23  ;;  %v2826_v23 = vld [vmem:[#allocation4] sm:$0xff]  ;;  %v2487_v24 = vpack.c.bf16 %v1105_v20, %v1103_v19  ;;  %v1150_v19 = vld [vmem:[#allocation10 + $0x198] sm:$0xff] }
 0x1ad   :  { %2400 = vmatpush1.bf16.msra.mxu0 %v2399_v26  ;;  %v1107_v26 = vld [vmem:[#allocation10 + $0x40] sm:$0xff] }
 0x1ae   :  { %2402 = vmatprep.subr.bf16.mxu0 %v2401_v29  ;;  %v1114_v29 = vld [vmem:[#allocation10 + $0x78] sm:$0xff]  ;;  %v2491_v30 = vpack.c.bf16 %v1109_v27, %v1107_v26 }
 0x1af   :  { %2464 = vmatpush1.bf16.msra.mxu1 %v2463_v32  ;;  %v2493_v31 = vpack.c.bf16 %v1114_v29, %v1112_v28  ;;  %v1111_v32 = vld [vmem:[#allocation10 + $0x60] sm:$0xff]  ;;  %v1153_v29 = vld [vmem:[#allocation10 + $0x1b0] sm:$0xff] }
 0x1b0   :  { %2466 = vmatprep.subr.bf16.mxu1 %v2465_v35  ;;  %v1118_v35 = vld [vmem:[#allocation10 + $0x98] sm:$0xff]  ;;  %v2495_v36 = vpack.c.bf16 %v1113_v33, %v1111_v32  ;;  %v1151_v28 = vld [vmem:[#allocation10 + $0x1a0] sm:$0xff] }
 0x1b1   :  { %2404 = vmatpush1.bf16.msra.mxu0 %v2403_v38  ;;  %v2497_v37 = vpack.c.bf16 %v1118_v35, %v1116_v34  ;;  %v1115_v38 = vld [vmem:[#allocation10 + $0x80] sm:$0xff]  ;;  %v2535_v32 = vpack.c.bf16 %v1153_v29, %v1151_v28  ;;  %v1157_v35 = vld [vmem:[#allocation10 + $0x1d0] sm:$0xff] }
 0x1b2   :  { %2406 = vmatprep.subr.bf16.mxu0 %v2405_v41  ;;  %v1122_v41 = vld [vmem:[#allocation10 + $0xb8] sm:$0xff]  ;;  %v2499_v42 = vpack.c.bf16 %v1117_v39, %v1115_v38  ;;  %v1155_v34 = vld [vmem:[#allocation10 + $0x1c0] sm:$0xff] }
 0x1b3   :  { %2468 = vmatpush1.bf16.msra.mxu1 %v2467_v44  ;;  %v2501_v43 = vpack.c.bf16 %v1122_v41, %v1120_v40  ;;  %v1119_v44 = vld [vmem:[#allocation10 + $0xa0] sm:$0xff]  ;;  %v2539_v38 = vpack.c.bf16 %v1157_v35, %v1155_v34  ;;  %v1161_v41 = vld [vmem:[#allocation10 + $0x1f0] sm:$0xff] }
 0x1b4   :  { %2470 = vmatprep.subr.bf16.mxu1 %v2469_v47  ;;  %v1126_v47 = vld [vmem:[#allocation10 + $0xd8] sm:$0xff]  ;;  %v2503_v48 = vpack.c.bf16 %v1121_v45, %v1119_v44  ;;  %v1159_v40 = vld [vmem:[#allocation10 + $0x1e0] sm:$0xff] }
 0x1b5   :  { %2408 = vmatpush1.bf16.msra.mxu0 %v2407_v49  ;;  %v2505_v15 = vpack.c.bf16 %v1126_v47, %v1124_v46  ;;  %v1123_v49 = vld [vmem:[#allocation10 + $0xc0] sm:$0xff]  ;;  %v229_v46 = vld [vmem:[#allocation9] sm:$0x3] }
 0x1b6   :  { %2410 = vmatprep.subr.bf16.mxu0 %v2409_v52  ;;  %v1130_v52 = vld [vmem:[#allocation10 + $0xf8] sm:$0xff]  ;;  %v2507_v53 = vpack.c.bf16 %v1125_v50, %v1123_v49 }
 0x1b7   :  { %2472 = vmatpush1.bf16.msra.mxu1 %v2471_v55  ;;  %v2509_v54 = vpack.c.bf16 %v1130_v52, %v1128_v51  ;;  %v1127_v55 = vld [vmem:[#allocation10 + $0xe0] sm:$0xff] }
 0x1b8   :  { %2474 = vmatprep.subr.bf16.mxu1 %v2473_v57  ;;  %v1134_v57 = vld [vmem:[#allocation10 + $0x118] sm:$0xff]  ;;  %v2511_v58 = vpack.c.bf16 %v1129_v11, %v1127_v55 }
 0x1b9   :  { %2412 = vmatpush1.bf16.msra.mxu0 %v2411_v60  ;;  %v2513_v59 = vpack.c.bf16 %v1134_v57, %v1132_v56  ;;  %v1131_v60 = vld [vmem:[#allocation10 + $0x100] sm:$0xff] }
 0x1ba   :  { %2414 = vmatprep.subr.bf16.mxu0 %v2413_v63  ;;  %v1138_v63 = vld [vmem:[#allocation10 + $0x138] sm:$0xff]  ;;  %v2515_v0 = vpack.c.bf16 %v1133_v61, %v1131_v60  ;;  %v1289_v60 = vld [vmem:[#allocation13 + $0x8] sm:$0xff] }
 0x1bb   :  { %2476 = vmatpush1.bf16.msra.mxu1 %v2475_v2  ;;  %v2517_v1 = vpack.c.bf16 %v1138_v63, %v1136_v62  ;;  %v1135_v2 = vld [vmem:[#allocation10 + $0x120] sm:$0xff] }
 0x1bc   :  { %2478 = vmatprep.subr.bf16.mxu1 %v2477_v5  ;;  %v1142_v5 = vld [vmem:[#allocation10 + $0x158] sm:$0xff]  ;;  %v2519_v6 = vpack.c.bf16 %v1137_v3, %v1135_v2  ;;  %v1288_v62 = vld [vmem:[#allocation13] sm:$0xff] }
 0x1bd   :  { %2416 = vmatpush1.bf16.msra.mxu0 %v2415_v8  ;;  %v2521_v7 = vpack.c.bf16 %v1142_v5, %v1140_v4  ;;  %v1139_v8 = vld [vmem:[#allocation10 + $0x140] sm:$0xff] }
 0x1be   :  { %2482 = vmatprep.subr.bf16.mxu0 %v2481_v9  ;;  %v1141_v9 = vld [vmem:[#allocation10 + $0x150] sm:$0xff]  ;;  %v1291_v61 = vld [vmem:[#allocation13 + $0x18] sm:$0xff]  ;;  %v1292_v5 = vld [vmem:[#allocation13 + $0x20] sm:$0xff] }
 0x1bf   :  { %2480 = vmatpush1.bf16.msra.mxu1 %v2479_v13  ;;  %v2523_v13 = vpack.c.bf16 %v1141_v9, %v1139_v8  ;;  %v2545_v63 = vpack.c.bf16 %v1291_v61, %v1289_v60  ;;  %v1295_v2 = vld [vmem:[#allocation13 + $0x38] sm:$0xff] }
 0x1c0   :  { %963 = vmatmul.mubr.f32.vlgmr.msra.gmra.mrb[4].mxu0 %v2826_v23  ;;  %v1299_v8 = vld [vmem:[#allocation13 + $0x58] sm:$0xff] }
 0x1c1   :  { %2484 = vmatpush1.bf16.msra.mxu0 %v2483_v17  ;;  %v1145_v17 = vld [vmem:[#allocation10 + $0x170] sm:$0xff]  ;;  %2546 = vmatprep.subr.bf16.mxu1 %v2545_v63  ;;  %v1311_v28 = vld [vmem:[#allocation13 + $0xb8] sm:$0xff]  ;;  %v1328_v63 = vld [vmem:[#allocation13 + $0x140] sm:$0xff] }
 0x1c2   :  { %1034 = vmatmul.mubr.f32.vlgmr.msra.gmra.mrb[4].mxu1 %v2826_v23  ;;  %2486 = vmatprep.subr.bf16.mxu0 %v2485_v18  ;;  %v1148_v18 = vld [vmem:[#allocation10 + $0x188] sm:$0xff]  ;;  %v2527_v20 = vpack.c.bf16 %v1145_v17, %v1143_v16  ;;  %v1149_v23 = vld [vmem:[#allocation10 + $0x190] sm:$0xff]  ;;  %v1303_v16 = vld [vmem:[#allocation13 + $0x78] sm:$0xff] }
 0x1c3   :  { %v2529_v21 = vpack.c.bf16 %v1150_v19, %v1148_v18  ;;  %v2531_v26 = vpack.c.bf16 %v1149_v23, %v1147_v22  ;;  %v1300_v19 = vld [vmem:[#allocation13 + $0x60] sm:$0xff]  ;;  %v1307_v22 = vld [vmem:[#allocation13 + $0x98] sm:$0xff] }
 0x1c4   :  { %v1315_v34 = vld [vmem:[#allocation13 + $0xd8] sm:$0xff] }
 0x1c5   :  { %2488 = vmatpush1.bf16.msra.mxu0 %v2487_v24  ;;  %v1152_v24 = vld [vmem:[#allocation10 + $0x1a8] sm:$0xff]  ;;  %v1331_v60 = vld [vmem:[#allocation13 + $0x158] sm:$0xff] }
 0x1c6   :  { %2490 = vmatprep.subr.bf16.mxu0 %v2489_v25  ;;  %v1154_v25 = vld [vmem:[#allocation10 + $0x1b8] sm:$0xff] }
 0x1c7   :  { %v2533_v27 = vpack.c.bf16 %v1154_v25, %v1152_v24  ;;  %v1304_v25 = vld [vmem:[#allocation13 + $0x80] sm:$0xff] }
 0x1c9   :  { %2492 = vmatpush1.bf16.msra.mxu0 %v2491_v30  ;;  %v1156_v30 = vld [vmem:[#allocation10 + $0x1c8] sm:$0xff] }
 0x1ca   :  { %2494 = vmatprep.subr.bf16.mxu0 %v2493_v31  ;;  %v1158_v31 = vld [vmem:[#allocation10 + $0x1d8] sm:$0xff] }
 0x1cb   :  { %v2537_v33 = vpack.c.bf16 %v1158_v31, %v1156_v30  ;;  %v1308_v31 = vld [vmem:[#allocation13 + $0xa0] sm:$0xff] }
 0x1cd   :  { %2496 = vmatpush1.bf16.msra.mxu0 %v2495_v36  ;;  %v1160_v36 = vld [vmem:[#allocation10 + $0x1e8] sm:$0xff] }
 0x1ce   :  { %2498 = vmatprep.subr.bf16.mxu0 %v2497_v37  ;;  %v1162_v37 = vld [vmem:[#allocation10 + $0x1f8] sm:$0xff] }
 0x1cf   :  { %v2541_v39 = vpack.c.bf16 %v1162_v37, %v1160_v36  ;;  %v1312_v37 = vld [vmem:[#allocation13 + $0xc0] sm:$0xff] }
 0x1d1   :  { %2500 = vmatpush1.bf16.msra.mxu0 %v2499_v42  ;;  %v2543_v42 = vpack.c.bf16 %v1161_v41, %v1159_v40  ;;  %v1319_v40 = vld [vmem:[#allocation13 + $0xf8] sm:$0xff] }
 0x1d2   :  { %2502 = vmatprep.subr.bf16.mxu0 %v2501_v43  ;;  %v1041_v43 = vlaneseq }
 0x1d4   :  { %v1042_v44 = vshrl.u32 %v1041_v43, 7  ;;  %v1316_v43 = vld [vmem:[#allocation13 + $0xe0] sm:$0xff] }
 0x1d5   :  { %2504 = vmatpush1.bf16.msra.mxu0 %v2503_v48 }
 0x1d6   :  { %2506 = vmatprep.subr.bf16.mxu0 %v2505_v15  ;;  %v3489_v45 = vsub.s32 0, %v1042_v44  ;;  %v3491_v47 = vsub.s32 1, %v1042_v44  ;;  %v1318_v44 = vld [vmem:[#allocation13 + $0xf0] sm:$0xff] }
 0x1d8   :  { %v3494_v48 = vrot.slane %v229_v46, %v3489_v45  ;;  %v3497_v15 = vrot.slane %v229_v46, %v3491_v47  ;;  %v1321_v46 = vld [vmem:[#allocation13 + $0x108] sm:$0xff] }
 0x1d9   :  { %2508 = vmatpush1.bf16.msra.mxu0 %v2507_v53 }
 0x1da   :  { %2510 = vmatprep.subr.bf16.mxu0 %v2509_v54 }
 0x1dd   :  { %2512 = vmatpush1.bf16.msra.mxu0 %v2511_v58 }
 0x1de   :  { %2514 = vmatprep.subr.bf16.mxu0 %v2513_v59 }
 0x1e1   :  { %2516 = vmatpush1.bf16.msra.mxu0 %v2515_v0  ;;  %v1290_v0 = vld [vmem:[#allocation13 + $0x10] sm:$0xff] }
 0x1e2   :  { %2518 = vmatprep.subr.bf16.mxu0 %v2517_v1  ;;  %v1293_v1 = vld [vmem:[#allocation13 + $0x28] sm:$0xff]  ;;  %v2547_v3 = vpack.c.bf16 %v1290_v0, %v1288_v62  ;;  %v1330_v0 = vld [vmem:[#allocation13 + $0x150] sm:$0xff] }
 0x1e3   :  { %v2549_v4 = vpack.c.bf16 %v1295_v2, %v1293_v1  ;;  %v1333_v1 = vld [vmem:[#allocation13 + $0x168] sm:$0xff]  ;;  %v1335_v2 = vld [vmem:[#allocation13 + $0x178] sm:$0xff] }
 0x1e4   :  { %2548 = vmatpush1.bf16.msra.mxu1 %v2547_v3  ;;  %v2587_v3 = vpack.c.bf16 %v1330_v0, %v1328_v63 }
 0x1e5   :  { %2520 = vmatpush1.bf16.msra.mxu0 %v2519_v6  ;;  %v1294_v6 = vld [vmem:[#allocation13 + $0x30] sm:$0xff]  ;;  %2550 = vmatprep.subr.bf16.mxu1 %v2549_v4  ;;  %v2589_v4 = vpack.c.bf16 %v1335_v2, %v1333_v1 }
 0x1e6   :  { %2522 = vmatprep.subr.bf16.mxu0 %v2521_v7  ;;  %v1297_v7 = vld [vmem:[#allocation13 + $0x48] sm:$0xff]  ;;  %v2551_v9 = vpack.c.bf16 %v1294_v6, %v1292_v5  ;;  %v1332_v5 = vld [vmem:[#allocation13 + $0x160] sm:$0xff]  ;;  %v1334_v6 = vld [vmem:[#allocation13 + $0x170] sm:$0xff] }
 0x1e7   :  { %v2553_v10 = vpack.c.bf16 %v1299_v8, %v1297_v7  ;;  %v1337_v7 = vld [vmem:[#allocation13 + $0x188] sm:$0xff]  ;;  %v1339_v8 = vld [vmem:[#allocation13 + $0x198] sm:$0xff] }
 0x1e8   :  { %2552 = vmatpush1.bf16.msra.mxu1 %v2551_v9  ;;  %v2591_v9 = vpack.c.bf16 %v1334_v6, %v1332_v5 }
 0x1e9   :  { %2524 = vmatpush1.bf16.msra.mxu0 %v2523_v13  ;;  %v1298_v13 = vld [vmem:[#allocation13 + $0x50] sm:$0xff]  ;;  %2554 = vmatprep.subr.bf16.mxu1 %v2553_v10  ;;  %v2593_v10 = vpack.c.bf16 %v1339_v8, %v1337_v7 }
 0x1ea   :  { %2526 = vmatprep.subr.bf16.mxu0 %v2525_v14  ;;  %v1301_v14 = vld [vmem:[#allocation13 + $0x68] sm:$0xff]  ;;  %v2555_v17 = vpack.c.bf16 %v1298_v13, %v1296_v12  ;;  %v1336_v12 = vld [vmem:[#allocation13 + $0x180] sm:$0xff]  ;;  %v1338_v13 = vld [vmem:[#allocation13 + $0x190] sm:$0xff] }
 0x1eb   :  { %v2557_v18 = vpack.c.bf16 %v1303_v16, %v1301_v14  ;;  %v1341_v14 = vld [vmem:[#allocation13 + $0x1a8] sm:$0xff]  ;;  %v1343_v16 = vld [vmem:[#allocation13 + $0x1b8] sm:$0xff] }
 0x1ec   :  { %2556 = vmatpush1.bf16.msra.mxu1 %v2555_v17  ;;  %v2595_v17 = vpack.c.bf16 %v1338_v13, %v1336_v12  ;;  %v1477_v12 = vld [vmem:[#allocation16] sm:$0xff] }
 0x1ed   :  { %2528 = vmatpush1.bf16.msra.mxu0 %v2527_v20  ;;  %v1302_v20 = vld [vmem:[#allocation13 + $0x70] sm:$0xff]  ;;  %2558 = vmatprep.subr.bf16.mxu1 %v2557_v18  ;;  %v2597_v18 = vpack.c.bf16 %v1343_v16, %v1341_v14 }
 0x1ee   :  { %2530 = vmatprep.subr.bf16.mxu0 %v2529_v21  ;;  %v1305_v21 = vld [vmem:[#allocation13 + $0x88] sm:$0xff]  ;;  %v2559_v23 = vpack.c.bf16 %v1302_v20, %v1300_v19  ;;  %v1340_v19 = vld [vmem:[#allocation13 + $0x1a0] sm:$0xff]  ;;  %v1342_v20 = vld [vmem:[#allocation13 + $0x1b0] sm:$0xff] }
 0x1ef   :  { %v2561_v24 = vpack.c.bf16 %v1307_v22, %v1305_v21  ;;  %v1345_v21 = vld [vmem:[#allocation13 + $0x1c8] sm:$0xff]  ;;  %v1347_v22 = vld [vmem:[#allocation13 + $0x1d8] sm:$0xff] }
 0x1f0   :  { %2560 = vmatpush1.bf16.msra.mxu1 %v2559_v23  ;;  %v2599_v23 = vpack.c.bf16 %v1342_v20, %v1340_v19  ;;  %v1479_v14 = vld [vmem:[#allocation16 + $0x10] sm:$0xff]  ;;  %v1482_v16 = vld [vmem:[#allocation16 + $0x28] sm:$0xff]  ;;  %v1481_v20 = vld [vmem:[#allocation16 + $0x20] sm:$0xff] }
 0x1f1   :  { %2532 = vmatpush1.bf16.msra.mxu0 %v2531_v26  ;;  %v1306_v26 = vld [vmem:[#allocation13 + $0x90] sm:$0xff]  ;;  %2562 = vmatprep.subr.bf16.mxu1 %v2561_v24 }
 0x1f2   :  { %2534 = vmatprep.subr.bf16.mxu0 %v2533_v27  ;;  %v1309_v27 = vld [vmem:[#allocation13 + $0xa8] sm:$0xff]  ;;  %v2563_v29 = vpack.c.bf16 %v1306_v26, %v1304_v25  ;;  %v2601_v25 = vpack.c.bf16 %v1347_v22, %v1345_v21  ;;  %v1483_v21 = vld [vmem:[#allocation16 + $0x30] sm:$0xff] }
 0x1f3   :  { %v2565_v30 = vpack.c.bf16 %v1311_v28, %v1309_v27  ;;  %v1486_v22 = vld [vmem:[#allocation16 + $0x48] sm:$0xff] }
 0x1f4   :  { %2564 = vmatpush1.bf16.msra.mxu1 %v2563_v29 }
 0x1f5   :  { %2536 = vmatpush1.bf16.msra.mxu0 %v2535_v32  ;;  %v1310_v32 = vld [vmem:[#allocation13 + $0xb0] sm:$0xff]  ;;  %2566 = vmatprep.subr.bf16.mxu1 %v2565_v30 }
 0x1f6   :  { %2538 = vmatprep.subr.bf16.mxu0 %v2537_v33  ;;  %v1313_v33 = vld [vmem:[#allocation13 + $0xc8] sm:$0xff]  ;;  %v2567_v35 = vpack.c.bf16 %v1310_v32, %v1308_v31 }
 0x1f7   :  { %v2569_v36 = vpack.c.bf16 %v1315_v34, %v1313_v33 }
 0x1f8   :  { %2568 = vmatpush1.bf16.msra.mxu1 %v2567_v35 }
 0x1f9   :  { %2540 = vmatpush1.bf16.msra.mxu0 %v2539_v38  ;;  %v1314_v38 = vld [vmem:[#allocation13 + $0xd0] sm:$0xff]  ;;  %2570 = vmatprep.subr.bf16.mxu1 %v2569_v36 }
 0x1fa   :  { %2542 = vmatprep.subr.bf16.mxu0 %v2541_v39  ;;  %v1317_v39 = vld [vmem:[#allocation13 + $0xe8] sm:$0xff]  ;;  %v2571_v41 = vpack.c.bf16 %v1314_v38, %v1312_v37  ;;  %v1344_v37 = vld [vmem:[#allocation13 + $0x1c0] sm:$0xff]  ;;  %v1346_v38 = vld [vmem:[#allocation13 + $0x1d0] sm:$0xff] }
 0x1fc   :  { %2572 = vmatpush1.bf16.msra.mxu1 %v2571_v41  ;;  %v1351_v41 = vld [vmem:[#allocation13 + $0x1f8] sm:$0xff] }
 0x1fd   :  { %2544 = vmatpush1.bf16.msra.mxu0 %v2543_v42  ;;  %v2573_v42 = vpack.c.bf16 %v1319_v40, %v1317_v39  ;;  %v2603_v39 = vpack.c.bf16 %v1346_v38, %v1344_v37  ;;  %v1349_v40 = vld [vmem:[#allocation13 + $0x1e8] sm:$0xff] }
 0x1fe   :  { %v1493_v38 = vld [vmem:[#allocation16 + $0x80] sm:$0xff] }
 0x1ff   :  { %2574 = vmatprep.subr.bf16.mxu1 %v2573_v42  ;;  %v2605_v42 = vpack.c.bf16 %v1351_v41, %v1349_v40  ;;  %v1498_v40 = vld [vmem:[#allocation16 + $0xa8] sm:$0xff]  ;;  %v1500_v41 = vld [vmem:[#allocation16 + $0xb8] sm:$0xff] }
 0x213   :  { %v680_v49 = vpop.f32.mrb[0].mxu0 }
 0x214   :  { %v1051_v50 = vadd.f32 %v3494_v48, %v680_v49  ;;  %v682_v51 = vpop.f32.mrb[1].mxu0  ;;  %v1323_v49 = vld [vmem:[#allocation13 + $0x118] sm:$0xff] }
 0x215   :  { %v1052_v52 = vadd.f32 %v3497_v15, %v682_v51  ;;  %v751_v53 = vpop.f32.mrb[0].mxu1  ;;  %v2577_v51 = vpack.c.bf16 %v1323_v49, %v1321_v46 }
 0x216   :  { %v1053_v54 = vmax.f32 %v1051_v50, 0.0  ;;  %v1057_v55 = vadd.f32 %v3494_v48, %v751_v53  ;;  %v753_v11 = vpop.f32.mrb[1].mxu1  ;;  %v2575_v50 = vpack.c.bf16 %v1318_v44, %v1316_v43  ;;  %v1322_v53 = vld [vmem:[#allocation13 + $0x110] sm:$0xff]  ;;  %v1348_v43 = vld [vmem:[#allocation13 + $0x1e0] sm:$0xff] }
 0x217   :  { %v1054_v56 = vmax.f32 %v1052_v52, 0.0  ;;  %v1058_v57 = vadd.f32 %v3497_v15, %v753_v11  ;;  %v1320_v52 = vld [vmem:[#allocation13 + $0x100] sm:$0xff]  ;;  %v1350_v44 = vld [vmem:[#allocation13 + $0x1f0] sm:$0xff] }
 0x218   :  { %v1059_v59 = vmax.f32 %v1057_v55, 0.0  ;;  %v1327_v55 = vld [vmem:[#allocation13 + $0x138] sm:$0xff]  ;;  %2576 = vmatpush1.bf16.msra.mxu1 %v2575_v50  ;;  %v2579_v11 = vpack.c.bf16 %v1322_v53, %v1320_v52  ;;  %v2607_v46 = vpack.c.bf16 %v1350_v44, %v1348_v43  ;;  %v2629_v43 = vpack.c.bf16 %v1500_v41, %v1498_v40  ;;  %v1497_v44 = vld [vmem:[#allocation16 + $0xa0] sm:$0xff] }
 0x219   :  { %v1060_v58 = vmax.f32 %v1058_v57, 0.0  ;;  %1239 = vmatprep.mubr.f32.mxu0 %v1054_v56  ;;  %2578 = vmatprep.subr.bf16.mxu1 %v2577_v51  ;;  %v1324_v57 = vld [vmem:[#allocation13 + $0x120] sm:$0xff] }
 0x21a   :  { %1240 = vmatmul.mubr.f32.vlgmr.msra.gmra.mrb[6].mxu0 %v1053_v54  ;;  %v1325_v54 = vld [vmem:[#allocation13 + $0x128] sm:$0xff] }
 0x21b   :  { %1245 = vmatprep.mubr.f32.mxu0 %v1060_v58  ;;  %v2581_v56 = vpack.c.bf16 %v1327_v55, %v1325_v54  ;;  %v1326_v58 = vld [vmem:[#allocation13 + $0x130] sm:$0xff] }
 0x21c   :  { %2580 = vmatpush1.bf16.msra.mxu1 %v2579_v11  ;;  %v2583_v61 = vpack.c.bf16 %v1326_v58, %v1324_v57 }
 0x21d   :  { %2582 = vmatprep.subr.bf16.mxu1 %v2581_v56 }
 0x21e   :  { %1246 = vmatmul.mubr.f32.gmra.mrb[8].mxu0 %v1059_v59  ;;  %v1329_v59 = vld [vmem:[#allocation13 + $0x148] sm:$0xff] }
 0x21f   :  { %v2585_v62 = vpack.c.bf16 %v1331_v60, %v1329_v59  ;;  %v1163_v60 = vld [vmem:[#allocation12] sm:$0x3] }
 0x220   :  { %2584 = vmatpush1.bf16.msra.mxu1 %v2583_v61  ;;  %v3512_v61 = vrot.slane %v1163_v60, %v3489_v45 }
 0x221   :  { %2586 = vmatprep.subr.bf16.mxu1 %v2585_v62  ;;  %v3515_v62 = vrot.slane %v1163_v60, %v3491_v47  ;;  %v1510_v60 = vld [vmem:[#allocation16 + $0x108] sm:$0xff] }
 0x224   :  { %2588 = vmatpush1.bf16.msra.mxu1 %v2587_v3 }
 0x225   :  { %2590 = vmatprep.subr.bf16.mxu1 %v2589_v4 }
 0x228   :  { %2592 = vmatpush1.bf16.msra.mxu1 %v2591_v9  ;;  %v1478_v9 = vld [vmem:[#allocation16 + $0x8] sm:$0xff] }
 0x229   :  { %2594 = vmatprep.subr.bf16.mxu1 %v2593_v10  ;;  %v1480_v10 = vld [vmem:[#allocation16 + $0x18] sm:$0xff] }
 0x22a   :  { %v2609_v13 = vpack.c.bf16 %v1480_v10, %v1478_v9  ;;  %v1520_v9 = vld [vmem:[#allocation16 + $0x158] sm:$0xff] }
 0x22c   :  { %2596 = vmatpush1.bf16.msra.mxu1 %v2595_v17  ;;  %v1484_v17 = vld [vmem:[#allocation16 + $0x38] sm:$0xff]  ;;  %2610 = vmatprep.subr.bf16.mxu0 %v2609_v13  ;;  %v1517_v13 = vld [vmem:[#allocation16 + $0x140] sm:$0xff] }
 0x22d   :  { %2598 = vmatprep.subr.bf16.mxu1 %v2597_v18  ;;  %v2611_v18 = vpack.c.bf16 %v1479_v14, %v1477_v12  ;;  %v2613_v19 = vpack.c.bf16 %v1484_v17, %v1482_v16  ;;  %v1519_v14 = vld [vmem:[#allocation16 + $0x150] sm:$0xff]  ;;  %v1522_v16 = vld [vmem:[#allocation16 + $0x168] sm:$0xff]  ;;  %v1524_v17 = vld [vmem:[#allocation16 + $0x178] sm:$0xff] }
 0x22f   :  { %2612 = vmatpush1.bf16.msra.mxu0 %v2611_v18  ;;  %v2651_v18 = vpack.c.bf16 %v1519_v14, %v1517_v13 }
 0x230   :  { %2600 = vmatpush1.bf16.msra.mxu1 %v2599_v23  ;;  %v1488_v23 = vld [vmem:[#allocation16 + $0x58] sm:$0xff]  ;;  %2614 = vmatprep.subr.bf16.mxu0 %v2613_v19  ;;  %v2653_v19 = vpack.c.bf16 %v1524_v17, %v1522_v16 }
 0x231   :  { %2602 = vmatprep.subr.bf16.mxu1 %v2601_v25  ;;  %v2617_v25 = vpack.c.bf16 %v1488_v23, %v1486_v22  ;;  %v1526_v22 = vld [vmem:[#allocation16 + $0x188] sm:$0xff]  ;;  %v1528_v23 = vld [vmem:[#allocation16 + $0x198] sm:$0xff] }
 0x234   :  { %2604 = vmatpush1.bf16.msra.mxu1 %v2603_v39  ;;  %v1495_v39 = vld [vmem:[#allocation16 + $0x90] sm:$0xff] }
 0x235   :  { %2606 = vmatprep.subr.bf16.mxu1 %v2605_v42  ;;  %v2627_v42 = vpack.c.bf16 %v1495_v39, %v1493_v38 }
 0x238   :  { %2608 = vmatpush1.bf16.msra.mxu1 %v2607_v46  ;;  %v1499_v46 = vld [vmem:[#allocation16 + $0xb0] sm:$0xff] }
 0x253   :  { %v822_v24 = vpop.f32.mrb[2].mxu0 }
 0x254   :  { %v1063_v26 = vadd.f32 %v3494_v48, %v822_v24  ;;  %v824_v27 = vpop.f32.mrb[3].mxu0  ;;  %v2615_v24 = vpack.c.bf16 %v1483_v21, %v1481_v20  ;;  %v1521_v20 = vld [vmem:[#allocation16 + $0x160] sm:$0xff]  ;;  %v1523_v21 = vld [vmem:[#allocation16 + $0x170] sm:$0xff] }
 0x255   :  { %v1064_v28 = vadd.f32 %v3497_v15, %v824_v27  ;;  %v893_v29 = vpop.f32.mrb[2].mxu1  ;;  %v1487_v27 = vld [vmem:[#allocation16 + $0x50] sm:$0xff] }
 0x256   :  { %v1065_v30 = vmax.f32 %v1063_v26, 0.0  ;;  %v1069_v31 = vadd.f32 %v3494_v48, %v893_v29  ;;  %v895_v32 = vpop.f32.mrb[3].mxu1  ;;  %v1485_v26 = vld [vmem:[#allocation16 + $0x40] sm:$0xff]  ;;  %v1492_v29 = vld [vmem:[#allocation16 + $0x78] sm:$0xff]  ;;  %2616 = vmatpush1.bf16.msra.mxu0 %v2615_v24  ;;  %v2655_v24 = vpack.c.bf16 %v1523_v21, %v1521_v20 }
 0x257   :  { %v1066_v33 = vmax.f32 %v1064_v28, 0.0  ;;  %v1070_v34 = vadd.f32 %v3497_v15, %v895_v32  ;;  %v1490_v28 = vld [vmem:[#allocation16 + $0x68] sm:$0xff]  ;;  %2618 = vmatprep.subr.bf16.mxu0 %v2617_v25  ;;  %v1489_v32 = vld [vmem:[#allocation16 + $0x60] sm:$0xff]  ;;  %v2657_v25 = vpack.c.bf16 %v1528_v23, %v1526_v22 }
 0x258   :  { %v1071_v36 = vmax.f32 %v1069_v31, 0.0  ;;  %v2621_v31 = vpack.c.bf16 %v1492_v29, %v1490_v28  ;;  %v1530_v28 = vld [vmem:[#allocation16 + $0x1a8] sm:$0xff]  ;;  %v1532_v29 = vld [vmem:[#allocation16 + $0x1b8] sm:$0xff] }
 0x259   :  { %v1072_v35 = vmax.f32 %v1070_v34, 0.0  ;;  %1251 = vmatprep.mubr.f32.mxu0 %v1066_v33  ;;  %v1491_v33 = vld [vmem:[#allocation16 + $0x70] sm:$0xff]  ;;  %v1494_v34 = vld [vmem:[#allocation16 + $0x88] sm:$0xff] }
 0x25a   :  { %1252 = vmatmul.mubr.f32.gmra.mrb[10].mxu0 %v1065_v30  ;;  %v2619_v30 = vpack.c.bf16 %v1487_v27, %v1485_v26  ;;  %v1525_v26 = vld [vmem:[#allocation16 + $0x180] sm:$0xff]  ;;  %v1527_v27 = vld [vmem:[#allocation16 + $0x190] sm:$0xff] }
 0x25b   :  { %1257 = vmatprep.mubr.f32.mxu0 %v1072_v35  ;;  %v1496_v35 = vld [vmem:[#allocation16 + $0x98] sm:$0xff] }
 0x25c   :  { %2620 = vmatpush1.bf16.msra.mxu0 %v2619_v30  ;;  %v2625_v37 = vpack.c.bf16 %v1496_v35, %v1494_v34  ;;  %v2659_v30 = vpack.c.bf16 %v1527_v27, %v1525_v26  ;;  %v1534_v34 = vld [vmem:[#allocation16 + $0x1c8] sm:$0xff]  ;;  %v1536_v35 = vld [vmem:[#allocation16 + $0x1d8] sm:$0xff] }
 0x25d   :  { %2622 = vmatprep.subr.bf16.mxu0 %v2621_v31  ;;  %v2661_v31 = vpack.c.bf16 %v1532_v29, %v1530_v28  ;;  %v2665_v38 = vpack.c.bf16 %v1536_v35, %v1534_v34 }
 0x25e   :  { %1258 = vmatmul.mubr.f32.gmra.mrb[12].mxu0 %v1071_v36  ;;  %v2623_v36 = vpack.c.bf16 %v1491_v33, %v1489_v32  ;;  %v1529_v32 = vld [vmem:[#allocation16 + $0x1a0] sm:$0xff]  ;;  %v1531_v33 = vld [vmem:[#allocation16 + $0x1b0] sm:$0xff] }
 0x260   :  { %2624 = vmatpush1.bf16.msra.mxu0 %v2623_v36  ;;  %v2663_v36 = vpack.c.bf16 %v1531_v33, %v1529_v32 }
 0x261   :  { %2626 = vmatprep.subr.bf16.mxu0 %v2625_v37 }
 0x264   :  { %2628 = vmatpush1.bf16.msra.mxu0 %v2627_v42 }
 0x265   :  { %2630 = vmatprep.subr.bf16.mxu0 %v2629_v43 }
 0x293   :  { %v964_v49 = vpop.f32.mrb[4].mxu0 }
 0x294   :  { %v1075_v50 = vadd.f32 %v3494_v48, %v964_v49  ;;  %v966_v51 = vpop.f32.mrb[5].mxu0  ;;  %v1502_v49 = vld [vmem:[#allocation16 + $0xc8] sm:$0xff] }
 0x295   :  { %v1076_v52 = vadd.f32 %v3497_v15, %v966_v51  ;;  %v1035_v53 = vpop.f32.mrb[4].mxu1  ;;  %v2631_v51 = vpack.c.bf16 %v1499_v46, %v1497_v44 }
 0x296   :  { %v1037_v54 = vpop.f32.mrb[5].mxu1  ;;  %v1077_v56 = vmax.f32 %v1075_v50, 0.0  ;;  %v1081_v57 = vadd.f32 %v3494_v48, %v1035_v53  ;;  %v1504_v50 = vld [vmem:[#allocation16 + $0xd8] sm:$0xff]  ;;  %v1501_v53 = vld [vmem:[#allocation16 + $0xc0] sm:$0xff] }
 0x297   :  { %v1078_v55 = vmax.f32 %v1076_v52, 0.0  ;;  %v1082_v11 = vadd.f32 %v3497_v15, %v1037_v54  ;;  %v2633_v52 = vpack.c.bf16 %v1504_v50, %v1502_v49  ;;  %v1503_v54 = vld [vmem:[#allocation16 + $0xd0] sm:$0xff]  ;;  %2632 = vmatpush1.bf16.msra.mxu0 %v2631_v51 }
 0x298   :  { %v1083_v59 = vmax.f32 %v1081_v57, 0.0 }
 0x299   :  { %v1084_v58 = vmax.f32 %v1082_v11, 0.0  ;;  %1263 = vmatprep.mubr.f32.mxu0 %v1078_v55  ;;  %v1506_v55 = vld [vmem:[#allocation16 + $0xe8] sm:$0xff]  ;;  %v1508_v11 = vld [vmem:[#allocation16 + $0xf8] sm:$0xff]  ;;  %2634 = vmatprep.subr.bf16.mxu0 %v2633_v52 }
 0x29a   :  { %1264 = vmatmul.mubr.f32.gmra.mrb[14].mxu0 %v1077_v56  ;;  %v2635_v56 = vpack.c.bf16 %v1503_v54, %v1501_v53  ;;  %v2637_v57 = vpack.c.bf16 %v1508_v11, %v1506_v55  ;;  %v1533_v53 = vld [vmem:[#allocation16 + $0x1c0] sm:$0xff]  ;;  %v1535_v54 = vld [vmem:[#allocation16 + $0x1d0] sm:$0xff]  ;;  %v1538_v11 = vld [vmem:[#allocation16 + $0x1e8] sm:$0xff] }
 0x29b   :  { %1269 = vmatprep.mubr.f32.mxu0 %v1084_v58  ;;  %v1505_v58 = vld [vmem:[#allocation16 + $0xe0] sm:$0xff]  ;;  %v2667_v55 = vpack.c.bf16 %v1535_v54, %v1533_v53 }
 0x29c   :  { %2636 = vmatpush1.bf16.msra.mxu0 %v2635_v56  ;;  %v1540_v56 = vld [vmem:[#allocation16 + $0x1f8] sm:$0xff]  ;;  %v1676_v53 = vld [vmem:[#allocation19] sm:$0xff] }
 0x29d   :  { %2638 = vmatprep.subr.bf16.mxu0 %v2637_v57  ;;  %v2669_v57 = vpack.c.bf16 %v1540_v56, %v1538_v11  ;;  %v1681_v11 = vld [vmem:[#allocation19 + $0x28] sm:$0xff]  ;;  %v1683_v56 = vld [vmem:[#allocation19 + $0x38] sm:$0xff] }
 0x29e   :  { %1270 = vmatmul.mubr.f32.gmra.mrb[16].mxu0 %v1083_v59  ;;  %v1507_v59 = vld [vmem:[#allocation16 + $0xf0] sm:$0xff] }
 0x2ed   :  { %v1241_v63 = vpop.f32.mrb[6].mxu0 }
 0x2ee   :  { %v1242_v0 = vadd.f32 %v1241_v63, %v3512_v61  ;;  %v1243_v15 = vpop.f32.mrb[7].mxu0  ;;  %v1512_v63 = vld [vmem:[#allocation16 + $0x118] sm:$0xff] }
 0x2ef   :  { %v1244_v1 = vadd.f32 %v1243_v15, %v3515_v62  ;;  %v2641_v15 = vpack.c.bf16 %v1512_v63, %v1510_v60 }
 0x2f0   :  { %v1276_v3 = vmax.f32 %v1242_v0, 0.0  ;;  %v2639_v0 = vpack.c.bf16 %v1507_v59, %v1505_v58  ;;  %v1537_v58 = vld [vmem:[#allocation16 + $0x1e0] sm:$0xff]  ;;  %v1539_v59 = vld [vmem:[#allocation16 + $0x1f0] sm:$0xff] }
 0x2f1   :  { %v1277_v48 = vmax.f32 %v1244_v1, 0.0  ;;  %v1247_v2 = vpop.f32.mrb[8].mxu0  ;;  %v1509_v1 = vld [vmem:[#allocation16 + $0x100] sm:$0xff]  ;;  %v2671_v60 = vpack.c.bf16 %v1539_v59, %v1537_v58  ;;  %v2677_v58 = vpack.c.bf16 %v1683_v56, %v1681_v11 }
 0x2f2   :  { %v1248_v4 = vadd.f32 %v1247_v2, %v3512_v61  ;;  %v1249_v5 = vpop.f32.mrb[9].mxu0  ;;  %v1514_v2 = vld [vmem:[#allocation16 + $0x128] sm:$0xff]  ;;  %2640 = vmatpush1.bf16.msra.mxu0 %v2639_v0 }
 0x2f3   :  { %v1250_v6 = vadd.f32 %v1249_v5, %v3515_v62  ;;  %1428 = vmatprep.mubr.f32.mxu1 %v1277_v48  ;;  %v1511_v48 = vld [vmem:[#allocation16 + $0x110] sm:$0xff]  ;;  %2642 = vmatprep.subr.bf16.mxu0 %v2641_v15  ;;  %v1680_v59 = vld [vmem:[#allocation19 + $0x20] sm:$0xff] }
 0x2f4   :  { %1429 = vmatmul.mubr.f32.vlgmr.msra.gmra.mrb[6].mxu1 %v1276_v3  ;;  %v1278_v8 = vmax.f32 %v1248_v4, 0.0  ;;  %v1516_v3 = vld [vmem:[#allocation16 + $0x138] sm:$0xff]  ;;  %v2643_v4 = vpack.c.bf16 %v1511_v48, %v1509_v1 }
 0x2f5   :  { %v1279_v7 = vmax.f32 %v1250_v6, 0.0  ;;  %v2645_v5 = vpack.c.bf16 %v1516_v3, %v1514_v2  ;;  %v1513_v6 = vld [vmem:[#allocation16 + $0x120] sm:$0xff] }
 0x2f6   :  { %2644 = vmatpush1.bf16.msra.mxu0 %v2643_v4 }
 0x2f7   :  { %1434 = vmatprep.mubr.f32.mxu1 %v1279_v7  ;;  %v1515_v7 = vld [vmem:[#allocation16 + $0x130] sm:$0xff]  ;;  %2646 = vmatprep.subr.bf16.mxu0 %v2645_v5 }
 0x2f8   :  { %1435 = vmatmul.mubr.f32.gmra.mrb[8].mxu1 %v1278_v8  ;;  %v1518_v8 = vld [vmem:[#allocation16 + $0x148] sm:$0xff]  ;;  %v2647_v10 = vpack.c.bf16 %v1515_v7, %v1513_v6 }
 0x2f9   :  { %v2649_v12 = vpack.c.bf16 %v1520_v9, %v1518_v8  ;;  %v1352_v9 = vld [vmem:[#allocation15] sm:$0x3] }
 0x2fa   :  { %2648 = vmatpush1.bf16.msra.mxu0 %v2647_v10  ;;  %v1357_v10 = vrot.slane %v1352_v9, %v3489_v45 }
 0x2fb   :  { %2650 = vmatprep.subr.bf16.mxu0 %v2649_v12  ;;  %v1361_v12 = vrot.slane %v1352_v9, %v3491_v47  ;;  %v1693_v9 = vld [vmem:[#allocation19 + $0x88] sm:$0xff] }
 0x2fe   :  { %2652 = vmatpush1.bf16.msra.mxu0 %v2651_v18 }
 0x2ff   :  { %2654 = vmatprep.subr.bf16.mxu0 %v2653_v19 }
 0x302   :  { %2656 = vmatpush1.bf16.msra.mxu0 %v2655_v24 }
 0x303   :  { %2658 = vmatprep.subr.bf16.mxu0 %v2657_v25 }
 0x306   :  { %2660 = vmatpush1.bf16.msra.mxu0 %v2659_v30 }
 0x307   :  { %2662 = vmatprep.subr.bf16.mxu0 %v2661_v31 }
 0x30a   :  { %2664 = vmatpush1.bf16.msra.mxu0 %v2663_v36 }
 0x30b   :  { %2666 = vmatprep.subr.bf16.mxu0 %v2665_v38 }
 0x30e   :  { %2668 = vmatpush1.bf16.msra.mxu0 %v2667_v55  ;;  %v1678_v55 = vld [vmem:[#allocation19 + $0x10] sm:$0xff] }
 0x30f   :  { %2670 = vmatprep.subr.bf16.mxu0 %v2669_v57  ;;  %v2675_v57 = vpack.c.bf16 %v1678_v55, %v1676_v53  ;;  %v1718_v53 = vld [vmem:[#allocation19 + $0x150] sm:$0xff]  ;;  %v1723_v55 = vld [vmem:[#allocation19 + $0x178] sm:$0xff] }
 0x312   :  { %2672 = vmatpush1.bf16.msra.mxu0 %v2671_v60  ;;  %v1682_v60 = vld [vmem:[#allocation19 + $0x30] sm:$0xff] }
 0x32d   :  { %v1253_v37 = vpop.f32.mrb[10].mxu0 }
 0x32e   :  { %v1254_v39 = vadd.f32 %v1253_v37, %v3512_v61  ;;  %v1255_v40 = vpop.f32.mrb[11].mxu0 }
 0x32f   :  { %v1256_v41 = vadd.f32 %v1255_v40, %v3515_v62 }
 0x330   :  { %v1280_v44 = vmax.f32 %v1254_v39, 0.0 }
 0x331   :  { %v1281_v42 = vmax.f32 %v1256_v41, 0.0  ;;  %v1259_v43 = vpop.f32.mrb[12].mxu0 }
 0x332   :  { %v1260_v46 = vadd.f32 %v1259_v43, %v3512_v61  ;;  %v1261_v49 = vpop.f32.mrb[13].mxu0 }
 0x333   :  { %v1262_v50 = vadd.f32 %v1261_v49, %v3515_v62  ;;  %1440 = vmatprep.mubr.f32.mxu1 %v1281_v42 }
 0x334   :  { %1441 = vmatmul.mubr.f32.gmra.mrb[10].mxu1 %v1280_v44  ;;  %v1282_v52 = vmax.f32 %v1260_v46, 0.0 }
 0x335   :  { %v1283_v51 = vmax.f32 %v1262_v50, 0.0 }
 0x337   :  { %1446 = vmatprep.mubr.f32.mxu1 %v1283_v51  ;;  %v1677_v51 = vld [vmem:[#allocation19 + $0x8] sm:$0xff] }
 0x338   :  { %1447 = vmatmul.mubr.f32.gmra.mrb[12].mxu1 %v1282_v52  ;;  %v1679_v52 = vld [vmem:[#allocation19 + $0x18] sm:$0xff] }
 0x339   :  { %v2673_v54 = vpack.c.bf16 %v1679_v52, %v1677_v51  ;;  %v1716_v52 = vld [vmem:[#allocation19 + $0x140] sm:$0xff] }
 0x33a   :  { %v2715_v11 = vpack.c.bf16 %v1718_v53, %v1716_v52  ;;  %v1836_v52 = vld [vmem:[#allocation22 + $0x58] sm:$0xff] }
 0x33b   :  { %2674 = vmatprep.subr.bf16.mxu1 %v2673_v54  ;;  %v1721_v54 = vld [vmem:[#allocation19 + $0x168] sm:$0xff] }
 0x33c   :  { %2676 = vmatpush1.bf16.msra.mxu1 %v2675_v57  ;;  %v2717_v56 = vpack.c.bf16 %v1723_v55, %v1721_v54  ;;  %v1720_v57 = vld [vmem:[#allocation19 + $0x160] sm:$0xff] }
 0x33d   :  { %2678 = vmatprep.subr.bf16.mxu1 %v2677_v58  ;;  %v1722_v58 = vld [vmem:[#allocation19 + $0x170] sm:$0xff]  ;;  %v1833_v55 = vld [vmem:[#allocation22 + $0x40] sm:$0xff] }
 0x36d   :  { %v1265_v63 = vpop.f32.mrb[14].mxu0 }
 0x36e   :  { %v1266_v0 = vadd.f32 %v1265_v63, %v3512_v61  ;;  %v1267_v15 = vpop.f32.mrb[15].mxu0  ;;  %v1685_v63 = vld [vmem:[#allocation19 + $0x48] sm:$0xff] }
 0x36f   :  { %v1268_v1 = vadd.f32 %v1267_v15, %v3515_v62  ;;  %v2679_v15 = vpack.c.bf16 %v1682_v60, %v1680_v59  ;;  %v1725_v59 = vld [vmem:[#allocation19 + $0x188] sm:$0xff]  ;;  %v1727_v60 = vld [vmem:[#allocation19 + $0x198] sm:$0xff] }
 0x370   :  { %v1284_v3 = vmax.f32 %v1266_v0, 0.0  ;;  %v1687_v0 = vld [vmem:[#allocation19 + $0x58] sm:$0xff] }
 0x371   :  { %v1285_v48 = vmax.f32 %v1268_v1, 0.0  ;;  %v1271_v2 = vpop.f32.mrb[16].mxu0  ;;  %v2681_v1 = vpack.c.bf16 %v1687_v0, %v1685_v63  ;;  %2680 = vmatpush1.bf16.msra.mxu1 %v2679_v15  ;;  %v2719_v63 = vpack.c.bf16 %v1722_v58, %v1720_v57  ;;  %v2721_v0 = vpack.c.bf16 %v1727_v60, %v1725_v59  ;;  %v1724_v15 = vld [vmem:[#allocation19 + $0x180] sm:$0xff] }
 0x372   :  { %v1272_v4 = vadd.f32 %v1271_v2, %v3512_v61  ;;  %v1273_v5 = vpop.f32.mrb[17].mxu0  ;;  %v1686_v2 = vld [vmem:[#allocation19 + $0x50] sm:$0xff]  ;;  %v1840_v57 = vld [vmem:[#allocation22 + $0x78] sm:$0xff]  ;;  %v1837_v60 = vld [vmem:[#allocation22 + $0x60] sm:$0xff] }
 0x373   :  { %v1274_v6 = vadd.f32 %v1273_v5, %v3515_v62  ;;  %1452 = vmatprep.mubr.f32.mxu1 %v1285_v48  ;;  %v1684_v48 = vld [vmem:[#allocation19 + $0x40] sm:$0xff]  ;;  %2682 = vmatprep.subr.bf16.mxu1 %v2681_v1  ;;  %v1726_v1 = vld [vmem:[#allocation19 + $0x190] sm:$0xff] }
 0x374   :  { %1453 = vmatmul.mubr.f32.gmra.mrb[14].mxu1 %v1284_v3  ;;  %v1286_v8 = vmax.f32 %v1272_v4, 0.0  ;;  %v1689_v3 = vld [vmem:[#allocation19 + $0x68] sm:$0xff]  ;;  %v1691_v4 = vld [vmem:[#allocation19 + $0x78] sm:$0xff]  ;;  %v2683_v5 = vpack.c.bf16 %v1686_v2, %v1684_v48  ;;  %v2723_v48 = vpack.c.bf16 %v1726_v1, %v1724_v15 }
 0x375   :  { %v1287_v7 = vmax.f32 %v1274_v6, 0.0  ;;  %v2685_v6 = vpack.c.bf16 %v1691_v4, %v1689_v3  ;;  %v1541_v2 = vld [vmem:[#allocation18] sm:$0x3]  ;;  %v1729_v3 = vld [vmem:[#allocation19 + $0x1a8] sm:$0xff] }
 0x376   :  { %2684 = vmatpush1.bf16.msra.mxu1 %v2683_v5  ;;  %v1731_v4 = vld [vmem:[#allocation19 + $0x1b8] sm:$0xff]  ;;  %v3532_v5 = vrot.slane %v1541_v2, %v3489_v45 }
 0x377   :  { %1458 = vmatprep.mubr.f32.mxu1 %v1287_v7  ;;  %v1688_v7 = vld [vmem:[#allocation19 + $0x60] sm:$0xff]  ;;  %2686 = vmatprep.subr.bf16.mxu1 %v2685_v6  ;;  %v2725_v6 = vpack.c.bf16 %v1731_v4, %v1729_v3  ;;  %v1843_v3 = vld [vmem:[#allocation22 + $0x90] sm:$0xff]  ;;  %v1846_v4 = vld [vmem:[#allocation22 + $0xa8] sm:$0xff] }
 0x378   :  { %1459 = vmatmul.mubr.f32.gmra.mrb[16].mxu1 %v1286_v8  ;;  %v1690_v8 = vld [vmem:[#allocation19 + $0x70] sm:$0xff]  ;;  %v1844_v15 = vld [vmem:[#allocation22 + $0x98] sm:$0xff] }
 0x3c7   :  { %v1430_v13 = vpop.f32.mrb[6].mxu1 }
 0x3c8   :  { %v1431_v14 = vadd.f32 %v1430_v13, %v1357_v10  ;;  %v1432_v16 = vpop.f32.mrb[7].mxu1 }
 0x3c9   :  { %v1433_v17 = vadd.f32 %v1432_v16, %v1361_v12  ;;  %v1694_v16 = vld [vmem:[#allocation19 + $0x90] sm:$0xff] }
 0x3ca   :  { %v1465_v19 = vmax.f32 %v1431_v14, 0.0  ;;  %v1692_v14 = vld [vmem:[#allocation19 + $0x80] sm:$0xff] }
 0x3cb   :  { %v1466_v18 = vmax.f32 %v1433_v17, 0.0  ;;  %v1436_v61 = vpop.f32.mrb[8].mxu1  ;;  %v1697_v17 = vld [vmem:[#allocation19 + $0xa8] sm:$0xff] }
 0x3cc   :  { %v1437_v20 = vadd.f32 %v1436_v61, %v1357_v10  ;;  %v1438_v62 = vpop.f32.mrb[9].mxu1  ;;  %v2691_v61 = vpack.c.bf16 %v1694_v16, %v1692_v14  ;;  %v1733_v14 = vld [vmem:[#allocation19 + $0x1c8] sm:$0xff]  ;;  %v1735_v16 = vld [vmem:[#allocation19 + $0x1d8] sm:$0xff] }
 0x3cd   :  { %v1439_v21 = vadd.f32 %v1438_v62, %v1361_v12  ;;  %1617 = vmatprep.mubr.f32.mxu0 %v1466_v18  ;;  %v1699_v18 = vld [vmem:[#allocation19 + $0xb8] sm:$0xff]  ;;  %v1698_v62 = vld [vmem:[#allocation19 + $0xb0] sm:$0xff] }
 0x3ce   :  { %1618 = vmatmul.mubr.f32.vlgmr.msra.gmra.mrb[18].mxu0 %v1465_v19  ;;  %v1467_v23 = vmax.f32 %v1437_v20, 0.0  ;;  %v2693_v19 = vpack.c.bf16 %v1699_v18, %v1697_v17  ;;  %v1696_v20 = vld [vmem:[#allocation19 + $0xa0] sm:$0xff]  ;;  %v2729_v18 = vpack.c.bf16 %v1735_v16, %v1733_v14 }
 0x3cf   :  { %v1468_v22 = vmax.f32 %v1439_v21, 0.0  ;;  %v1701_v21 = vld [vmem:[#allocation19 + $0xc8] sm:$0xff]  ;;  %v1852_v14 = vld [vmem:[#allocation22 + $0xd8] sm:$0xff] }
 0x3d1   :  { %1623 = vmatprep.mubr.f32.mxu0 %v1468_v22  ;;  %v1703_v22 = vld [vmem:[#allocation19 + $0xd8] sm:$0xff] }
 0x3d2   :  { %1624 = vmatmul.mubr.f32.gmra.mrb[20].mxu0 %v1467_v23  ;;  %v2695_v23 = vpack.c.bf16 %v1698_v62, %v1696_v20 }
 0x407   :  { %v1442_v24 = vpop.f32.mrb[10].mxu1 }
 0x408   :  { %v1443_v25 = vadd.f32 %v1442_v24, %v1357_v10  ;;  %v1444_v26 = vpop.f32.mrb[11].mxu1  ;;  %v2697_v24 = vpack.c.bf16 %v1703_v22, %v1701_v21 }
 0x409   :  { %v1445_v27 = vadd.f32 %v1444_v26, %v1361_v12  ;;  %v1702_v26 = vld [vmem:[#allocation19 + $0xd0] sm:$0xff] }
 0x40a   :  { %v1469_v30 = vmax.f32 %v1443_v25, 0.0  ;;  %v1700_v25 = vld [vmem:[#allocation19 + $0xc0] sm:$0xff] }
 0x40b   :  { %v1470_v28 = vmax.f32 %v1445_v27, 0.0  ;;  %v1448_v29 = vpop.f32.mrb[12].mxu1  ;;  %v1705_v27 = vld [vmem:[#allocation19 + $0xe8] sm:$0xff] }
 0x40c   :  { %v1449_v31 = vadd.f32 %v1448_v29, %v1357_v10  ;;  %v1450_v32 = vpop.f32.mrb[13].mxu1  ;;  %v2699_v29 = vpack.c.bf16 %v1702_v26, %v1700_v25  ;;  %v1737_v25 = vld [vmem:[#allocation19 + $0x1e8] sm:$0xff]  ;;  %v1739_v26 = vld [vmem:[#allocation19 + $0x1f8] sm:$0xff] }
 0x40d   :  { %v1451_v33 = vadd.f32 %v1450_v32, %v1361_v12  ;;  %1629 = vmatprep.mubr.f32.mxu0 %v1470_v28  ;;  %v1707_v28 = vld [vmem:[#allocation19 + $0xf8] sm:$0xff]  ;;  %v1706_v32 = vld [vmem:[#allocation19 + $0xf0] sm:$0xff] }
 0x40e   :  { %1630 = vmatmul.mubr.f32.gmra.mrb[22].mxu0 %v1469_v30  ;;  %v1471_v35 = vmax.f32 %v1449_v31, 0.0  ;;  %v2701_v30 = vpack.c.bf16 %v1707_v28, %v1705_v27  ;;  %v1704_v31 = vld [vmem:[#allocation19 + $0xe0] sm:$0xff] }
 0x40f   :  { %v1472_v34 = vmax.f32 %v1451_v33, 0.0  ;;  %v1709_v33 = vld [vmem:[#allocation19 + $0x108] sm:$0xff] }
 0x411   :  { %1635 = vmatprep.mubr.f32.mxu0 %v1472_v34  ;;  %v1711_v34 = vld [vmem:[#allocation19 + $0x118] sm:$0xff] }
 0x412   :  { %1636 = vmatmul.mubr.f32.gmra.mrb[24].mxu0 %v1471_v35  ;;  %v2703_v35 = vpack.c.bf16 %v1706_v32, %v1704_v31  ;;  %v1738_v31 = vld [vmem:[#allocation19 + $0x1f0] sm:$0xff] }
 0x447   :  { %v1454_v36 = vpop.f32.mrb[14].mxu1 }
 0x448   :  { %v1455_v37 = vadd.f32 %v1454_v36, %v1357_v10  ;;  %v1456_v38 = vpop.f32.mrb[15].mxu1  ;;  %v2705_v36 = vpack.c.bf16 %v1711_v34, %v1709_v33 }
 0x449   :  { %v1457_v39 = vadd.f32 %v1456_v38, %v1361_v12  ;;  %v1710_v38 = vld [vmem:[#allocation19 + $0x110] sm:$0xff] }
 0x44a   :  { %v1473_v42 = vmax.f32 %v1455_v37, 0.0  ;;  %v1708_v37 = vld [vmem:[#allocation19 + $0x100] sm:$0xff] }
 0x44b   :  { %v1474_v40 = vmax.f32 %v1457_v39, 0.0  ;;  %v1460_v41 = vpop.f32.mrb[16].mxu1  ;;  %v1713_v39 = vld [vmem:[#allocation19 + $0x128] sm:$0xff] }
 0x44c   :  { %v1461_v43 = vadd.f32 %v1460_v41, %v1357_v10  ;;  %v1462_v44 = vpop.f32.mrb[17].mxu1  ;;  %v1695_v10 = vld [vmem:[#allocation19 + $0x98] sm:$0xff]  ;;  %v2707_v41 = vpack.c.bf16 %v1710_v38, %v1708_v37  ;;  %v1826_v37 = vld [vmem:[#allocation22 + $0x8] sm:$0xff] }
 0x44d   :  { %v1463_v46 = vadd.f32 %v1462_v44, %v1361_v12  ;;  %1641 = vmatprep.mubr.f32.mxu0 %v1474_v40  ;;  %v2687_v12 = vpack.c.bf16 %v1690_v8, %v1688_v7  ;;  %v2689_v13 = vpack.c.bf16 %v1695_v10, %v1693_v9  ;;  %v1715_v40 = vld [vmem:[#allocation19 + $0x138] sm:$0xff]  ;;  %v1714_v44 = vld [vmem:[#allocation19 + $0x130] sm:$0xff]  ;;  %v1728_v7 = vld [vmem:[#allocation19 + $0x1a0] sm:$0xff]  ;;  %v3535_v10 = vrot.slane %v1541_v2, %v3491_v47 }
 0x44e   :  { %1642 = vmatmul.mubr.f32.gmra.mrb[26].mxu0 %v1473_v42  ;;  %v1475_v50 = vmax.f32 %v1461_v43, 0.0  ;;  %v2709_v42 = vpack.c.bf16 %v1715_v40, %v1713_v39  ;;  %v1712_v43 = vld [vmem:[#allocation19 + $0x120] sm:$0xff]  ;;  %v1730_v8 = vld [vmem:[#allocation19 + $0x1b0] sm:$0xff] }
 0x44f   :  { %v1476_v49 = vmax.f32 %v1463_v46, 0.0  ;;  %2688 = vmatpush1.bf16.msra.mxu1 %v2687_v12  ;;  %v1717_v46 = vld [vmem:[#allocation19 + $0x148] sm:$0xff]  ;;  %v2727_v12 = vpack.c.bf16 %v1730_v8, %v1728_v7  ;;  %v1828_v38 = vld [vmem:[#allocation22 + $0x18] sm:$0xff] }
 0x450   :  { %2690 = vmatprep.subr.bf16.mxu1 %v2689_v13  ;;  %v1825_v39 = vld [vmem:[#allocation22] sm:$0xff]  ;;  %v2737_v40 = vpack.c.bf16 %v1828_v38, %v1826_v37  ;;  %v1863_v37 = vld [vmem:[#allocation22 + $0x130] sm:$0xff]  ;;  %v1866_v38 = vld [vmem:[#allocation22 + $0x148] sm:$0xff] }
 0x451   :  { %1647 = vmatprep.mubr.f32.mxu0 %v1476_v49  ;;  %v1719_v49 = vld [vmem:[#allocation19 + $0x158] sm:$0xff]  ;;  %v1841_v2 = vld [vmem:[#allocation22 + $0x80] sm:$0xff] }
 0x452   :  { %1648 = vmatmul.mubr.f32.gmra.mrb[28].mxu0 %v1475_v50  ;;  %v2711_v50 = vpack.c.bf16 %v1714_v44, %v1712_v43  ;;  %v2713_v51 = vpack.c.bf16 %v1719_v49, %v1717_v46  ;;  %v1832_v43 = vld [vmem:[#allocation22 + $0x38] sm:$0xff]  ;;  %v1829_v49 = vld [vmem:[#allocation22 + $0x20] sm:$0xff]  ;;  %2738 = vmatprep.subr.bf16.mxu0 %v2737_v40  ;;  %v2755_v7 = vpack.c.bf16 %v1843_v3, %v1841_v2 }
 0x453   :  { %2692 = vmatpush1.bf16.msra.mxu1 %v2691_v61  ;;  %v1732_v61 = vld [vmem:[#allocation19 + $0x1c0] sm:$0xff] }
 0x454   :  { %2694 = vmatprep.subr.bf16.mxu1 %v2693_v19  ;;  %v1734_v19 = vld [vmem:[#allocation19 + $0x1d0] sm:$0xff] }
 0x455   :  { %v2731_v21 = vpack.c.bf16 %v1734_v19, %v1732_v61  ;;  %v1851_v61 = vld [vmem:[#allocation22 + $0xd0] sm:$0xff]  ;;  %v1854_v19 = vld [vmem:[#allocation22 + $0xe8] sm:$0xff] }
 0x457   :  { %2696 = vmatpush1.bf16.msra.mxu1 %v2695_v23 }
 0x458   :  { %2698 = vmatprep.subr.bf16.mxu1 %v2697_v24 }
 0x45b   :  { %2700 = vmatpush1.bf16.msra.mxu1 %v2699_v29  ;;  %v2733_v29 = vpack.c.bf16 %v1739_v26, %v1737_v25  ;;  %v1860_v25 = vld [vmem:[#allocation22 + $0x118] sm:$0xff] }
 0x45c   :  { %2702 = vmatprep.subr.bf16.mxu1 %v2701_v30  ;;  %v1736_v30 = vld [vmem:[#allocation19 + $0x1e0] sm:$0xff] }
 0x45d   :  { %v2735_v34 = vpack.c.bf16 %v1738_v31, %v1736_v30  ;;  %v1862_v30 = vld [vmem:[#allocation22 + $0x128] sm:$0xff]  ;;  %v1864_v31 = vld [vmem:[#allocation22 + $0x138] sm:$0xff] }
 0x45f   :  { %2704 = vmatpush1.bf16.msra.mxu1 %v2703_v35 }
 0x460   :  { %2706 = vmatprep.subr.bf16.mxu1 %v2705_v36 }
 0x463   :  { %2708 = vmatpush1.bf16.msra.mxu1 %v2707_v41  ;;  %v1827_v41 = vld [vmem:[#allocation22 + $0x10] sm:$0xff] }
 0x464   :  { %2710 = vmatprep.subr.bf16.mxu1 %v2709_v42  ;;  %v1830_v42 = vld [vmem:[#allocation22 + $0x28] sm:$0xff]  ;;  %v2739_v44 = vpack.c.bf16 %v1827_v41, %v1825_v39  ;;  %v1868_v39 = vld [vmem:[#allocation22 + $0x158] sm:$0xff] }
 0x465   :  { %v2741_v46 = vpack.c.bf16 %v1832_v43, %v1830_v42  ;;  %v2777_v41 = vpack.c.bf16 %v1868_v39, %v1866_v38  ;;  %v1865_v42 = vld [vmem:[#allocation22 + $0x140] sm:$0xff]  ;;  %v1867_v43 = vld [vmem:[#allocation22 + $0x150] sm:$0xff] }
 0x466   :  { %2740 = vmatpush1.bf16.msra.mxu0 %v2739_v44  ;;  %v1870_v44 = vld [vmem:[#allocation22 + $0x168] sm:$0xff]  ;;  %v1881_v38 = vld [vmem:[#allocation22 + $0x1c0] sm:$0xff]  ;;  %v1883_v39 = vld [vmem:[#allocation22 + $0x1d0] sm:$0xff] }
 0x467   :  { %2712 = vmatpush1.bf16.msra.mxu1 %v2711_v50  ;;  %v1831_v50 = vld [vmem:[#allocation22 + $0x30] sm:$0xff]  ;;  %2742 = vmatprep.subr.bf16.mxu0 %v2741_v46  ;;  %v1872_v46 = vld [vmem:[#allocation22 + $0x178] sm:$0xff] }
 0x468   :  { %2714 = vmatprep.subr.bf16.mxu1 %v2713_v51  ;;  %v1834_v51 = vld [vmem:[#allocation22 + $0x48] sm:$0xff]  ;;  %v2743_v53 = vpack.c.bf16 %v1831_v50, %v1829_v49  ;;  %v2779_v49 = vpack.c.bf16 %v1867_v43, %v1865_v42  ;;  %v2781_v50 = vpack.c.bf16 %v1872_v46, %v1870_v44  ;;  %v1888_v42 = vld [vmem:[#allocation22 + $0x1f8] sm:$0xff]  ;;  %v1885_v44 = vld [vmem:[#allocation22 + $0x1e0] sm:$0xff] }
 0x469   :  { %v2745_v54 = vpack.c.bf16 %v1836_v52, %v1834_v51  ;;  %v1869_v51 = vld [vmem:[#allocation22 + $0x160] sm:$0xff]  ;;  %v1871_v52 = vld [vmem:[#allocation22 + $0x170] sm:$0xff] }
 0x46a   :  { %2744 = vmatpush1.bf16.msra.mxu0 %v2743_v53  ;;  %v1874_v53 = vld [vmem:[#allocation22 + $0x188] sm:$0xff]  ;;  %v1887_v46 = vld [vmem:[#allocation22 + $0x1f0] sm:$0xff] }
 0x46b   :  { %2716 = vmatpush1.bf16.msra.mxu1 %v2715_v11  ;;  %v1835_v11 = vld [vmem:[#allocation22 + $0x50] sm:$0xff]  ;;  %2746 = vmatprep.subr.bf16.mxu0 %v2745_v54  ;;  %v1876_v54 = vld [vmem:[#allocation22 + $0x198] sm:$0xff] }
 0x46c   :  { %2718 = vmatprep.subr.bf16.mxu1 %v2717_v56  ;;  %v1838_v56 = vld [vmem:[#allocation22 + $0x68] sm:$0xff]  ;;  %v2747_v58 = vpack.c.bf16 %v1835_v11, %v1833_v55  ;;  %v2783_v55 = vpack.c.bf16 %v1871_v52, %v1869_v51  ;;  %v2785_v11 = vpack.c.bf16 %v1876_v54, %v1874_v53 }
 0x46d   :  { %v2749_v59 = vpack.c.bf16 %v1840_v57, %v1838_v56  ;;  %v1873_v56 = vld [vmem:[#allocation22 + $0x180] sm:$0xff]  ;;  %v1875_v57 = vld [vmem:[#allocation22 + $0x190] sm:$0xff] }
 0x46e   :  { %2748 = vmatpush1.bf16.msra.mxu0 %v2747_v58  ;;  %v1878_v58 = vld [vmem:[#allocation22 + $0x1a8] sm:$0xff] }
 0x46f   :  { %2720 = vmatpush1.bf16.msra.mxu1 %v2719_v63  ;;  %v1839_v63 = vld [vmem:[#allocation22 + $0x70] sm:$0xff]  ;;  %2750 = vmatprep.subr.bf16.mxu0 %v2749_v59  ;;  %v1880_v59 = vld [vmem:[#allocation22 + $0x1b8] sm:$0xff] }
 0x470   :  { %2722 = vmatprep.subr.bf16.mxu1 %v2721_v0  ;;  %v1842_v0 = vld [vmem:[#allocation22 + $0x88] sm:$0xff]  ;;  %v2751_v1 = vpack.c.bf16 %v1839_v63, %v1837_v60  ;;  %v2787_v60 = vpack.c.bf16 %v1875_v57, %v1873_v56  ;;  %v2789_v63 = vpack.c.bf16 %v1880_v59, %v1878_v58  ;;  %v1974_v56 = vld [vmem:[#allocation25] sm:$0x3]  ;;  %v1975_v58 = vld [vmem:[#allocation3] sm:$0x1]  ;;  %v3193_v59 = vmov 0  }
 0x471   :  { %v1993_v57 = vrot.slane %v1974_v56, %v3491_v47  ;;  %2821 = vset.pattern.permute.xlu0 %v3193_v59 }
 0x472   :  { %2752 = vmatpush1.bf16.msra.mxu0 %v2751_v1  ;;  %v1882_v1 = vld [vmem:[#allocation22 + $0x1c8] sm:$0xff]  ;;  %1978 = vperm.xlu0 %2821, %v1975_v58  }
 0x473   :  { %2724 = vmatpush1.bf16.msra.mxu1 %v2723_v48  ;;  %v2753_v48 = vpack.c.bf16 %v1844_v15, %v1842_v0  ;;  %v1877_v0 = vld [vmem:[#allocation22 + $0x1a0] sm:$0xff]  ;;  %v1879_v15 = vld [vmem:[#allocation22 + $0x1b0] sm:$0xff] }
 0x474   :  { %2726 = vmatprep.subr.bf16.mxu1 %v2725_v6  ;;  %v1848_v6 = vld [vmem:[#allocation22 + $0xb8] sm:$0xff] }
 0x475   :  { %2754 = vmatprep.subr.bf16.mxu0 %v2753_v48  ;;  %v2757_v8 = vpack.c.bf16 %v1848_v6, %v1846_v4  ;;  %v1884_v48 = vld [vmem:[#allocation22 + $0x1d8] sm:$0xff]  ;;  %v2791_v6 = vpack.c.bf16 %v1879_v15, %v1877_v0 }
 0x476   :  { %2756 = vmatpush1.bf16.msra.mxu0 %v2755_v7 }
 0x477   :  { %2728 = vmatpush1.bf16.msra.mxu1 %v2727_v12  ;;  %v1847_v12 = vld [vmem:[#allocation22 + $0xb0] sm:$0xff]  ;;  %2758 = vmatprep.subr.bf16.mxu0 %v2757_v8  ;;  %v2793_v8 = vpack.c.bf16 %v1884_v48, %v1882_v1 }
 0x478   :  { %2730 = vmatprep.subr.bf16.mxu1 %v2729_v18  ;;  %v1849_v18 = vld [vmem:[#allocation22 + $0xc0] sm:$0xff] }
 0x47b   :  { %2732 = vmatpush1.bf16.msra.mxu1 %v2731_v21 }
 0x47c   :  { %2734 = vmatprep.subr.bf16.mxu1 %v2733_v29  ;;  %v1859_v29 = vld [vmem:[#allocation22 + $0x110] sm:$0xff] }
 0x47f   :  { %2736 = vmatpush1.bf16.msra.mxu1 %v2735_v34  ;;  %v1861_v34 = vld [vmem:[#allocation22 + $0x120] sm:$0xff] }
 0x480   :  { %v2775_v40 = vpack.c.bf16 %v1863_v37, %v1861_v34 }
 0x4a1   :  { %v1619_v9 = vpop.f32.mrb[18].mxu0 }
 0x4a2   :  { %v1621_v13 = vpop.f32.mrb[19].mxu0  ;;  %v1620_v17 = vadd.f32 %v1619_v9, %v3532_v5  ;;  %v1845_v9 = vld [vmem:[#allocation22 + $0xa0] sm:$0xff] }
 0x4a3   :  { %v1622_v20 = vadd.f32 %v1621_v13, %v3535_v10  ;;  %v1850_v13 = vld [vmem:[#allocation22 + $0xc8] sm:$0xff]  ;;  %v2759_v16 = vpack.c.bf16 %v1847_v12, %v1845_v9 }
 0x4a4   :  { %v1654_v27 = vmax.f32 %v1620_v17, 0.0  ;;  %v2761_v17 = vpack.c.bf16 %v1852_v14, %v1850_v13 }
 0x4a5   :  { %v1625_v62 = vpop.f32.mrb[20].mxu0  ;;  %v1655_v32 = vmax.f32 %v1622_v20, 0.0  ;;  %v1856_v20 = vld [vmem:[#allocation22 + $0xf8] sm:$0xff]  ;;  %2760 = vmatpush1.bf16.msra.mxu0 %v2759_v16 }
 0x4a6   :  { %v1626_v22 = vadd.f32 %v1625_v62, %v3532_v5  ;;  %v1627_v23 = vpop.f32.mrb[21].mxu0  ;;  %v2763_v62 = vpack.c.bf16 %v1851_v61, %v1849_v18  ;;  %2762 = vmatprep.subr.bf16.mxu0 %v2761_v17  ;;  %v2765_v21 = vpack.c.bf16 %v1856_v20, %v1854_v19 }
 0x4a7   :  { %v1628_v24 = vadd.f32 %v1627_v23, %v3535_v10  ;;  %v1855_v23 = vld [vmem:[#allocation22 + $0xf0] sm:$0xff] }
 0x4a8   :  { %v1656_v28 = vmax.f32 %v1626_v22, 0.0  ;;  %v1853_v22 = vld [vmem:[#allocation22 + $0xe0] sm:$0xff] }
 0x4a9   :  { %v1657_v33 = vmax.f32 %v1628_v24, 0.0  ;;  %v1858_v24 = vld [vmem:[#allocation22 + $0x108] sm:$0xff]  ;;  %2764 = vmatpush1.bf16.msra.mxu0 %v2763_v62  ;;  %v2767_v26 = vpack.c.bf16 %v1855_v23, %v1853_v22 }
 0x4aa   :  { %v3541_v35 = vadd.f32 %v1656_v28, %v1654_v27  ;;  %2766 = vmatprep.subr.bf16.mxu0 %v2765_v21  ;;  %v2769_v27 = vpack.c.bf16 %v1860_v25, %v1858_v24  ;;  %v1857_v28 = vld [vmem:[#allocation22 + $0x100] sm:$0xff] }
 0x4ab   :  { %v3543_v36 = vadd.f32 %v1657_v33, %v1655_v32  ;;  %v2771_v32 = vpack.c.bf16 %v1859_v29, %v1857_v28  ;;  %v2773_v33 = vpack.c.bf16 %v1864_v31, %v1862_v30 }
 0x4ad   :  { %2768 = vmatpush1.bf16.msra.mxu0 %v2767_v26 }
 0x4ae   :  { %2770 = vmatprep.subr.bf16.mxu0 %v2769_v27 }
 0x4b1   :  { %2772 = vmatpush1.bf16.msra.mxu0 %v2771_v32 }
 0x4b2   :  { %2774 = vmatprep.subr.bf16.mxu0 %v2773_v33 }
 0x4b5   :  { %2776 = vmatpush1.bf16.msra.mxu0 %v2775_v40  ;;  %v2795_v40 = vpack.c.bf16 %v1883_v39, %v1881_v38 }
 0x4b6   :  { %2778 = vmatprep.subr.bf16.mxu0 %v2777_v41  ;;  %v1886_v41 = vld [vmem:[#allocation22 + $0x1e8] sm:$0xff] }
 0x4b7   :  { %v2797_v43 = vpack.c.bf16 %v1888_v42, %v1886_v41 }
 0x4b9   :  { %2780 = vmatpush1.bf16.msra.mxu0 %v2779_v49  ;;  %v1740_v49 = vld [vmem:[#allocation21] sm:$0x3] }
 0x4ba   :  { %2782 = vmatprep.subr.bf16.mxu0 %v2781_v50  ;;  %v1749_v50 = vrot.slane %v1740_v49, %v3491_v47 }
 0x4bd   :  { %2784 = vmatpush1.bf16.msra.mxu0 %v2783_v55 }
 0x4be   :  { %2786 = vmatprep.subr.bf16.mxu0 %v2785_v11 }
 0x4c1   :  { %2788 = vmatpush1.bf16.msra.mxu0 %v2787_v60  ;;  %v1889_v60 = vld [vmem:[#allocation24] sm:$0x3] }
 0x4c2   :  { %2790 = vmatprep.subr.bf16.mxu0 %v2789_v63  ;;  %v1894_v63 = vrot.slane %v1889_v60, %v3489_v45  ;;  %v1898_v0 = vrot.slane %v1889_v60, %v3491_v47 }
 0x4c5   :  { %2792 = vmatpush1.bf16.msra.mxu0 %v2791_v6  ;;  %v1989_v6 = vrot.slane %v1974_v56, %v3489_v45 }
 0x4c6   :  { %2794 = vmatprep.subr.bf16.mxu0 %v2793_v8 }
 0x4c9   :  { %2796 = vmatpush1.bf16.msra.mxu0 %v2795_v40 }
 0x4ca   :  { %2798 = vmatprep.subr.bf16.mxu0 %v2797_v43 }
 0x4e1   :  { %v1631_v2 = vpop.f32.mrb[22].mxu0 }
 0x4e2   :  { %v1632_v3 = vadd.f32 %v1631_v2, %v3532_v5  ;;  %v1633_v4 = vpop.f32.mrb[23].mxu0 }
 0x4e3   :  { %v1634_v7 = vadd.f32 %v1633_v4, %v3535_v10 }
 0x4e4   :  { %v1658_v9 = vmax.f32 %v1632_v3, 0.0 }
 0x4e5   :  { %v1659_v12 = vmax.f32 %v1634_v7, 0.0  ;;  %v1637_v13 = vpop.f32.mrb[24].mxu0 }
 0x4e6   :  { %v1668_v14 = vadd.f32 %v3541_v35, %v1658_v9  ;;  %v1638_v16 = vadd.f32 %v1637_v13, %v3532_v5  ;;  %v1639_v17 = vpop.f32.mrb[25].mxu0 }
 0x4e7   :  { %v1669_v18 = vadd.f32 %v3543_v36, %v1659_v12  ;;  %v1640_v61 = vadd.f32 %v1639_v17, %v3535_v10 }
 0x4e8   :  { %v1660_v19 = vmax.f32 %v1638_v16, 0.0 }
 0x4e9   :  { %v1661_v20 = vmax.f32 %v1640_v61, 0.0 }
 0x4ea   :  { %v1670_v62 = vadd.f32 %v1668_v14, %v1660_v19 }
 0x4eb   :  { %v1671_v21 = vadd.f32 %v1669_v18, %v1661_v20 }
 0x4f1   :  { %v1979_v7 = vpop.permute.xlu0 %1978 }
 0x4f2   :  { %v1984_v8 = vrot.slane %v1979_v7, %v3489_v45 }
 0x521   :  { %v1643_v22 = vpop.f32.mrb[26].mxu0 }
 0x522   :  { %v1644_v23 = vadd.f32 %v1643_v22, %v3532_v5  ;;  %v1645_v24 = vpop.f32.mrb[27].mxu0 }
 0x523   :  { %v1646_v25 = vadd.f32 %v1645_v24, %v3535_v10 }
 0x524   :  { %v1662_v35 = vmax.f32 %v1644_v23, 0.0 }
 0x525   :  { %v1663_v26 = vmax.f32 %v1646_v25, 0.0  ;;  %v1649_v27 = vpop.f32.mrb[28].mxu0 }
 0x526   :  { %v1672_v28 = vadd.f32 %v1670_v62, %v1662_v35  ;;  %v1650_v29 = vadd.f32 %v1649_v27, %v3532_v5  ;;  %v1651_v36 = vpop.f32.mrb[29].mxu0  ;;  %v2799_v5 = vpack.c.bf16 %v1887_v46, %v1885_v44 }
 0x527   :  { %v1673_v30 = vadd.f32 %v1671_v21, %v1663_v26  ;;  %v1652_v31 = vadd.f32 %v1651_v36, %v3535_v10  ;;  %v1745_v10 = vrot.slane %v1740_v49, %v3489_v45 }
 0x528   :  { %v1664_v32 = vmax.f32 %v1650_v29, 0.0  ;;  %2800 = vmatpush1.bf16.msra.mxu0 %v2799_v5 }
 0x529   :  { %v1665_v33 = vmax.f32 %v1652_v31, 0.0 }
 0x52a   :  { %v1674_v34 = vadd.f32 %v1672_v28, %v1664_v32 }
 0x52b   :  { %v1675_v37 = vadd.f32 %v1673_v30, %v1665_v33 }
 0x52d   :  { %1816 = vmatprep.mubr.f32.mxu1 %v1675_v37 }
 0x52e   :  { %1817 = vmatmul.mubr.f32.vlgmr.msra.gmra.mrb[18].mxu1 %v1674_v34 }
 0x52f   :  { %2060 = vmatprep.mubr.f32.mxu1 %v1993_v57 }
 0x601   :  { %v1818_v51 = vpop.f32.mrb[18].mxu1 }
 0x602   :  { %v1819_v52 = vadd.f32 %v1818_v51, %v1745_v10  ;;  %v1820_v53 = vpop.f32.mrb[19].mxu1 }
 0x603   :  { %v1821_v54 = vadd.f32 %v1820_v53, %v1749_v50 }
 0x604   :  { %v1823_v11 = vmax.f32 %v1819_v52, 0.0 }
 0x605   :  { %v1824_v55 = vmax.f32 %v1821_v54, 0.0 }
 0x607   :  { %1965 = vmatprep.mubr.f32.mxu0 %v1824_v55 }
 0x608   :  { %1966 = vmatmul.mubr.f32.vlgmr.msra.gmra.mrb[30].mxu0 %v1823_v11 }
 0x6db   :  { %v1967_v15 = vpop.f32.mrb[30].mxu0 }
 0x6dc   :  { %v1968_v1 = vadd.f32 %v1967_v15, %v1894_v63  ;;  %v1969_v48 = vpop.f32.mrb[31].mxu0 }
 0x6dd   :  { %v1970_v2 = vadd.f32 %v1969_v48, %v1898_v0 }
 0x6de   :  { %v1972_v4 = vmax.f32 %v1968_v1, 0.0 }
 0x6df   :  { %v1973_v3 = vmax.f32 %v1970_v2, 0.0 }
 0x6e1   :  { %1996 = vmatprep.subr.mxu1 %v1973_v3 }
 0x6e2   :  { %1997 = vmatpush1.xpose.msra.mxu1 %v1972_v4 }
 0x6e5   :  { %2061 = vmatmul.mubr.f32.vlgmr.msra.gmra.mrb[20].mxu1 %v1989_v6 }
 0x7b8   :  { %v2062_v9 = vpop.f32.mrb[20].mxu1 }
 0x7b9   :  { %v2063_v12 = vadd.f32 %v2062_v9, %v1984_v8  ;;  %v2064_v13 = vpop.f32.mrb[21].mxu1 }
 0x7bb   :  { %v2096_v14 = vmul.f32 -1.442695, %v2063_v12 }
 0x7bd   :  { %2822 = vpow2.f32 %v2096_v14 }
 0x7c7   :  { %v2823_v47 = vpop.eup %2822 }
 0x7c8   :  { %v2069_v16 = vadd.f32 1.0, %v2823_v47 }
 0x7ca   :  { %2824 = vrcp.f32 %v2069_v16 }
 0x7d4   :  { %v2825_v17 = vpop.eup %2824 }
 0x7d5   :  { %2073 = vst.msk [vmem:[#allocation27] sm:$0x1] %vm2072_vm0, %v2825_v17 }
 0x7d6   :  { %3146 = shalt.err (!%p3143_p4)
}
 0x7d7   :  { %s3147_s26 = scalar_lea.hbm %s3589_s15, 16 }
 0x7d8   :  { %p3148_p5 = scmp.ne.s32.totalorder %s3589_s15, %s3147_s26  ;;  %p3151_p6 = scmp.lt.u32.totalorder %s3147_s26, %s3589_s15 }
 0x7da   :  { %p3153_p7 = pnand %p3151_p6, %p3148_p5 }
 0x7dc   :  { %3156 = shalt.err (!%p3153_p7)
}
 0x7dd   :  { %2083 = dma.vmem_to_hbm [thread:$0]  %s2081_s14, 16, %s3589_s15, [#allocation6]  }
 0x7de   :  { %3173 = dma.done.wait [#allocation6], 16  }
 0x7df   :  { %3174 = vsyncadd [#allocation6], 4294967280 }
 0x7e0   :  { %2087 = vsyncpa [#allocation5], 1 }
 0x7e1   :  { %2088 = vsyncpa [#allocation8], 1 }
 0x7e2   :  { %2089 = vsyncpa [#allocation11], 1 }
 0x7e3   :  { %2090 = vsyncpa [#allocation14], 1 }
 0x7e4   :  { %2091 = vsyncpa [#allocation17], 1 }
 0x7e5   :  { %2092 = vsyncpa [#allocation20], 1 }
 0x7e6   :  { %2093 = vsyncpa [#allocation23], 1 }
 0x7e7   :  { %2094 = vsyncpa [#allocation26], 1 }
 0x7e8   :  { %2095 = vsyncpa [#allocation6], 1 }

</bundles_post_ra>
